<compile_context>
chip_gen: v6e
topology: v6e:2x2x1
jax: 0.10.0
libtpu: 0.0.40
codegen_flags: <defaults>
</compile_context>

<pallas_src>
import math

import jax
import jax.numpy as jnp
from jax.experimental import pallas as pl
from jax.experimental.pallas import tpu as pltpu


def _layer_norm(x, gamma, beta, eps=1e-5):
    mu = jnp.mean(x, axis=-1, keepdims=True)
    var = jnp.mean((x - mu) ** 2, axis=-1, keepdims=True)
    return (x - mu) * jax.lax.rsqrt(var + eps) * gamma + beta


def _make_encoder_kernel(B, S, D, H, L):
    hd = D // H
    scale = 1.0 / math.sqrt(hd)

    def kernel(x_ref, bias_ref,
               wqkv_ref, bqkv_ref, wo_ref, bo_ref,
               w1_ref, b1_ref, w2_ref, b2_ref,
               g1_ref, be1_ref, g2_ref, be2_ref,
               out_ref):
        x = x_ref[...]                        # (B, S, D) f32
        bias = bias_ref[...]                  # (B, 1, S) additive key-pad bias (hoisted)

        for l in range(L):                    # static unroll over encoder layers
            x2 = x.reshape(B * S, D)
            x_bf = x2.astype(jnp.bfloat16)    # MXU operands bf16, accumulate f32

            # --- fused QKV projection: one wide, lane-dense matmul ----------
            qkv = jnp.dot(x_bf, wqkv_ref[l],
                          preferred_element_type=jnp.float32) + bqkv_ref[l]
            qkv = qkv.reshape(B, S, 3 * D)
            q = (qkv[:, :, 0:D] * scale).astype(jnp.bfloat16)  # fold 1/sqrt(hd) into q
            k = qkv[:, :, D:2 * D].astype(jnp.bfloat16)
            v = qkv[:, :, 2 * D:3 * D].astype(jnp.bfloat16)

            # --- multi-head attention; heads folded into the out-projection
            # (no jnp.concatenate: concat(heads) @ Wo == sum_h head_h @ Wo_h)
            attn = jnp.zeros((B * S, D), jnp.float32)
            for h in range(H):                # static unroll over heads
                lo, hi = h * hd, (h + 1) * hd
                s = jnp.einsum('bqd,bkd->bqk', q[:, :, lo:hi], k[:, :, lo:hi],
                               preferred_element_type=jnp.float32)
                s = s + bias                                   # key padding mask
                s = s - jnp.max(s, axis=-1, keepdims=True)
                p = jnp.exp(s)
                p = p * pl.reciprocal(jnp.sum(p, axis=-1, keepdims=True),
                                      approx=True)
                oh = jnp.einsum('bqk,bkd->bqd', p.astype(jnp.bfloat16),
                                v[:, :, lo:hi],
                                preferred_element_type=jnp.float32)
                attn = attn + jnp.dot(
                    oh.reshape(B * S, hd).astype(jnp.bfloat16), wo_ref[l, h],
                    preferred_element_type=jnp.float32)
            attn = attn + bo_ref[l]

            # dropout layers are identity in eval mode; post-norm (norm_first=False)
            y = _layer_norm(x2 + attn, g1_ref[l], be1_ref[l])

            # --- feed-forward (ReLU); elementwise math stays f32 -------------
            ff = jnp.dot(y.astype(jnp.bfloat16), w1_ref[l],
                         preferred_element_type=jnp.float32) + b1_ref[l]
            ff = jnp.maximum(ff, 0.0)
            ff = jnp.dot(ff.astype(jnp.bfloat16), w2_ref[l],
                         preferred_element_type=jnp.float32) + b2_ref[l]
            y = _layer_norm(y + ff, g2_ref[l], be2_ref[l])

            x = y.reshape(B, S, D)

        out_ref[...] = x[:, S - 1, :]         # (B, D) last-token features

    return kernel


def _classifier_kernel(x_ref, w_ref, b_ref, out_ref):
    # (B, D) @ (D, TILE_N) per grid step; lane-dense (TILE_N % 128 == 0) output.
    x = x_ref[...].astype(jnp.bfloat16)
    out_ref[...] = (jnp.dot(x, w_ref[...], preferred_element_type=jnp.float32)
                    + b_ref[...])


def transformer_playlist_forward(params, input_ids, attention_mask=None):
    emb = params['emb']
    pe = params['pe']
    B, S = input_ids.shape
    D = emb.shape[1]
    H = params['nhead']
    L = params['num_layers']
    hd = D // H
    F = params['w1_t'].shape[-1]
    num_songs = params['wout_t'].shape[1]
    bf16 = jnp.bfloat16

    # Glue: embedding gather + positional encoding (dropout identity in eval).
    x = (jnp.take(emb, input_ids, axis=0) + pe[:S][None, :, :]).astype(jnp.float32)

    # Key-padding bias, shaped (B, 1, S) so the kernel never re-broadcasts it.
    if attention_mask is None:
        bias = jnp.zeros((B, 1, S), jnp.float32)
    else:
        bias = jnp.where(attention_mask == 0, -1e9, 0.0).astype(jnp.float32)[:, None, :]

    # Weight packing: matmul operands in bf16; Wo pre-split per head so the
    # kernel indexes it on leading axes only (no lane slicing of weights).
    wo_heads = params['wo_t'].reshape(L, H, hd, D).astype(bf16)
    enc_args = (
        x, bias,
        params['wqkv_t'].astype(bf16), params['bqkv'],
        wo_heads, params['bo'],
        params['w1_t'].astype(bf16), params['b1'],
        params['w2_t'].astype(bf16), params['b2'],
        params['g1'], params['be1'], params['g2'], params['be2'],
    )

    enc_flops = (2 * L * B * S * (3 * D * D + D * D + 2 * D * F)
                 + 4 * L * B * H * S * S * hd)
    enc_bytes = sum(int(a.size) * a.dtype.itemsize for a in enc_args) + B * D * 4
    x_last = pl.pallas_call(
        _make_encoder_kernel(B, S, D, H, L),
        out_shape=jax.ShapeDtypeStruct((B, D), jnp.float32),
        in_specs=[pl.BlockSpec(memory_space=pltpu.MemorySpace.VMEM)] * len(enc_args),
        out_specs=pl.BlockSpec(memory_space=pltpu.MemorySpace.VMEM),
        cost_estimate=pl.CostEstimate(flops=enc_flops,
                                      transcendentals=L * B * H * S * S,
                                      bytes_accessed=enc_bytes),
    )(*enc_args)
    # TODO(synk): for deeper models, stream per-layer weights (grid over L or
    # manual double-buffering) instead of holding all layers resident in VMEM.

    # --- classifier: tiled over the (potentially huge) song catalog ----------
    TILE_N = 512 if num_songs > 512 else 128
    n_pad = pl.cdiv(num_songs, TILE_N) * TILE_N
    wout = params['wout_t'].astype(bf16)
    bout = params['bout']
    if n_pad != num_songs:
        wout = jnp.pad(wout, ((0, 0), (0, n_pad - num_songs)))
        bout = jnp.pad(bout, ((0, 0), (0, n_pad - num_songs)))

    logits = pl.pallas_call(
        _classifier_kernel,
        out_shape=jax.ShapeDtypeStruct((B, n_pad), jnp.float32),
        grid=(n_pad // TILE_N,),
        in_specs=[
            pl.BlockSpec((B, D), lambda j: (0, 0)),        # last-token features
            pl.BlockSpec((D, TILE_N), lambda j: (0, j)),   # weight tile (bf16)
            pl.BlockSpec((1, TILE_N), lambda j: (0, j)),   # bias tile
        ],
        out_specs=pl.BlockSpec((B, TILE_N), lambda j: (0, j)),
        compiler_params=pltpu.CompilerParams(
            dimension_semantics=("parallel",)),            # v7x megacore split
        cost_estimate=pl.CostEstimate(
            flops=2 * B * D * n_pad, transcendentals=0,
            bytes_accessed=B * D * 4 + D * n_pad * 2 + (B + 1) * n_pad * 4),
    )(x_last, wout, bout)

    return logits[:, :num_songs]


def init_params(key, num_songs, D, H=8, L=2, max_len=64):
    F = 4 * D
    ks = iter(jax.random.split(key, 4 * L + 2))

    emb = jax.random.normal(next(ks), (num_songs + 1, D), jnp.float32) * 0.02
    emb = emb.at[num_songs].set(0.0)          # padding_idx row is zeroed

    # Sinusoidal positional encoding (same formula as PositionalEncoding).
    position = jnp.arange(max_len, dtype=jnp.float32)[:, None]
    div_term = jnp.exp(jnp.arange(0, D, 2, dtype=jnp.float32)
                       * (-math.log(10000.0) / D))
    pe = jnp.zeros((max_len, D), jnp.float32)
    pe = pe.at[:, 0::2].set(jnp.sin(position * div_term))
    pe = pe.at[:, 1::2].set(jnp.cos(position * div_term))

    wqkv_t, wo_t, w1_t, w2_t = [], [], [], []
    for _ in range(L):
        wqkv_t.append(jax.random.normal(next(ks), (D, 3 * D), jnp.float32) * 0.02)
        wo_t.append(jax.random.normal(next(ks), (D, D), jnp.float32) * 0.02)
        w1_t.append(jax.random.normal(next(ks), (D, F), jnp.float32) * 0.02)
        w2_t.append(jax.random.normal(next(ks), (F, D), jnp.float32) * 0.02)

    params = dict(
        emb=emb, pe=pe, nhead=H, num_layers=L,
        wqkv_t=jnp.stack(wqkv_t), bqkv=jnp.zeros((L, 1, 3 * D), jnp.float32),
        wo_t=jnp.stack(wo_t),     bo=jnp.zeros((L, 1, D), jnp.float32),
        w1_t=jnp.stack(w1_t),     b1=jnp.zeros((L, 1, F), jnp.float32),
        w2_t=jnp.stack(w2_t),     b2=jnp.zeros((L, 1, D), jnp.float32),
        g1=jnp.ones((L, 1, D), jnp.float32),  be1=jnp.zeros((L, 1, D), jnp.float32),
        g2=jnp.ones((L, 1, D), jnp.float32),  be2=jnp.zeros((L, 1, D), jnp.float32),
        wout_t=jax.random.normal(next(ks), (D, num_songs), jnp.float32) * 0.02,
        bout=jnp.zeros((1, num_songs), jnp.float32),
    )
    return params


if __name__ == "__main__":
    num_songs, D, H, L = 64, 32, 8, 2
    B, S = 2, 8

    key = jax.random.PRNGKey(0)
    pkey, dkey = jax.random.split(key)

    params = init_params(pkey, num_songs, D, H, L)
    input_ids = jax.random.randint(dkey, (B, S), 0, num_songs, dtype=jnp.int32)
    attention_mask = jnp.ones((B, S), jnp.int32)   # no padding

    logits = transformer_playlist_forward(params, input_ids, attention_mask)
    jax.block_until_ready(logits)
    assert logits.shape == (B, num_songs) and logits.dtype == jnp.float32
    assert bool(jnp.all(jnp.isfinite(logits)))

    print("KERNEL_OK")
</pallas_src>

<mosaic_0001>
module attributes {stable_mosaic.version = 11 : i64} {
  func.func @kernel(%arg0: memref<2x8x32xf32, #tpu.memory_space<vmem>>, %arg1: memref<2x1x8xf32, #tpu.memory_space<vmem>>, %arg2: memref<2x32x96xbf16, #tpu.memory_space<vmem>>, %arg3: memref<2x1x96xf32, #tpu.memory_space<vmem>>, %arg4: memref<2x8x4x32xbf16, #tpu.memory_space<vmem>>, %arg5: memref<2x1x32xf32, #tpu.memory_space<vmem>>, %arg6: memref<2x32x128xbf16, #tpu.memory_space<vmem>>, %arg7: memref<2x1x128xf32, #tpu.memory_space<vmem>>, %arg8: memref<2x128x32xbf16, #tpu.memory_space<vmem>>, %arg9: memref<2x1x32xf32, #tpu.memory_space<vmem>>, %arg10: memref<2x1x32xf32, #tpu.memory_space<vmem>>, %arg11: memref<2x1x32xf32, #tpu.memory_space<vmem>>, %arg12: memref<2x1x32xf32, #tpu.memory_space<vmem>>, %arg13: memref<2x1x32xf32, #tpu.memory_space<vmem>>, %arg14: memref<2x32xf32, #tpu.memory_space<vmem>>) attributes {dimension_semantics = [], scalar_prefetch = 0 : i64, scratch_operands = 0 : i64, tpu.core_type = #tpu.core_type<tc>} {
    %c0 = arith.constant 0 : index
    %c0_0 = arith.constant 0 : index
    %c0_1 = arith.constant 0 : index
    %0 = vector.load %arg0[%c0, %c0_0, %c0_1] : memref<2x8x32xf32, #tpu.memory_space<vmem>>, vector<2x8x32xf32>
    %c0_2 = arith.constant 0 : index
    %c0_3 = arith.constant 0 : index
    %c0_4 = arith.constant 0 : index
    %1 = vector.load %arg1[%c0_2, %c0_3, %c0_4] : memref<2x1x8xf32, #tpu.memory_space<vmem>>, vector<2x1x8xf32>
    %2 = vector.shape_cast %0 : vector<2x8x32xf32> to vector<16x32xf32>
    %3 = arith.truncf %2 : vector<16x32xf32> to vector<16x32xbf16>
    %c0_5 = arith.constant 0 : index
    %c0_6 = arith.constant 0 : index
    %c0_7 = arith.constant 0 : index
    %4 = vector.load %arg2[%c0_5, %c0_6, %c0_7] : memref<2x32x96xbf16, #tpu.memory_space<vmem>>, vector<1x32x96xbf16>
    %5 = vector.shape_cast %4 : vector<1x32x96xbf16> to vector<32x96xbf16>
    %cst = arith.constant dense<0.000000e+00> : vector<16x96xf32>
    %6 = tpu.matmul %3, %5, %cst {dimension_numbers = #tpu.dot_dimension_numbers<[1], [0], [0], [1], [0, 0, 1, 1], [], []>} : vector<16x32xbf16>, vector<32x96xbf16>, vector<16x96xf32> -> vector<16x96xf32>
    %c0_8 = arith.constant 0 : index
    %c0_9 = arith.constant 0 : index
    %c0_10 = arith.constant 0 : index
    %7 = vector.load %arg3[%c0_8, %c0_9, %c0_10] : memref<2x1x96xf32, #tpu.memory_space<vmem>>, vector<1x1x96xf32>
    %8 = vector.shape_cast %7 : vector<1x1x96xf32> to vector<1x96xf32>
    %9 = vector.broadcast %8 : vector<1x96xf32> to vector<16x96xf32>
    %10 = arith.addf %6, %9 : vector<16x96xf32>
    %11 = vector.shape_cast %10 : vector<16x96xf32> to vector<2x8x96xf32>
    %12 = vector.extract_strided_slice %11 {offsets = [0, 0, 0], sizes = [2, 8, 32], strides = [1, 1, 1]} : vector<2x8x96xf32> to vector<2x8x32xf32>
    %cst_11 = arith.constant 5.000000e-01 : f32
    %13 = vector.broadcast %cst_11 : f32 to vector<2x8x32xf32>
    %14 = arith.mulf %12, %13 : vector<2x8x32xf32>
    %15 = arith.truncf %14 : vector<2x8x32xf32> to vector<2x8x32xbf16>
    %16 = vector.extract_strided_slice %11 {offsets = [0, 0, 32], sizes = [2, 8, 32], strides = [1, 1, 1]} : vector<2x8x96xf32> to vector<2x8x32xf32>
    %17 = arith.truncf %16 : vector<2x8x32xf32> to vector<2x8x32xbf16>
    %18 = vector.extract_strided_slice %11 {offsets = [0, 0, 64], sizes = [2, 8, 32], strides = [1, 1, 1]} : vector<2x8x96xf32> to vector<2x8x32xf32>
    %19 = arith.truncf %18 : vector<2x8x32xf32> to vector<2x8x32xbf16>
    %cst_12 = arith.constant 0.000000e+00 : f32
    %20 = vector.broadcast %cst_12 : f32 to vector<16x32xf32>
    %21 = vector.extract_strided_slice %15 {offsets = [0, 0, 0], sizes = [2, 8, 4], strides = [1, 1, 1]} : vector<2x8x32xbf16> to vector<2x8x4xbf16>
    %22 = vector.extract_strided_slice %17 {offsets = [0, 0, 0], sizes = [2, 8, 4], strides = [1, 1, 1]} : vector<2x8x32xbf16> to vector<2x8x4xbf16>
    "tpu.trace_start"() <{level = 10 : i32, message = "bqd,bkd->bqk"}> : () -> ()
    %cst_13 = arith.constant dense<0.000000e+00> : vector<2x8x8xf32>
    %23 = tpu.matmul %21, %22, %cst_13 {dimension_numbers = #tpu.dot_dimension_numbers<[2], [2], [1], [1], [0, 0, 0, 1, 1, 1], [0], [0]>} : vector<2x8x4xbf16>, vector<2x8x4xbf16>, vector<2x8x8xf32> -> vector<2x8x8xf32>
    "tpu.trace_stop"() : () -> ()
    %24 = vector.broadcast %1 : vector<2x1x8xf32> to vector<2x8x8xf32>
    %25 = arith.addf %23, %24 : vector<2x8x8xf32>
    %cst_14 = arith.constant dense<0xFF800000> : vector<2x8xf32>
    %26 = vector.multi_reduction <maximumf>, %25, %cst_14 [2] : vector<2x8x8xf32> to vector<2x8xf32>
    %27 = vector.shape_cast %26 : vector<2x8xf32> to vector<2x8x1xf32>
    %28 = vector.broadcast %27 : vector<2x8x1xf32> to vector<2x8x8xf32>
    %29 = arith.subf %25, %28 : vector<2x8x8xf32>
    %30 = math.exp %29 : vector<2x8x8xf32>
    %cst_15 = arith.constant dense<0.000000e+00> : vector<2x8xf32>
    %31 = vector.multi_reduction <add>, %30, %cst_15 [2] : vector<2x8x8xf32> to vector<2x8xf32>
    %32 = vector.shape_cast %31 : vector<2x8xf32> to vector<2x8x1xf32>
    %33 = tpu.reciprocal %32 {approx = true} : vector<2x8x1xf32> -> vector<2x8x1xf32>
    %34 = vector.broadcast %33 : vector<2x8x1xf32> to vector<2x8x8xf32>
    %35 = arith.mulf %30, %34 : vector<2x8x8xf32>
    %36 = arith.truncf %35 : vector<2x8x8xf32> to vector<2x8x8xbf16>
    %37 = vector.extract_strided_slice %19 {offsets = [0, 0, 0], sizes = [2, 8, 4], strides = [1, 1, 1]} : vector<2x8x32xbf16> to vector<2x8x4xbf16>
    "tpu.trace_start"() <{level = 10 : i32, message = "bqk,bkd->bqd"}> : () -> ()
    %cst_16 = arith.constant dense<0.000000e+00> : vector<2x8x4xf32>
    %38 = tpu.matmul %36, %37, %cst_16 {dimension_numbers = #tpu.dot_dimension_numbers<[2], [1], [1], [2], [0, 0, 0, 1, 1, 2], [0], [0]>} : vector<2x8x8xbf16>, vector<2x8x4xbf16>, vector<2x8x4xf32> -> vector<2x8x4xf32>
    "tpu.trace_stop"() : () -> ()
    %39 = vector.shape_cast %38 : vector<2x8x4xf32> to vector<16x4xf32>
    %40 = arith.truncf %39 : vector<16x4xf32> to vector<16x4xbf16>
    %c0_17 = arith.constant 0 : index
    %c0_18 = arith.constant 0 : index
    %c0_19 = arith.constant 0 : index
    %c0_20 = arith.constant 0 : index
    %41 = vector.load %arg4[%c0_17, %c0_18, %c0_19, %c0_20] : memref<2x8x4x32xbf16, #tpu.memory_space<vmem>>, vector<1x1x4x32xbf16>
    %42 = vector.shape_cast %41 : vector<1x1x4x32xbf16> to vector<4x32xbf16>
    %cst_21 = arith.constant dense<0.000000e+00> : vector<16x32xf32>
    %43 = tpu.matmul %40, %42, %cst_21 {dimension_numbers = #tpu.dot_dimension_numbers<[1], [0], [0], [1], [0, 0, 1, 1], [], []>} : vector<16x4xbf16>, vector<4x32xbf16>, vector<16x32xf32> -> vector<16x32xf32>
    %44 = arith.addf %20, %43 : vector<16x32xf32>
    %45 = vector.extract_strided_slice %15 {offsets = [0, 0, 4], sizes = [2, 8, 4], strides = [1, 1, 1]} : vector<2x8x32xbf16> to vector<2x8x4xbf16>
    %46 = vector.extract_strided_slice %17 {offsets = [0, 0, 4], sizes = [2, 8, 4], strides = [1, 1, 1]} : vector<2x8x32xbf16> to vector<2x8x4xbf16>
    "tpu.trace_start"() <{level = 10 : i32, message = "bqd,bkd->bqk"}> : () -> ()
    %cst_22 = arith.constant dense<0.000000e+00> : vector<2x8x8xf32>
    %47 = tpu.matmul %45, %46, %cst_22 {dimension_numbers = #tpu.dot_dimension_numbers<[2], [2], [1], [1], [0, 0, 0, 1, 1, 1], [0], [0]>} : vector<2x8x4xbf16>, vector<2x8x4xbf16>, vector<2x8x8xf32> -> vector<2x8x8xf32>
    "tpu.trace_stop"() : () -> ()
    %48 = vector.broadcast %1 : vector<2x1x8xf32> to vector<2x8x8xf32>
    %49 = arith.addf %47, %48 : vector<2x8x8xf32>
    %cst_23 = arith.constant dense<0xFF800000> : vector<2x8xf32>
    %50 = vector.multi_reduction <maximumf>, %49, %cst_23 [2] : vector<2x8x8xf32> to vector<2x8xf32>
    %51 = vector.shape_cast %50 : vector<2x8xf32> to vector<2x8x1xf32>
    %52 = vector.broadcast %51 : vector<2x8x1xf32> to vector<2x8x8xf32>
    %53 = arith.subf %49, %52 : vector<2x8x8xf32>
    %54 = math.exp %53 : vector<2x8x8xf32>
    %cst_24 = arith.constant dense<0.000000e+00> : vector<2x8xf32>
    %55 = vector.multi_reduction <add>, %54, %cst_24 [2] : vector<2x8x8xf32> to vector<2x8xf32>
    %56 = vector.shape_cast %55 : vector<2x8xf32> to vector<2x8x1xf32>
    %57 = tpu.reciprocal %56 {approx = true} : vector<2x8x1xf32> -> vector<2x8x1xf32>
    %58 = vector.broadcast %57 : vector<2x8x1xf32> to vector<2x8x8xf32>
    %59 = arith.mulf %54, %58 : vector<2x8x8xf32>
    %60 = arith.truncf %59 : vector<2x8x8xf32> to vector<2x8x8xbf16>
    %61 = vector.extract_strided_slice %19 {offsets = [0, 0, 4], sizes = [2, 8, 4], strides = [1, 1, 1]} : vector<2x8x32xbf16> to vector<2x8x4xbf16>
    "tpu.trace_start"() <{level = 10 : i32, message = "bqk,bkd->bqd"}> : () -> ()
    %cst_25 = arith.constant dense<0.000000e+00> : vector<2x8x4xf32>
    %62 = tpu.matmul %60, %61, %cst_25 {dimension_numbers = #tpu.dot_dimension_numbers<[2], [1], [1], [2], [0, 0, 0, 1, 1, 2], [0], [0]>} : vector<2x8x8xbf16>, vector<2x8x4xbf16>, vector<2x8x4xf32> -> vector<2x8x4xf32>
    "tpu.trace_stop"() : () -> ()
    %63 = vector.shape_cast %62 : vector<2x8x4xf32> to vector<16x4xf32>
    %64 = arith.truncf %63 : vector<16x4xf32> to vector<16x4xbf16>
    %c0_26 = arith.constant 0 : index
    %c1 = arith.constant 1 : index
    %c0_27 = arith.constant 0 : index
    %c0_28 = arith.constant 0 : index
    %65 = vector.load %arg4[%c0_26, %c1, %c0_27, %c0_28] : memref<2x8x4x32xbf16, #tpu.memory_space<vmem>>, vector<1x1x4x32xbf16>
    %66 = vector.shape_cast %65 : vector<1x1x4x32xbf16> to vector<4x32xbf16>
    %cst_29 = arith.constant dense<0.000000e+00> : vector<16x32xf32>
    %67 = tpu.matmul %64, %66, %cst_29 {dimension_numbers = #tpu.dot_dimension_numbers<[1], [0], [0], [1], [0, 0, 1, 1], [], []>} : vector<16x4xbf16>, vector<4x32xbf16>, vector<16x32xf32> -> vector<16x32xf32>
    %68 = arith.addf %44, %67 : vector<16x32xf32>
    %69 = vector.extract_strided_slice %15 {offsets = [0, 0, 8], sizes = [2, 8, 4], strides = [1, 1, 1]} : vector<2x8x32xbf16> to vector<2x8x4xbf16>
    %70 = vector.extract_strided_slice %17 {offsets = [0, 0, 8], sizes = [2, 8, 4], strides = [1, 1, 1]} : vector<2x8x32xbf16> to vector<2x8x4xbf16>
    "tpu.trace_start"() <{level = 10 : i32, message = "bqd,bkd->bqk"}> : () -> ()
    %cst_30 = arith.constant dense<0.000000e+00> : vector<2x8x8xf32>
    %71 = tpu.matmul %69, %70, %cst_30 {dimension_numbers = #tpu.dot_dimension_numbers<[2], [2], [1], [1], [0, 0, 0, 1, 1, 1], [0], [0]>} : vector<2x8x4xbf16>, vector<2x8x4xbf16>, vector<2x8x8xf32> -> vector<2x8x8xf32>
    "tpu.trace_stop"() : () -> ()
    %72 = vector.broadcast %1 : vector<2x1x8xf32> to vector<2x8x8xf32>
    %73 = arith.addf %71, %72 : vector<2x8x8xf32>
    %cst_31 = arith.constant dense<0xFF800000> : vector<2x8xf32>
    %74 = vector.multi_reduction <maximumf>, %73, %cst_31 [2] : vector<2x8x8xf32> to vector<2x8xf32>
    %75 = vector.shape_cast %74 : vector<2x8xf32> to vector<2x8x1xf32>
    %76 = vector.broadcast %75 : vector<2x8x1xf32> to vector<2x8x8xf32>
    %77 = arith.subf %73, %76 : vector<2x8x8xf32>
    %78 = math.exp %77 : vector<2x8x8xf32>
    %cst_32 = arith.constant dense<0.000000e+00> : vector<2x8xf32>
    %79 = vector.multi_reduction <add>, %78, %cst_32 [2] : vector<2x8x8xf32> to vector<2x8xf32>
    %80 = vector.shape_cast %79 : vector<2x8xf32> to vector<2x8x1xf32>
    %81 = tpu.reciprocal %80 {approx = true} : vector<2x8x1xf32> -> vector<2x8x1xf32>
    %82 = vector.broadcast %81 : vector<2x8x1xf32> to vector<2x8x8xf32>
    %83 = arith.mulf %78, %82 : vector<2x8x8xf32>
    %84 = arith.truncf %83 : vector<2x8x8xf32> to vector<2x8x8xbf16>
    %85 = vector.extract_strided_slice %19 {offsets = [0, 0, 8], sizes = [2, 8, 4], strides = [1, 1, 1]} : vector<2x8x32xbf16> to vector<2x8x4xbf16>
    "tpu.trace_start"() <{level = 10 : i32, message = "bqk,bkd->bqd"}> : () -> ()
    %cst_33 = arith.constant dense<0.000000e+00> : vector<2x8x4xf32>
    %86 = tpu.matmul %84, %85, %cst_33 {dimension_numbers = #tpu.dot_dimension_numbers<[2], [1], [1], [2], [0, 0, 0, 1, 1, 2], [0], [0]>} : vector<2x8x8xbf16>, vector<2x8x4xbf16>, vector<2x8x4xf32> -> vector<2x8x4xf32>
    "tpu.trace_stop"() : () -> ()
    %87 = vector.shape_cast %86 : vector<2x8x4xf32> to vector<16x4xf32>
    %88 = arith.truncf %87 : vector<16x4xf32> to vector<16x4xbf16>
    %c0_34 = arith.constant 0 : index
    %c2 = arith.constant 2 : index
    %c0_35 = arith.constant 0 : index
    %c0_36 = arith.constant 0 : index
    %89 = vector.load %arg4[%c0_34, %c2, %c0_35, %c0_36] : memref<2x8x4x32xbf16, #tpu.memory_space<vmem>>, vector<1x1x4x32xbf16>
    %90 = vector.shape_cast %89 : vector<1x1x4x32xbf16> to vector<4x32xbf16>
    %cst_37 = arith.constant dense<0.000000e+00> : vector<16x32xf32>
    %91 = tpu.matmul %88, %90, %cst_37 {dimension_numbers = #tpu.dot_dimension_numbers<[1], [0], [0], [1], [0, 0, 1, 1], [], []>} : vector<16x4xbf16>, vector<4x32xbf16>, vector<16x32xf32> -> vector<16x32xf32>
    %92 = arith.addf %68, %91 : vector<16x32xf32>
    %93 = vector.extract_strided_slice %15 {offsets = [0, 0, 12], sizes = [2, 8, 4], strides = [1, 1, 1]} : vector<2x8x32xbf16> to vector<2x8x4xbf16>
    %94 = vector.extract_strided_slice %17 {offsets = [0, 0, 12], sizes = [2, 8, 4], strides = [1, 1, 1]} : vector<2x8x32xbf16> to vector<2x8x4xbf16>
    "tpu.trace_start"() <{level = 10 : i32, message = "bqd,bkd->bqk"}> : () -> ()
    %cst_38 = arith.constant dense<0.000000e+00> : vector<2x8x8xf32>
    %95 = tpu.matmul %93, %94, %cst_38 {dimension_numbers = #tpu.dot_dimension_numbers<[2], [2], [1], [1], [0, 0, 0, 1, 1, 1], [0], [0]>} : vector<2x8x4xbf16>, vector<2x8x4xbf16>, vector<2x8x8xf32> -> vector<2x8x8xf32>
    "tpu.trace_stop"() : () -> ()
    %96 = vector.broadcast %1 : vector<2x1x8xf32> to vector<2x8x8xf32>
    %97 = arith.addf %95, %96 : vector<2x8x8xf32>
    %cst_39 = arith.constant dense<0xFF800000> : vector<2x8xf32>
    %98 = vector.multi_reduction <maximumf>, %97, %cst_39 [2] : vector<2x8x8xf32> to vector<2x8xf32>
    %99 = vector.shape_cast %98 : vector<2x8xf32> to vector<2x8x1xf32>
    %100 = vector.broadcast %99 : vector<2x8x1xf32> to vector<2x8x8xf32>
    %101 = arith.subf %97, %100 : vector<2x8x8xf32>
    %102 = math.exp %101 : vector<2x8x8xf32>
    %cst_40 = arith.constant dense<0.000000e+00> : vector<2x8xf32>
    %103 = vector.multi_reduction <add>, %102, %cst_40 [2] : vector<2x8x8xf32> to vector<2x8xf32>
    %104 = vector.shape_cast %103 : vector<2x8xf32> to vector<2x8x1xf32>
    %105 = tpu.reciprocal %104 {approx = true} : vector<2x8x1xf32> -> vector<2x8x1xf32>
    %106 = vector.broadcast %105 : vector<2x8x1xf32> to vector<2x8x8xf32>
    %107 = arith.mulf %102, %106 : vector<2x8x8xf32>
    %108 = arith.truncf %107 : vector<2x8x8xf32> to vector<2x8x8xbf16>
    %109 = vector.extract_strided_slice %19 {offsets = [0, 0, 12], sizes = [2, 8, 4], strides = [1, 1, 1]} : vector<2x8x32xbf16> to vector<2x8x4xbf16>
    "tpu.trace_start"() <{level = 10 : i32, message = "bqk,bkd->bqd"}> : () -> ()
    %cst_41 = arith.constant dense<0.000000e+00> : vector<2x8x4xf32>
    %110 = tpu.matmul %108, %109, %cst_41 {dimension_numbers = #tpu.dot_dimension_numbers<[2], [1], [1], [2], [0, 0, 0, 1, 1, 2], [0], [0]>} : vector<2x8x8xbf16>, vector<2x8x4xbf16>, vector<2x8x4xf32> -> vector<2x8x4xf32>
    "tpu.trace_stop"() : () -> ()
    %111 = vector.shape_cast %110 : vector<2x8x4xf32> to vector<16x4xf32>
    %112 = arith.truncf %111 : vector<16x4xf32> to vector<16x4xbf16>
    %c0_42 = arith.constant 0 : index
    %c3 = arith.constant 3 : index
    %c0_43 = arith.constant 0 : index
    %c0_44 = arith.constant 0 : index
    %113 = vector.load %arg4[%c0_42, %c3, %c0_43, %c0_44] : memref<2x8x4x32xbf16, #tpu.memory_space<vmem>>, vector<1x1x4x32xbf16>
    %114 = vector.shape_cast %113 : vector<1x1x4x32xbf16> to vector<4x32xbf16>
    %cst_45 = arith.constant dense<0.000000e+00> : vector<16x32xf32>
    %115 = tpu.matmul %112, %114, %cst_45 {dimension_numbers = #tpu.dot_dimension_numbers<[1], [0], [0], [1], [0, 0, 1, 1], [], []>} : vector<16x4xbf16>, vector<4x32xbf16>, vector<16x32xf32> -> vector<16x32xf32>
    %116 = arith.addf %92, %115 : vector<16x32xf32>
    %117 = vector.extract_strided_slice %15 {offsets = [0, 0, 16], sizes = [2, 8, 4], strides = [1, 1, 1]} : vector<2x8x32xbf16> to vector<2x8x4xbf16>
    %118 = vector.extract_strided_slice %17 {offsets = [0, 0, 16], sizes = [2, 8, 4], strides = [1, 1, 1]} : vector<2x8x32xbf16> to vector<2x8x4xbf16>
    "tpu.trace_start"() <{level = 10 : i32, message = "bqd,bkd->bqk"}> : () -> ()
    %cst_46 = arith.constant dense<0.000000e+00> : vector<2x8x8xf32>
    %119 = tpu.matmul %117, %118, %cst_46 {dimension_numbers = #tpu.dot_dimension_numbers<[2], [2], [1], [1], [0, 0, 0, 1, 1, 1], [0], [0]>} : vector<2x8x4xbf16>, vector<2x8x4xbf16>, vector<2x8x8xf32> -> vector<2x8x8xf32>
    "tpu.trace_stop"() : () -> ()
    %120 = vector.broadcast %1 : vector<2x1x8xf32> to vector<2x8x8xf32>
    %121 = arith.addf %119, %120 : vector<2x8x8xf32>
    %cst_47 = arith.constant dense<0xFF800000> : vector<2x8xf32>
    %122 = vector.multi_reduction <maximumf>, %121, %cst_47 [2] : vector<2x8x8xf32> to vector<2x8xf32>
    %123 = vector.shape_cast %122 : vector<2x8xf32> to vector<2x8x1xf32>
    %124 = vector.broadcast %123 : vector<2x8x1xf32> to vector<2x8x8xf32>
    %125 = arith.subf %121, %124 : vector<2x8x8xf32>
    %126 = math.exp %125 : vector<2x8x8xf32>
    %cst_48 = arith.constant dense<0.000000e+00> : vector<2x8xf32>
    %127 = vector.multi_reduction <add>, %126, %cst_48 [2] : vector<2x8x8xf32> to vector<2x8xf32>
    %128 = vector.shape_cast %127 : vector<2x8xf32> to vector<2x8x1xf32>
    %129 = tpu.reciprocal %128 {approx = true} : vector<2x8x1xf32> -> vector<2x8x1xf32>
    %130 = vector.broadcast %129 : vector<2x8x1xf32> to vector<2x8x8xf32>
    %131 = arith.mulf %126, %130 : vector<2x8x8xf32>
    %132 = arith.truncf %131 : vector<2x8x8xf32> to vector<2x8x8xbf16>
    %133 = vector.extract_strided_slice %19 {offsets = [0, 0, 16], sizes = [2, 8, 4], strides = [1, 1, 1]} : vector<2x8x32xbf16> to vector<2x8x4xbf16>
    "tpu.trace_start"() <{level = 10 : i32, message = "bqk,bkd->bqd"}> : () -> ()
    %cst_49 = arith.constant dense<0.000000e+00> : vector<2x8x4xf32>
    %134 = tpu.matmul %132, %133, %cst_49 {dimension_numbers = #tpu.dot_dimension_numbers<[2], [1], [1], [2], [0, 0, 0, 1, 1, 2], [0], [0]>} : vector<2x8x8xbf16>, vector<2x8x4xbf16>, vector<2x8x4xf32> -> vector<2x8x4xf32>
    "tpu.trace_stop"() : () -> ()
    %135 = vector.shape_cast %134 : vector<2x8x4xf32> to vector<16x4xf32>
    %136 = arith.truncf %135 : vector<16x4xf32> to vector<16x4xbf16>
    %c0_50 = arith.constant 0 : index
    %c4 = arith.constant 4 : index
    %c0_51 = arith.constant 0 : index
    %c0_52 = arith.constant 0 : index
    %137 = vector.load %arg4[%c0_50, %c4, %c0_51, %c0_52] : memref<2x8x4x32xbf16, #tpu.memory_space<vmem>>, vector<1x1x4x32xbf16>
    %138 = vector.shape_cast %137 : vector<1x1x4x32xbf16> to vector<4x32xbf16>
    %cst_53 = arith.constant dense<0.000000e+00> : vector<16x32xf32>
    %139 = tpu.matmul %136, %138, %cst_53 {dimension_numbers = #tpu.dot_dimension_numbers<[1], [0], [0], [1], [0, 0, 1, 1], [], []>} : vector<16x4xbf16>, vector<4x32xbf16>, vector<16x32xf32> -> vector<16x32xf32>
    %140 = arith.addf %116, %139 : vector<16x32xf32>
    %141 = vector.extract_strided_slice %15 {offsets = [0, 0, 20], sizes = [2, 8, 4], strides = [1, 1, 1]} : vector<2x8x32xbf16> to vector<2x8x4xbf16>
    %142 = vector.extract_strided_slice %17 {offsets = [0, 0, 20], sizes = [2, 8, 4], strides = [1, 1, 1]} : vector<2x8x32xbf16> to vector<2x8x4xbf16>
    "tpu.trace_start"() <{level = 10 : i32, message = "bqd,bkd->bqk"}> : () -> ()
    %cst_54 = arith.constant dense<0.000000e+00> : vector<2x8x8xf32>
    %143 = tpu.matmul %141, %142, %cst_54 {dimension_numbers = #tpu.dot_dimension_numbers<[2], [2], [1], [1], [0, 0, 0, 1, 1, 1], [0], [0]>} : vector<2x8x4xbf16>, vector<2x8x4xbf16>, vector<2x8x8xf32> -> vector<2x8x8xf32>
    "tpu.trace_stop"() : () -> ()
    %144 = vector.broadcast %1 : vector<2x1x8xf32> to vector<2x8x8xf32>
    %145 = arith.addf %143, %144 : vector<2x8x8xf32>
    %cst_55 = arith.constant dense<0xFF800000> : vector<2x8xf32>
    %146 = vector.multi_reduction <maximumf>, %145, %cst_55 [2] : vector<2x8x8xf32> to vector<2x8xf32>
    %147 = vector.shape_cast %146 : vector<2x8xf32> to vector<2x8x1xf32>
    %148 = vector.broadcast %147 : vector<2x8x1xf32> to vector<2x8x8xf32>
    %149 = arith.subf %145, %148 : vector<2x8x8xf32>
    %150 = math.exp %149 : vector<2x8x8xf32>
    %cst_56 = arith.constant dense<0.000000e+00> : vector<2x8xf32>
    %151 = vector.multi_reduction <add>, %150, %cst_56 [2] : vector<2x8x8xf32> to vector<2x8xf32>
    %152 = vector.shape_cast %151 : vector<2x8xf32> to vector<2x8x1xf32>
    %153 = tpu.reciprocal %152 {approx = true} : vector<2x8x1xf32> -> vector<2x8x1xf32>
    %154 = vector.broadcast %153 : vector<2x8x1xf32> to vector<2x8x8xf32>
    %155 = arith.mulf %150, %154 : vector<2x8x8xf32>
    %156 = arith.truncf %155 : vector<2x8x8xf32> to vector<2x8x8xbf16>
    %157 = vector.extract_strided_slice %19 {offsets = [0, 0, 20], sizes = [2, 8, 4], strides = [1, 1, 1]} : vector<2x8x32xbf16> to vector<2x8x4xbf16>
    "tpu.trace_start"() <{level = 10 : i32, message = "bqk,bkd->bqd"}> : () -> ()
    %cst_57 = arith.constant dense<0.000000e+00> : vector<2x8x4xf32>
    %158 = tpu.matmul %156, %157, %cst_57 {dimension_numbers = #tpu.dot_dimension_numbers<[2], [1], [1], [2], [0, 0, 0, 1, 1, 2], [0], [0]>} : vector<2x8x8xbf16>, vector<2x8x4xbf16>, vector<2x8x4xf32> -> vector<2x8x4xf32>
    "tpu.trace_stop"() : () -> ()
    %159 = vector.shape_cast %158 : vector<2x8x4xf32> to vector<16x4xf32>
    %160 = arith.truncf %159 : vector<16x4xf32> to vector<16x4xbf16>
    %c0_58 = arith.constant 0 : index
    %c5 = arith.constant 5 : index
    %c0_59 = arith.constant 0 : index
    %c0_60 = arith.constant 0 : index
    %161 = vector.load %arg4[%c0_58, %c5, %c0_59, %c0_60] : memref<2x8x4x32xbf16, #tpu.memory_space<vmem>>, vector<1x1x4x32xbf16>
    %162 = vector.shape_cast %161 : vector<1x1x4x32xbf16> to vector<4x32xbf16>
    %cst_61 = arith.constant dense<0.000000e+00> : vector<16x32xf32>
    %163 = tpu.matmul %160, %162, %cst_61 {dimension_numbers = #tpu.dot_dimension_numbers<[1], [0], [0], [1], [0, 0, 1, 1], [], []>} : vector<16x4xbf16>, vector<4x32xbf16>, vector<16x32xf32> -> vector<16x32xf32>
    %164 = arith.addf %140, %163 : vector<16x32xf32>
    %165 = vector.extract_strided_slice %15 {offsets = [0, 0, 24], sizes = [2, 8, 4], strides = [1, 1, 1]} : vector<2x8x32xbf16> to vector<2x8x4xbf16>
    %166 = vector.extract_strided_slice %17 {offsets = [0, 0, 24], sizes = [2, 8, 4], strides = [1, 1, 1]} : vector<2x8x32xbf16> to vector<2x8x4xbf16>
    "tpu.trace_start"() <{level = 10 : i32, message = "bqd,bkd->bqk"}> : () -> ()
    %cst_62 = arith.constant dense<0.000000e+00> : vector<2x8x8xf32>
    %167 = tpu.matmul %165, %166, %cst_62 {dimension_numbers = #tpu.dot_dimension_numbers<[2], [2], [1], [1], [0, 0, 0, 1, 1, 1], [0], [0]>} : vector<2x8x4xbf16>, vector<2x8x4xbf16>, vector<2x8x8xf32> -> vector<2x8x8xf32>
    "tpu.trace_stop"() : () -> ()
    %168 = vector.broadcast %1 : vector<2x1x8xf32> to vector<2x8x8xf32>
    %169 = arith.addf %167, %168 : vector<2x8x8xf32>
    %cst_63 = arith.constant dense<0xFF800000> : vector<2x8xf32>
    %170 = vector.multi_reduction <maximumf>, %169, %cst_63 [2] : vector<2x8x8xf32> to vector<2x8xf32>
    %171 = vector.shape_cast %170 : vector<2x8xf32> to vector<2x8x1xf32>
    %172 = vector.broadcast %171 : vector<2x8x1xf32> to vector<2x8x8xf32>
    %173 = arith.subf %169, %172 : vector<2x8x8xf32>
    %174 = math.exp %173 : vector<2x8x8xf32>
    %cst_64 = arith.constant dense<0.000000e+00> : vector<2x8xf32>
    %175 = vector.multi_reduction <add>, %174, %cst_64 [2] : vector<2x8x8xf32> to vector<2x8xf32>
    %176 = vector.shape_cast %175 : vector<2x8xf32> to vector<2x8x1xf32>
    %177 = tpu.reciprocal %176 {approx = true} : vector<2x8x1xf32> -> vector<2x8x1xf32>
    %178 = vector.broadcast %177 : vector<2x8x1xf32> to vector<2x8x8xf32>
    %179 = arith.mulf %174, %178 : vector<2x8x8xf32>
    %180 = arith.truncf %179 : vector<2x8x8xf32> to vector<2x8x8xbf16>
    %181 = vector.extract_strided_slice %19 {offsets = [0, 0, 24], sizes = [2, 8, 4], strides = [1, 1, 1]} : vector<2x8x32xbf16> to vector<2x8x4xbf16>
    "tpu.trace_start"() <{level = 10 : i32, message = "bqk,bkd->bqd"}> : () -> ()
    %cst_65 = arith.constant dense<0.000000e+00> : vector<2x8x4xf32>
    %182 = tpu.matmul %180, %181, %cst_65 {dimension_numbers = #tpu.dot_dimension_numbers<[2], [1], [1], [2], [0, 0, 0, 1, 1, 2], [0], [0]>} : vector<2x8x8xbf16>, vector<2x8x4xbf16>, vector<2x8x4xf32> -> vector<2x8x4xf32>
    "tpu.trace_stop"() : () -> ()
    %183 = vector.shape_cast %182 : vector<2x8x4xf32> to vector<16x4xf32>
    %184 = arith.truncf %183 : vector<16x4xf32> to vector<16x4xbf16>
    %c0_66 = arith.constant 0 : index
    %c6 = arith.constant 6 : index
    %c0_67 = arith.constant 0 : index
    %c0_68 = arith.constant 0 : index
    %185 = vector.load %arg4[%c0_66, %c6, %c0_67, %c0_68] : memref<2x8x4x32xbf16, #tpu.memory_space<vmem>>, vector<1x1x4x32xbf16>
    %186 = vector.shape_cast %185 : vector<1x1x4x32xbf16> to vector<4x32xbf16>
    %cst_69 = arith.constant dense<0.000000e+00> : vector<16x32xf32>
    %187 = tpu.matmul %184, %186, %cst_69 {dimension_numbers = #tpu.dot_dimension_numbers<[1], [0], [0], [1], [0, 0, 1, 1], [], []>} : vector<16x4xbf16>, vector<4x32xbf16>, vector<16x32xf32> -> vector<16x32xf32>
    %188 = arith.addf %164, %187 : vector<16x32xf32>
    %189 = vector.extract_strided_slice %15 {offsets = [0, 0, 28], sizes = [2, 8, 4], strides = [1, 1, 1]} : vector<2x8x32xbf16> to vector<2x8x4xbf16>
    %190 = vector.extract_strided_slice %17 {offsets = [0, 0, 28], sizes = [2, 8, 4], strides = [1, 1, 1]} : vector<2x8x32xbf16> to vector<2x8x4xbf16>
    "tpu.trace_start"() <{level = 10 : i32, message = "bqd,bkd->bqk"}> : () -> ()
    %cst_70 = arith.constant dense<0.000000e+00> : vector<2x8x8xf32>
    %191 = tpu.matmul %189, %190, %cst_70 {dimension_numbers = #tpu.dot_dimension_numbers<[2], [2], [1], [1], [0, 0, 0, 1, 1, 1], [0], [0]>} : vector<2x8x4xbf16>, vector<2x8x4xbf16>, vector<2x8x8xf32> -> vector<2x8x8xf32>
    "tpu.trace_stop"() : () -> ()
    %192 = vector.broadcast %1 : vector<2x1x8xf32> to vector<2x8x8xf32>
    %193 = arith.addf %191, %192 : vector<2x8x8xf32>
    %cst_71 = arith.constant dense<0xFF800000> : vector<2x8xf32>
    %194 = vector.multi_reduction <maximumf>, %193, %cst_71 [2] : vector<2x8x8xf32> to vector<2x8xf32>
    %195 = vector.shape_cast %194 : vector<2x8xf32> to vector<2x8x1xf32>
    %196 = vector.broadcast %195 : vector<2x8x1xf32> to vector<2x8x8xf32>
    %197 = arith.subf %193, %196 : vector<2x8x8xf32>
    %198 = math.exp %197 : vector<2x8x8xf32>
    %cst_72 = arith.constant dense<0.000000e+00> : vector<2x8xf32>
    %199 = vector.multi_reduction <add>, %198, %cst_72 [2] : vector<2x8x8xf32> to vector<2x8xf32>
    %200 = vector.shape_cast %199 : vector<2x8xf32> to vector<2x8x1xf32>
    %201 = tpu.reciprocal %200 {approx = true} : vector<2x8x1xf32> -> vector<2x8x1xf32>
    %202 = vector.broadcast %201 : vector<2x8x1xf32> to vector<2x8x8xf32>
    %203 = arith.mulf %198, %202 : vector<2x8x8xf32>
    %204 = arith.truncf %203 : vector<2x8x8xf32> to vector<2x8x8xbf16>
    %205 = vector.extract_strided_slice %19 {offsets = [0, 0, 28], sizes = [2, 8, 4], strides = [1, 1, 1]} : vector<2x8x32xbf16> to vector<2x8x4xbf16>
    "tpu.trace_start"() <{level = 10 : i32, message = "bqk,bkd->bqd"}> : () -> ()
    %cst_73 = arith.constant dense<0.000000e+00> : vector<2x8x4xf32>
    %206 = tpu.matmul %204, %205, %cst_73 {dimension_numbers = #tpu.dot_dimension_numbers<[2], [1], [1], [2], [0, 0, 0, 1, 1, 2], [0], [0]>} : vector<2x8x8xbf16>, vector<2x8x4xbf16>, vector<2x8x4xf32> -> vector<2x8x4xf32>
    "tpu.trace_stop"() : () -> ()
    %207 = vector.shape_cast %206 : vector<2x8x4xf32> to vector<16x4xf32>
    %208 = arith.truncf %207 : vector<16x4xf32> to vector<16x4xbf16>
    %c0_74 = arith.constant 0 : index
    %c7 = arith.constant 7 : index
    %c0_75 = arith.constant 0 : index
    %c0_76 = arith.constant 0 : index
    %209 = vector.load %arg4[%c0_74, %c7, %c0_75, %c0_76] : memref<2x8x4x32xbf16, #tpu.memory_space<vmem>>, vector<1x1x4x32xbf16>
    %210 = vector.shape_cast %209 : vector<1x1x4x32xbf16> to vector<4x32xbf16>
    %cst_77 = arith.constant dense<0.000000e+00> : vector<16x32xf32>
    %211 = tpu.matmul %208, %210, %cst_77 {dimension_numbers = #tpu.dot_dimension_numbers<[1], [0], [0], [1], [0, 0, 1, 1], [], []>} : vector<16x4xbf16>, vector<4x32xbf16>, vector<16x32xf32> -> vector<16x32xf32>
    %212 = arith.addf %188, %211 : vector<16x32xf32>
    %c0_78 = arith.constant 0 : index
    %c0_79 = arith.constant 0 : index
    %c0_80 = arith.constant 0 : index
    %213 = vector.load %arg5[%c0_78, %c0_79, %c0_80] : memref<2x1x32xf32, #tpu.memory_space<vmem>>, vector<1x1x32xf32>
    %214 = vector.shape_cast %213 : vector<1x1x32xf32> to vector<1x32xf32>
    %215 = vector.broadcast %214 : vector<1x32xf32> to vector<16x32xf32>
    %216 = arith.addf %212, %215 : vector<16x32xf32>
    %217 = arith.addf %2, %216 : vector<16x32xf32>
    %c0_81 = arith.constant 0 : index
    %c0_82 = arith.constant 0 : index
    %c0_83 = arith.constant 0 : index
    %218 = vector.load %arg10[%c0_81, %c0_82, %c0_83] : memref<2x1x32xf32, #tpu.memory_space<vmem>>, vector<1x1x32xf32>
    %219 = vector.shape_cast %218 : vector<1x1x32xf32> to vector<1x32xf32>
    %c0_84 = arith.constant 0 : index
    %c0_85 = arith.constant 0 : index
    %c0_86 = arith.constant 0 : index
    %220 = vector.load %arg11[%c0_84, %c0_85, %c0_86] : memref<2x1x32xf32, #tpu.memory_space<vmem>>, vector<1x1x32xf32>
    %221 = vector.shape_cast %220 : vector<1x1x32xf32> to vector<1x32xf32>
    %cst_87 = arith.constant dense<0.000000e+00> : vector<16xf32>
    %222 = vector.multi_reduction <add>, %217, %cst_87 [1] : vector<16x32xf32> to vector<16xf32>
    %223 = vector.shape_cast %222 : vector<16xf32> to vector<16x1xf32>
    %cst_88 = arith.constant 3.200000e+01 : f32
    %224 = vector.broadcast %cst_88 : f32 to vector<16x1xf32>
    %225 = arith.divf %223, %224 : vector<16x1xf32>
    %226 = vector.broadcast %225 : vector<16x1xf32> to vector<16x32xf32>
    %227 = arith.subf %217, %226 : vector<16x32xf32>
    %228 = arith.mulf %227, %227 : vector<16x32xf32>
    %cst_89 = arith.constant dense<0.000000e+00> : vector<16xf32>
    %229 = vector.multi_reduction <add>, %228, %cst_89 [1] : vector<16x32xf32> to vector<16xf32>
    %230 = vector.shape_cast %229 : vector<16xf32> to vector<16x1xf32>
    %cst_90 = arith.constant 3.200000e+01 : f32
    %231 = vector.broadcast %cst_90 : f32 to vector<16x1xf32>
    %232 = arith.divf %230, %231 : vector<16x1xf32>
    %233 = vector.broadcast %225 : vector<16x1xf32> to vector<16x32xf32>
    %234 = arith.subf %217, %233 : vector<16x32xf32>
    %cst_91 = arith.constant 9.99999974E-6 : f32
    %235 = vector.broadcast %cst_91 : f32 to vector<16x1xf32>
    %236 = arith.addf %232, %235 : vector<16x1xf32>
    %237 = math.rsqrt %236 : vector<16x1xf32>
    %238 = vector.broadcast %237 : vector<16x1xf32> to vector<16x32xf32>
    %239 = arith.mulf %234, %238 : vector<16x32xf32>
    %240 = vector.broadcast %219 : vector<1x32xf32> to vector<16x32xf32>
    %241 = arith.mulf %239, %240 : vector<16x32xf32>
    %242 = vector.broadcast %221 : vector<1x32xf32> to vector<16x32xf32>
    %243 = arith.addf %241, %242 : vector<16x32xf32>
    %244 = arith.truncf %243 : vector<16x32xf32> to vector<16x32xbf16>
    %c0_92 = arith.constant 0 : index
    %c0_93 = arith.constant 0 : index
    %c0_94 = arith.constant 0 : index
    %245 = vector.load %arg6[%c0_92, %c0_93, %c0_94] : memref<2x32x128xbf16, #tpu.memory_space<vmem>>, vector<1x32x128xbf16>
    %246 = vector.shape_cast %245 : vector<1x32x128xbf16> to vector<32x128xbf16>
    %cst_95 = arith.constant dense<0.000000e+00> : vector<16x128xf32>
    %247 = tpu.matmul %244, %246, %cst_95 {dimension_numbers = #tpu.dot_dimension_numbers<[1], [0], [0], [1], [0, 0, 1, 1], [], []>} : vector<16x32xbf16>, vector<32x128xbf16>, vector<16x128xf32> -> vector<16x128xf32>
    %c0_96 = arith.constant 0 : index
    %c0_97 = arith.constant 0 : index
    %c0_98 = arith.constant 0 : index
    %248 = vector.load %arg7[%c0_96, %c0_97, %c0_98] : memref<2x1x128xf32, #tpu.memory_space<vmem>>, vector<1x1x128xf32>
    %249 = vector.shape_cast %248 : vector<1x1x128xf32> to vector<1x128xf32>
    %250 = vector.broadcast %249 : vector<1x128xf32> to vector<16x128xf32>
    %251 = arith.addf %247, %250 : vector<16x128xf32>
    %cst_99 = arith.constant 0.000000e+00 : f32
    %252 = vector.broadcast %cst_99 : f32 to vector<16x128xf32>
    %253 = arith.maximumf %251, %252 : vector<16x128xf32>
    %254 = arith.truncf %253 : vector<16x128xf32> to vector<16x128xbf16>
    %c0_100 = arith.constant 0 : index
    %c0_101 = arith.constant 0 : index
    %c0_102 = arith.constant 0 : index
    %255 = vector.load %arg8[%c0_100, %c0_101, %c0_102] : memref<2x128x32xbf16, #tpu.memory_space<vmem>>, vector<1x128x32xbf16>
    %256 = vector.shape_cast %255 : vector<1x128x32xbf16> to vector<128x32xbf16>
    %cst_103 = arith.constant dense<0.000000e+00> : vector<16x32xf32>
    %257 = tpu.matmul %254, %256, %cst_103 {dimension_numbers = #tpu.dot_dimension_numbers<[1], [0], [0], [1], [0, 0, 1, 1], [], []>} : vector<16x128xbf16>, vector<128x32xbf16>, vector<16x32xf32> -> vector<16x32xf32>
    %c0_104 = arith.constant 0 : index
    %c0_105 = arith.constant 0 : index
    %c0_106 = arith.constant 0 : index
    %258 = vector.load %arg9[%c0_104, %c0_105, %c0_106] : memref<2x1x32xf32, #tpu.memory_space<vmem>>, vector<1x1x32xf32>
    %259 = vector.shape_cast %258 : vector<1x1x32xf32> to vector<1x32xf32>
    %260 = vector.broadcast %259 : vector<1x32xf32> to vector<16x32xf32>
    %261 = arith.addf %257, %260 : vector<16x32xf32>
    %262 = arith.addf %243, %261 : vector<16x32xf32>
    %c0_107 = arith.constant 0 : index
    %c0_108 = arith.constant 0 : index
    %c0_109 = arith.constant 0 : index
    %263 = vector.load %arg12[%c0_107, %c0_108, %c0_109] : memref<2x1x32xf32, #tpu.memory_space<vmem>>, vector<1x1x32xf32>
    %264 = vector.shape_cast %263 : vector<1x1x32xf32> to vector<1x32xf32>
    %c0_110 = arith.constant 0 : index
    %c0_111 = arith.constant 0 : index
    %c0_112 = arith.constant 0 : index
    %265 = vector.load %arg13[%c0_110, %c0_111, %c0_112] : memref<2x1x32xf32, #tpu.memory_space<vmem>>, vector<1x1x32xf32>
    %266 = vector.shape_cast %265 : vector<1x1x32xf32> to vector<1x32xf32>
    %cst_113 = arith.constant dense<0.000000e+00> : vector<16xf32>
    %267 = vector.multi_reduction <add>, %262, %cst_113 [1] : vector<16x32xf32> to vector<16xf32>
    %268 = vector.shape_cast %267 : vector<16xf32> to vector<16x1xf32>
    %cst_114 = arith.constant 3.200000e+01 : f32
    %269 = vector.broadcast %cst_114 : f32 to vector<16x1xf32>
    %270 = arith.divf %268, %269 : vector<16x1xf32>
    %271 = vector.broadcast %270 : vector<16x1xf32> to vector<16x32xf32>
    %272 = arith.subf %262, %271 : vector<16x32xf32>
    %273 = arith.mulf %272, %272 : vector<16x32xf32>
    %cst_115 = arith.constant dense<0.000000e+00> : vector<16xf32>
    %274 = vector.multi_reduction <add>, %273, %cst_115 [1] : vector<16x32xf32> to vector<16xf32>
    %275 = vector.shape_cast %274 : vector<16xf32> to vector<16x1xf32>
    %cst_116 = arith.constant 3.200000e+01 : f32
    %276 = vector.broadcast %cst_116 : f32 to vector<16x1xf32>
    %277 = arith.divf %275, %276 : vector<16x1xf32>
    %278 = vector.broadcast %270 : vector<16x1xf32> to vector<16x32xf32>
    %279 = arith.subf %262, %278 : vector<16x32xf32>
    %cst_117 = arith.constant 9.99999974E-6 : f32
    %280 = vector.broadcast %cst_117 : f32 to vector<16x1xf32>
    %281 = arith.addf %277, %280 : vector<16x1xf32>
    %282 = math.rsqrt %281 : vector<16x1xf32>
    %283 = vector.broadcast %282 : vector<16x1xf32> to vector<16x32xf32>
    %284 = arith.mulf %279, %283 : vector<16x32xf32>
    %285 = vector.broadcast %264 : vector<1x32xf32> to vector<16x32xf32>
    %286 = arith.mulf %284, %285 : vector<16x32xf32>
    %287 = vector.broadcast %266 : vector<1x32xf32> to vector<16x32xf32>
    %288 = arith.addf %286, %287 : vector<16x32xf32>
    %289 = vector.shape_cast %288 : vector<16x32xf32> to vector<2x8x32xf32>
    %290 = vector.shape_cast %289 : vector<2x8x32xf32> to vector<16x32xf32>
    %291 = arith.truncf %290 : vector<16x32xf32> to vector<16x32xbf16>
    %c1_118 = arith.constant 1 : index
    %c0_119 = arith.constant 0 : index
    %c0_120 = arith.constant 0 : index
    %292 = vector.load %arg2[%c1_118, %c0_119, %c0_120] : memref<2x32x96xbf16, #tpu.memory_space<vmem>>, vector<1x32x96xbf16>
    %293 = vector.shape_cast %292 : vector<1x32x96xbf16> to vector<32x96xbf16>
    %cst_121 = arith.constant dense<0.000000e+00> : vector<16x96xf32>
    %294 = tpu.matmul %291, %293, %cst_121 {dimension_numbers = #tpu.dot_dimension_numbers<[1], [0], [0], [1], [0, 0, 1, 1], [], []>} : vector<16x32xbf16>, vector<32x96xbf16>, vector<16x96xf32> -> vector<16x96xf32>
    %c1_122 = arith.constant 1 : index
    %c0_123 = arith.constant 0 : index
    %c0_124 = arith.constant 0 : index
    %295 = vector.load %arg3[%c1_122, %c0_123, %c0_124] : memref<2x1x96xf32, #tpu.memory_space<vmem>>, vector<1x1x96xf32>
    %296 = vector.shape_cast %295 : vector<1x1x96xf32> to vector<1x96xf32>
    %297 = vector.broadcast %296 : vector<1x96xf32> to vector<16x96xf32>
    %298 = arith.addf %294, %297 : vector<16x96xf32>
    %299 = vector.shape_cast %298 : vector<16x96xf32> to vector<2x8x96xf32>
    %300 = vector.extract_strided_slice %299 {offsets = [0, 0, 0], sizes = [2, 8, 32], strides = [1, 1, 1]} : vector<2x8x96xf32> to vector<2x8x32xf32>
    %cst_125 = arith.constant 5.000000e-01 : f32
    %301 = vector.broadcast %cst_125 : f32 to vector<2x8x32xf32>
    %302 = arith.mulf %300, %301 : vector<2x8x32xf32>
    %303 = arith.truncf %302 : vector<2x8x32xf32> to vector<2x8x32xbf16>
    %304 = vector.extract_strided_slice %299 {offsets = [0, 0, 32], sizes = [2, 8, 32], strides = [1, 1, 1]} : vector<2x8x96xf32> to vector<2x8x32xf32>
    %305 = arith.truncf %304 : vector<2x8x32xf32> to vector<2x8x32xbf16>
    %306 = vector.extract_strided_slice %299 {offsets = [0, 0, 64], sizes = [2, 8, 32], strides = [1, 1, 1]} : vector<2x8x96xf32> to vector<2x8x32xf32>
    %307 = arith.truncf %306 : vector<2x8x32xf32> to vector<2x8x32xbf16>
    %cst_126 = arith.constant 0.000000e+00 : f32
    %308 = vector.broadcast %cst_126 : f32 to vector<16x32xf32>
    %309 = vector.extract_strided_slice %303 {offsets = [0, 0, 0], sizes = [2, 8, 4], strides = [1, 1, 1]} : vector<2x8x32xbf16> to vector<2x8x4xbf16>
    %310 = vector.extract_strided_slice %305 {offsets = [0, 0, 0], sizes = [2, 8, 4], strides = [1, 1, 1]} : vector<2x8x32xbf16> to vector<2x8x4xbf16>
    "tpu.trace_start"() <{level = 10 : i32, message = "bqd,bkd->bqk"}> : () -> ()
    %cst_127 = arith.constant dense<0.000000e+00> : vector<2x8x8xf32>
    %311 = tpu.matmul %309, %310, %cst_127 {dimension_numbers = #tpu.dot_dimension_numbers<[2], [2], [1], [1], [0, 0, 0, 1, 1, 1], [0], [0]>} : vector<2x8x4xbf16>, vector<2x8x4xbf16>, vector<2x8x8xf32> -> vector<2x8x8xf32>
    "tpu.trace_stop"() : () -> ()
    %312 = vector.broadcast %1 : vector<2x1x8xf32> to vector<2x8x8xf32>
    %313 = arith.addf %311, %312 : vector<2x8x8xf32>
    %cst_128 = arith.constant dense<0xFF800000> : vector<2x8xf32>
    %314 = vector.multi_reduction <maximumf>, %313, %cst_128 [2] : vector<2x8x8xf32> to vector<2x8xf32>
    %315 = vector.shape_cast %314 : vector<2x8xf32> to vector<2x8x1xf32>
    %316 = vector.broadcast %315 : vector<2x8x1xf32> to vector<2x8x8xf32>
    %317 = arith.subf %313, %316 : vector<2x8x8xf32>
    %318 = math.exp %317 : vector<2x8x8xf32>
    %cst_129 = arith.constant dense<0.000000e+00> : vector<2x8xf32>
    %319 = vector.multi_reduction <add>, %318, %cst_129 [2] : vector<2x8x8xf32> to vector<2x8xf32>
    %320 = vector.shape_cast %319 : vector<2x8xf32> to vector<2x8x1xf32>
    %321 = tpu.reciprocal %320 {approx = true} : vector<2x8x1xf32> -> vector<2x8x1xf32>
    %322 = vector.broadcast %321 : vector<2x8x1xf32> to vector<2x8x8xf32>
    %323 = arith.mulf %318, %322 : vector<2x8x8xf32>
    %324 = arith.truncf %323 : vector<2x8x8xf32> to vector<2x8x8xbf16>
    %325 = vector.extract_strided_slice %307 {offsets = [0, 0, 0], sizes = [2, 8, 4], strides = [1, 1, 1]} : vector<2x8x32xbf16> to vector<2x8x4xbf16>
    "tpu.trace_start"() <{level = 10 : i32, message = "bqk,bkd->bqd"}> : () -> ()
    %cst_130 = arith.constant dense<0.000000e+00> : vector<2x8x4xf32>
    %326 = tpu.matmul %324, %325, %cst_130 {dimension_numbers = #tpu.dot_dimension_numbers<[2], [1], [1], [2], [0, 0, 0, 1, 1, 2], [0], [0]>} : vector<2x8x8xbf16>, vector<2x8x4xbf16>, vector<2x8x4xf32> -> vector<2x8x4xf32>
    "tpu.trace_stop"() : () -> ()
    %327 = vector.shape_cast %326 : vector<2x8x4xf32> to vector<16x4xf32>
    %328 = arith.truncf %327 : vector<16x4xf32> to vector<16x4xbf16>
    %c1_131 = arith.constant 1 : index
    %c0_132 = arith.constant 0 : index
    %c0_133 = arith.constant 0 : index
    %c0_134 = arith.constant 0 : index
    %329 = vector.load %arg4[%c1_131, %c0_132, %c0_133, %c0_134] : memref<2x8x4x32xbf16, #tpu.memory_space<vmem>>, vector<1x1x4x32xbf16>
    %330 = vector.shape_cast %329 : vector<1x1x4x32xbf16> to vector<4x32xbf16>
    %cst_135 = arith.constant dense<0.000000e+00> : vector<16x32xf32>
    %331 = tpu.matmul %328, %330, %cst_135 {dimension_numbers = #tpu.dot_dimension_numbers<[1], [0], [0], [1], [0, 0, 1, 1], [], []>} : vector<16x4xbf16>, vector<4x32xbf16>, vector<16x32xf32> -> vector<16x32xf32>
    %332 = arith.addf %308, %331 : vector<16x32xf32>
    %333 = vector.extract_strided_slice %303 {offsets = [0, 0, 4], sizes = [2, 8, 4], strides = [1, 1, 1]} : vector<2x8x32xbf16> to vector<2x8x4xbf16>
    %334 = vector.extract_strided_slice %305 {offsets = [0, 0, 4], sizes = [2, 8, 4], strides = [1, 1, 1]} : vector<2x8x32xbf16> to vector<2x8x4xbf16>
    "tpu.trace_start"() <{level = 10 : i32, message = "bqd,bkd->bqk"}> : () -> ()
    %cst_136 = arith.constant dense<0.000000e+00> : vector<2x8x8xf32>
    %335 = tpu.matmul %333, %334, %cst_136 {dimension_numbers = #tpu.dot_dimension_numbers<[2], [2], [1], [1], [0, 0, 0, 1, 1, 1], [0], [0]>} : vector<2x8x4xbf16>, vector<2x8x4xbf16>, vector<2x8x8xf32> -> vector<2x8x8xf32>
    "tpu.trace_stop"() : () -> ()
    %336 = vector.broadcast %1 : vector<2x1x8xf32> to vector<2x8x8xf32>
    %337 = arith.addf %335, %336 : vector<2x8x8xf32>
    %cst_137 = arith.constant dense<0xFF800000> : vector<2x8xf32>
    %338 = vector.multi_reduction <maximumf>, %337, %cst_137 [2] : vector<2x8x8xf32> to vector<2x8xf32>
    %339 = vector.shape_cast %338 : vector<2x8xf32> to vector<2x8x1xf32>
    %340 = vector.broadcast %339 : vector<2x8x1xf32> to vector<2x8x8xf32>
    %341 = arith.subf %337, %340 : vector<2x8x8xf32>
    %342 = math.exp %341 : vector<2x8x8xf32>
    %cst_138 = arith.constant dense<0.000000e+00> : vector<2x8xf32>
    %343 = vector.multi_reduction <add>, %342, %cst_138 [2] : vector<2x8x8xf32> to vector<2x8xf32>
    %344 = vector.shape_cast %343 : vector<2x8xf32> to vector<2x8x1xf32>
    %345 = tpu.reciprocal %344 {approx = true} : vector<2x8x1xf32> -> vector<2x8x1xf32>
    %346 = vector.broadcast %345 : vector<2x8x1xf32> to vector<2x8x8xf32>
    %347 = arith.mulf %342, %346 : vector<2x8x8xf32>
    %348 = arith.truncf %347 : vector<2x8x8xf32> to vector<2x8x8xbf16>
    %349 = vector.extract_strided_slice %307 {offsets = [0, 0, 4], sizes = [2, 8, 4], strides = [1, 1, 1]} : vector<2x8x32xbf16> to vector<2x8x4xbf16>
    "tpu.trace_start"() <{level = 10 : i32, message = "bqk,bkd->bqd"}> : () -> ()
    %cst_139 = arith.constant dense<0.000000e+00> : vector<2x8x4xf32>
    %350 = tpu.matmul %348, %349, %cst_139 {dimension_numbers = #tpu.dot_dimension_numbers<[2], [1], [1], [2], [0, 0, 0, 1, 1, 2], [0], [0]>} : vector<2x8x8xbf16>, vector<2x8x4xbf16>, vector<2x8x4xf32> -> vector<2x8x4xf32>
    "tpu.trace_stop"() : () -> ()
    %351 = vector.shape_cast %350 : vector<2x8x4xf32> to vector<16x4xf32>
    %352 = arith.truncf %351 : vector<16x4xf32> to vector<16x4xbf16>
    %c1_140 = arith.constant 1 : index
    %c1_141 = arith.constant 1 : index
    %c0_142 = arith.constant 0 : index
    %c0_143 = arith.constant 0 : index
    %353 = vector.load %arg4[%c1_140, %c1_141, %c0_142, %c0_143] : memref<2x8x4x32xbf16, #tpu.memory_space<vmem>>, vector<1x1x4x32xbf16>
    %354 = vector.shape_cast %353 : vector<1x1x4x32xbf16> to vector<4x32xbf16>
    %cst_144 = arith.constant dense<0.000000e+00> : vector<16x32xf32>
    %355 = tpu.matmul %352, %354, %cst_144 {dimension_numbers = #tpu.dot_dimension_numbers<[1], [0], [0], [1], [0, 0, 1, 1], [], []>} : vector<16x4xbf16>, vector<4x32xbf16>, vector<16x32xf32> -> vector<16x32xf32>
    %356 = arith.addf %332, %355 : vector<16x32xf32>
    %357 = vector.extract_strided_slice %303 {offsets = [0, 0, 8], sizes = [2, 8, 4], strides = [1, 1, 1]} : vector<2x8x32xbf16> to vector<2x8x4xbf16>
    %358 = vector.extract_strided_slice %305 {offsets = [0, 0, 8], sizes = [2, 8, 4], strides = [1, 1, 1]} : vector<2x8x32xbf16> to vector<2x8x4xbf16>
    "tpu.trace_start"() <{level = 10 : i32, message = "bqd,bkd->bqk"}> : () -> ()
    %cst_145 = arith.constant dense<0.000000e+00> : vector<2x8x8xf32>
    %359 = tpu.matmul %357, %358, %cst_145 {dimension_numbers = #tpu.dot_dimension_numbers<[2], [2], [1], [1], [0, 0, 0, 1, 1, 1], [0], [0]>} : vector<2x8x4xbf16>, vector<2x8x4xbf16>, vector<2x8x8xf32> -> vector<2x8x8xf32>
    "tpu.trace_stop"() : () -> ()
    %360 = vector.broadcast %1 : vector<2x1x8xf32> to vector<2x8x8xf32>
    %361 = arith.addf %359, %360 : vector<2x8x8xf32>
    %cst_146 = arith.constant dense<0xFF800000> : vector<2x8xf32>
    %362 = vector.multi_reduction <maximumf>, %361, %cst_146 [2] : vector<2x8x8xf32> to vector<2x8xf32>
    %363 = vector.shape_cast %362 : vector<2x8xf32> to vector<2x8x1xf32>
    %364 = vector.broadcast %363 : vector<2x8x1xf32> to vector<2x8x8xf32>
    %365 = arith.subf %361, %364 : vector<2x8x8xf32>
    %366 = math.exp %365 : vector<2x8x8xf32>
    %cst_147 = arith.constant dense<0.000000e+00> : vector<2x8xf32>
    %367 = vector.multi_reduction <add>, %366, %cst_147 [2] : vector<2x8x8xf32> to vector<2x8xf32>
    %368 = vector.shape_cast %367 : vector<2x8xf32> to vector<2x8x1xf32>
    %369 = tpu.reciprocal %368 {approx = true} : vector<2x8x1xf32> -> vector<2x8x1xf32>
    %370 = vector.broadcast %369 : vector<2x8x1xf32> to vector<2x8x8xf32>
    %371 = arith.mulf %366, %370 : vector<2x8x8xf32>
    %372 = arith.truncf %371 : vector<2x8x8xf32> to vector<2x8x8xbf16>
    %373 = vector.extract_strided_slice %307 {offsets = [0, 0, 8], sizes = [2, 8, 4], strides = [1, 1, 1]} : vector<2x8x32xbf16> to vector<2x8x4xbf16>
    "tpu.trace_start"() <{level = 10 : i32, message = "bqk,bkd->bqd"}> : () -> ()
    %cst_148 = arith.constant dense<0.000000e+00> : vector<2x8x4xf32>
    %374 = tpu.matmul %372, %373, %cst_148 {dimension_numbers = #tpu.dot_dimension_numbers<[2], [1], [1], [2], [0, 0, 0, 1, 1, 2], [0], [0]>} : vector<2x8x8xbf16>, vector<2x8x4xbf16>, vector<2x8x4xf32> -> vector<2x8x4xf32>
    "tpu.trace_stop"() : () -> ()
    %375 = vector.shape_cast %374 : vector<2x8x4xf32> to vector<16x4xf32>
    %376 = arith.truncf %375 : vector<16x4xf32> to vector<16x4xbf16>
    %c1_149 = arith.constant 1 : index
    %c2_150 = arith.constant 2 : index
    %c0_151 = arith.constant 0 : index
    %c0_152 = arith.constant 0 : index
    %377 = vector.load %arg4[%c1_149, %c2_150, %c0_151, %c0_152] : memref<2x8x4x32xbf16, #tpu.memory_space<vmem>>, vector<1x1x4x32xbf16>
    %378 = vector.shape_cast %377 : vector<1x1x4x32xbf16> to vector<4x32xbf16>
    %cst_153 = arith.constant dense<0.000000e+00> : vector<16x32xf32>
    %379 = tpu.matmul %376, %378, %cst_153 {dimension_numbers = #tpu.dot_dimension_numbers<[1], [0], [0], [1], [0, 0, 1, 1], [], []>} : vector<16x4xbf16>, vector<4x32xbf16>, vector<16x32xf32> -> vector<16x32xf32>
    %380 = arith.addf %356, %379 : vector<16x32xf32>
    %381 = vector.extract_strided_slice %303 {offsets = [0, 0, 12], sizes = [2, 8, 4], strides = [1, 1, 1]} : vector<2x8x32xbf16> to vector<2x8x4xbf16>
    %382 = vector.extract_strided_slice %305 {offsets = [0, 0, 12], sizes = [2, 8, 4], strides = [1, 1, 1]} : vector<2x8x32xbf16> to vector<2x8x4xbf16>
    "tpu.trace_start"() <{level = 10 : i32, message = "bqd,bkd->bqk"}> : () -> ()
    %cst_154 = arith.constant dense<0.000000e+00> : vector<2x8x8xf32>
    %383 = tpu.matmul %381, %382, %cst_154 {dimension_numbers = #tpu.dot_dimension_numbers<[2], [2], [1], [1], [0, 0, 0, 1, 1, 1], [0], [0]>} : vector<2x8x4xbf16>, vector<2x8x4xbf16>, vector<2x8x8xf32> -> vector<2x8x8xf32>
    "tpu.trace_stop"() : () -> ()
    %384 = vector.broadcast %1 : vector<2x1x8xf32> to vector<2x8x8xf32>
    %385 = arith.addf %383, %384 : vector<2x8x8xf32>
    %cst_155 = arith.constant dense<0xFF800000> : vector<2x8xf32>
    %386 = vector.multi_reduction <maximumf>, %385, %cst_155 [2] : vector<2x8x8xf32> to vector<2x8xf32>
    %387 = vector.shape_cast %386 : vector<2x8xf32> to vector<2x8x1xf32>
    %388 = vector.broadcast %387 : vector<2x8x1xf32> to vector<2x8x8xf32>
    %389 = arith.subf %385, %388 : vector<2x8x8xf32>
    %390 = math.exp %389 : vector<2x8x8xf32>
    %cst_156 = arith.constant dense<0.000000e+00> : vector<2x8xf32>
    %391 = vector.multi_reduction <add>, %390, %cst_156 [2] : vector<2x8x8xf32> to vector<2x8xf32>
    %392 = vector.shape_cast %391 : vector<2x8xf32> to vector<2x8x1xf32>
    %393 = tpu.reciprocal %392 {approx = true} : vector<2x8x1xf32> -> vector<2x8x1xf32>
    %394 = vector.broadcast %393 : vector<2x8x1xf32> to vector<2x8x8xf32>
    %395 = arith.mulf %390, %394 : vector<2x8x8xf32>
    %396 = arith.truncf %395 : vector<2x8x8xf32> to vector<2x8x8xbf16>
    %397 = vector.extract_strided_slice %307 {offsets = [0, 0, 12], sizes = [2, 8, 4], strides = [1, 1, 1]} : vector<2x8x32xbf16> to vector<2x8x4xbf16>
    "tpu.trace_start"() <{level = 10 : i32, message = "bqk,bkd->bqd"}> : () -> ()
    %cst_157 = arith.constant dense<0.000000e+00> : vector<2x8x4xf32>
    %398 = tpu.matmul %396, %397, %cst_157 {dimension_numbers = #tpu.dot_dimension_numbers<[2], [1], [1], [2], [0, 0, 0, 1, 1, 2], [0], [0]>} : vector<2x8x8xbf16>, vector<2x8x4xbf16>, vector<2x8x4xf32> -> vector<2x8x4xf32>
    "tpu.trace_stop"() : () -> ()
    %399 = vector.shape_cast %398 : vector<2x8x4xf32> to vector<16x4xf32>
    %400 = arith.truncf %399 : vector<16x4xf32> to vector<16x4xbf16>
    %c1_158 = arith.constant 1 : index
    %c3_159 = arith.constant 3 : index
    %c0_160 = arith.constant 0 : index
    %c0_161 = arith.constant 0 : index
    %401 = vector.load %arg4[%c1_158, %c3_159, %c0_160, %c0_161] : memref<2x8x4x32xbf16, #tpu.memory_space<vmem>>, vector<1x1x4x32xbf16>
    %402 = vector.shape_cast %401 : vector<1x1x4x32xbf16> to vector<4x32xbf16>
    %cst_162 = arith.constant dense<0.000000e+00> : vector<16x32xf32>
    %403 = tpu.matmul %400, %402, %cst_162 {dimension_numbers = #tpu.dot_dimension_numbers<[1], [0], [0], [1], [0, 0, 1, 1], [], []>} : vector<16x4xbf16>, vector<4x32xbf16>, vector<16x32xf32> -> vector<16x32xf32>
    %404 = arith.addf %380, %403 : vector<16x32xf32>
    %405 = vector.extract_strided_slice %303 {offsets = [0, 0, 16], sizes = [2, 8, 4], strides = [1, 1, 1]} : vector<2x8x32xbf16> to vector<2x8x4xbf16>
    %406 = vector.extract_strided_slice %305 {offsets = [0, 0, 16], sizes = [2, 8, 4], strides = [1, 1, 1]} : vector<2x8x32xbf16> to vector<2x8x4xbf16>
    "tpu.trace_start"() <{level = 10 : i32, message = "bqd,bkd->bqk"}> : () -> ()
    %cst_163 = arith.constant dense<0.000000e+00> : vector<2x8x8xf32>
    %407 = tpu.matmul %405, %406, %cst_163 {dimension_numbers = #tpu.dot_dimension_numbers<[2], [2], [1], [1], [0, 0, 0, 1, 1, 1], [0], [0]>} : vector<2x8x4xbf16>, vector<2x8x4xbf16>, vector<2x8x8xf32> -> vector<2x8x8xf32>
    "tpu.trace_stop"() : () -> ()
    %408 = vector.broadcast %1 : vector<2x1x8xf32> to vector<2x8x8xf32>
    %409 = arith.addf %407, %408 : vector<2x8x8xf32>
    %cst_164 = arith.constant dense<0xFF800000> : vector<2x8xf32>
    %410 = vector.multi_reduction <maximumf>, %409, %cst_164 [2] : vector<2x8x8xf32> to vector<2x8xf32>
    %411 = vector.shape_cast %410 : vector<2x8xf32> to vector<2x8x1xf32>
    %412 = vector.broadcast %411 : vector<2x8x1xf32> to vector<2x8x8xf32>
    %413 = arith.subf %409, %412 : vector<2x8x8xf32>
    %414 = math.exp %413 : vector<2x8x8xf32>
    %cst_165 = arith.constant dense<0.000000e+00> : vector<2x8xf32>
    %415 = vector.multi_reduction <add>, %414, %cst_165 [2] : vector<2x8x8xf32> to vector<2x8xf32>
    %416 = vector.shape_cast %415 : vector<2x8xf32> to vector<2x8x1xf32>
    %417 = tpu.reciprocal %416 {approx = true} : vector<2x8x1xf32> -> vector<2x8x1xf32>
    %418 = vector.broadcast %417 : vector<2x8x1xf32> to vector<2x8x8xf32>
    %419 = arith.mulf %414, %418 : vector<2x8x8xf32>
    %420 = arith.truncf %419 : vector<2x8x8xf32> to vector<2x8x8xbf16>
    %421 = vector.extract_strided_slice %307 {offsets = [0, 0, 16], sizes = [2, 8, 4], strides = [1, 1, 1]} : vector<2x8x32xbf16> to vector<2x8x4xbf16>
    "tpu.trace_start"() <{level = 10 : i32, message = "bqk,bkd->bqd"}> : () -> ()
    %cst_166 = arith.constant dense<0.000000e+00> : vector<2x8x4xf32>
    %422 = tpu.matmul %420, %421, %cst_166 {dimension_numbers = #tpu.dot_dimension_numbers<[2], [1], [1], [2], [0, 0, 0, 1, 1, 2], [0], [0]>} : vector<2x8x8xbf16>, vector<2x8x4xbf16>, vector<2x8x4xf32> -> vector<2x8x4xf32>
    "tpu.trace_stop"() : () -> ()
    %423 = vector.shape_cast %422 : vector<2x8x4xf32> to vector<16x4xf32>
    %424 = arith.truncf %423 : vector<16x4xf32> to vector<16x4xbf16>
    %c1_167 = arith.constant 1 : index
    %c4_168 = arith.constant 4 : index
    %c0_169 = arith.constant 0 : index
    %c0_170 = arith.constant 0 : index
    %425 = vector.load %arg4[%c1_167, %c4_168, %c0_169, %c0_170] : memref<2x8x4x32xbf16, #tpu.memory_space<vmem>>, vector<1x1x4x32xbf16>
    %426 = vector.shape_cast %425 : vector<1x1x4x32xbf16> to vector<4x32xbf16>
    %cst_171 = arith.constant dense<0.000000e+00> : vector<16x32xf32>
    %427 = tpu.matmul %424, %426, %cst_171 {dimension_numbers = #tpu.dot_dimension_numbers<[1], [0], [0], [1], [0, 0, 1, 1], [], []>} : vector<16x4xbf16>, vector<4x32xbf16>, vector<16x32xf32> -> vector<16x32xf32>
    %428 = arith.addf %404, %427 : vector<16x32xf32>
    %429 = vector.extract_strided_slice %303 {offsets = [0, 0, 20], sizes = [2, 8, 4], strides = [1, 1, 1]} : vector<2x8x32xbf16> to vector<2x8x4xbf16>
    %430 = vector.extract_strided_slice %305 {offsets = [0, 0, 20], sizes = [2, 8, 4], strides = [1, 1, 1]} : vector<2x8x32xbf16> to vector<2x8x4xbf16>
    "tpu.trace_start"() <{level = 10 : i32, message = "bqd,bkd->bqk"}> : () -> ()
    %cst_172 = arith.constant dense<0.000000e+00> : vector<2x8x8xf32>
    %431 = tpu.matmul %429, %430, %cst_172 {dimension_numbers = #tpu.dot_dimension_numbers<[2], [2], [1], [1], [0, 0, 0, 1, 1, 1], [0], [0]>} : vector<2x8x4xbf16>, vector<2x8x4xbf16>, vector<2x8x8xf32> -> vector<2x8x8xf32>
    "tpu.trace_stop"() : () -> ()
    %432 = vector.broadcast %1 : vector<2x1x8xf32> to vector<2x8x8xf32>
    %433 = arith.addf %431, %432 : vector<2x8x8xf32>
    %cst_173 = arith.constant dense<0xFF800000> : vector<2x8xf32>
    %434 = vector.multi_reduction <maximumf>, %433, %cst_173 [2] : vector<2x8x8xf32> to vector<2x8xf32>
    %435 = vector.shape_cast %434 : vector<2x8xf32> to vector<2x8x1xf32>
    %436 = vector.broadcast %435 : vector<2x8x1xf32> to vector<2x8x8xf32>
    %437 = arith.subf %433, %436 : vector<2x8x8xf32>
    %438 = math.exp %437 : vector<2x8x8xf32>
    %cst_174 = arith.constant dense<0.000000e+00> : vector<2x8xf32>
    %439 = vector.multi_reduction <add>, %438, %cst_174 [2] : vector<2x8x8xf32> to vector<2x8xf32>
    %440 = vector.shape_cast %439 : vector<2x8xf32> to vector<2x8x1xf32>
    %441 = tpu.reciprocal %440 {approx = true} : vector<2x8x1xf32> -> vector<2x8x1xf32>
    %442 = vector.broadcast %441 : vector<2x8x1xf32> to vector<2x8x8xf32>
    %443 = arith.mulf %438, %442 : vector<2x8x8xf32>
    %444 = arith.truncf %443 : vector<2x8x8xf32> to vector<2x8x8xbf16>
    %445 = vector.extract_strided_slice %307 {offsets = [0, 0, 20], sizes = [2, 8, 4], strides = [1, 1, 1]} : vector<2x8x32xbf16> to vector<2x8x4xbf16>
    "tpu.trace_start"() <{level = 10 : i32, message = "bqk,bkd->bqd"}> : () -> ()
    %cst_175 = arith.constant dense<0.000000e+00> : vector<2x8x4xf32>
    %446 = tpu.matmul %444, %445, %cst_175 {dimension_numbers = #tpu.dot_dimension_numbers<[2], [1], [1], [2], [0, 0, 0, 1, 1, 2], [0], [0]>} : vector<2x8x8xbf16>, vector<2x8x4xbf16>, vector<2x8x4xf32> -> vector<2x8x4xf32>
    "tpu.trace_stop"() : () -> ()
    %447 = vector.shape_cast %446 : vector<2x8x4xf32> to vector<16x4xf32>
    %448 = arith.truncf %447 : vector<16x4xf32> to vector<16x4xbf16>
    %c1_176 = arith.constant 1 : index
    %c5_177 = arith.constant 5 : index
    %c0_178 = arith.constant 0 : index
    %c0_179 = arith.constant 0 : index
    %449 = vector.load %arg4[%c1_176, %c5_177, %c0_178, %c0_179] : memref<2x8x4x32xbf16, #tpu.memory_space<vmem>>, vector<1x1x4x32xbf16>
    %450 = vector.shape_cast %449 : vector<1x1x4x32xbf16> to vector<4x32xbf16>
    %cst_180 = arith.constant dense<0.000000e+00> : vector<16x32xf32>
    %451 = tpu.matmul %448, %450, %cst_180 {dimension_numbers = #tpu.dot_dimension_numbers<[1], [0], [0], [1], [0, 0, 1, 1], [], []>} : vector<16x4xbf16>, vector<4x32xbf16>, vector<16x32xf32> -> vector<16x32xf32>
    %452 = arith.addf %428, %451 : vector<16x32xf32>
    %453 = vector.extract_strided_slice %303 {offsets = [0, 0, 24], sizes = [2, 8, 4], strides = [1, 1, 1]} : vector<2x8x32xbf16> to vector<2x8x4xbf16>
    %454 = vector.extract_strided_slice %305 {offsets = [0, 0, 24], sizes = [2, 8, 4], strides = [1, 1, 1]} : vector<2x8x32xbf16> to vector<2x8x4xbf16>
    "tpu.trace_start"() <{level = 10 : i32, message = "bqd,bkd->bqk"}> : () -> ()
    %cst_181 = arith.constant dense<0.000000e+00> : vector<2x8x8xf32>
    %455 = tpu.matmul %453, %454, %cst_181 {dimension_numbers = #tpu.dot_dimension_numbers<[2], [2], [1], [1], [0, 0, 0, 1, 1, 1], [0], [0]>} : vector<2x8x4xbf16>, vector<2x8x4xbf16>, vector<2x8x8xf32> -> vector<2x8x8xf32>
    "tpu.trace_stop"() : () -> ()
    %456 = vector.broadcast %1 : vector<2x1x8xf32> to vector<2x8x8xf32>
    %457 = arith.addf %455, %456 : vector<2x8x8xf32>
    %cst_182 = arith.constant dense<0xFF800000> : vector<2x8xf32>
    %458 = vector.multi_reduction <maximumf>, %457, %cst_182 [2] : vector<2x8x8xf32> to vector<2x8xf32>
    %459 = vector.shape_cast %458 : vector<2x8xf32> to vector<2x8x1xf32>
    %460 = vector.broadcast %459 : vector<2x8x1xf32> to vector<2x8x8xf32>
    %461 = arith.subf %457, %460 : vector<2x8x8xf32>
    %462 = math.exp %461 : vector<2x8x8xf32>
    %cst_183 = arith.constant dense<0.000000e+00> : vector<2x8xf32>
    %463 = vector.multi_reduction <add>, %462, %cst_183 [2] : vector<2x8x8xf32> to vector<2x8xf32>
    %464 = vector.shape_cast %463 : vector<2x8xf32> to vector<2x8x1xf32>
    %465 = tpu.reciprocal %464 {approx = true} : vector<2x8x1xf32> -> vector<2x8x1xf32>
    %466 = vector.broadcast %465 : vector<2x8x1xf32> to vector<2x8x8xf32>
    %467 = arith.mulf %462, %466 : vector<2x8x8xf32>
    %468 = arith.truncf %467 : vector<2x8x8xf32> to vector<2x8x8xbf16>
    %469 = vector.extract_strided_slice %307 {offsets = [0, 0, 24], sizes = [2, 8, 4], strides = [1, 1, 1]} : vector<2x8x32xbf16> to vector<2x8x4xbf16>
    "tpu.trace_start"() <{level = 10 : i32, message = "bqk,bkd->bqd"}> : () -> ()
    %cst_184 = arith.constant dense<0.000000e+00> : vector<2x8x4xf32>
    %470 = tpu.matmul %468, %469, %cst_184 {dimension_numbers = #tpu.dot_dimension_numbers<[2], [1], [1], [2], [0, 0, 0, 1, 1, 2], [0], [0]>} : vector<2x8x8xbf16>, vector<2x8x4xbf16>, vector<2x8x4xf32> -> vector<2x8x4xf32>
    "tpu.trace_stop"() : () -> ()
    %471 = vector.shape_cast %470 : vector<2x8x4xf32> to vector<16x4xf32>
    %472 = arith.truncf %471 : vector<16x4xf32> to vector<16x4xbf16>
    %c1_185 = arith.constant 1 : index
    %c6_186 = arith.constant 6 : index
    %c0_187 = arith.constant 0 : index
    %c0_188 = arith.constant 0 : index
    %473 = vector.load %arg4[%c1_185, %c6_186, %c0_187, %c0_188] : memref<2x8x4x32xbf16, #tpu.memory_space<vmem>>, vector<1x1x4x32xbf16>
    %474 = vector.shape_cast %473 : vector<1x1x4x32xbf16> to vector<4x32xbf16>
    %cst_189 = arith.constant dense<0.000000e+00> : vector<16x32xf32>
    %475 = tpu.matmul %472, %474, %cst_189 {dimension_numbers = #tpu.dot_dimension_numbers<[1], [0], [0], [1], [0, 0, 1, 1], [], []>} : vector<16x4xbf16>, vector<4x32xbf16>, vector<16x32xf32> -> vector<16x32xf32>
    %476 = arith.addf %452, %475 : vector<16x32xf32>
    %477 = vector.extract_strided_slice %303 {offsets = [0, 0, 28], sizes = [2, 8, 4], strides = [1, 1, 1]} : vector<2x8x32xbf16> to vector<2x8x4xbf16>
    %478 = vector.extract_strided_slice %305 {offsets = [0, 0, 28], sizes = [2, 8, 4], strides = [1, 1, 1]} : vector<2x8x32xbf16> to vector<2x8x4xbf16>
    "tpu.trace_start"() <{level = 10 : i32, message = "bqd,bkd->bqk"}> : () -> ()
    %cst_190 = arith.constant dense<0.000000e+00> : vector<2x8x8xf32>
    %479 = tpu.matmul %477, %478, %cst_190 {dimension_numbers = #tpu.dot_dimension_numbers<[2], [2], [1], [1], [0, 0, 0, 1, 1, 1], [0], [0]>} : vector<2x8x4xbf16>, vector<2x8x4xbf16>, vector<2x8x8xf32> -> vector<2x8x8xf32>
    "tpu.trace_stop"() : () -> ()
    %480 = vector.broadcast %1 : vector<2x1x8xf32> to vector<2x8x8xf32>
    %481 = arith.addf %479, %480 : vector<2x8x8xf32>
    %cst_191 = arith.constant dense<0xFF800000> : vector<2x8xf32>
    %482 = vector.multi_reduction <maximumf>, %481, %cst_191 [2] : vector<2x8x8xf32> to vector<2x8xf32>
    %483 = vector.shape_cast %482 : vector<2x8xf32> to vector<2x8x1xf32>
    %484 = vector.broadcast %483 : vector<2x8x1xf32> to vector<2x8x8xf32>
    %485 = arith.subf %481, %484 : vector<2x8x8xf32>
    %486 = math.exp %485 : vector<2x8x8xf32>
    %cst_192 = arith.constant dense<0.000000e+00> : vector<2x8xf32>
    %487 = vector.multi_reduction <add>, %486, %cst_192 [2] : vector<2x8x8xf32> to vector<2x8xf32>
    %488 = vector.shape_cast %487 : vector<2x8xf32> to vector<2x8x1xf32>
    %489 = tpu.reciprocal %488 {approx = true} : vector<2x8x1xf32> -> vector<2x8x1xf32>
    %490 = vector.broadcast %489 : vector<2x8x1xf32> to vector<2x8x8xf32>
    %491 = arith.mulf %486, %490 : vector<2x8x8xf32>
    %492 = arith.truncf %491 : vector<2x8x8xf32> to vector<2x8x8xbf16>
    %493 = vector.extract_strided_slice %307 {offsets = [0, 0, 28], sizes = [2, 8, 4], strides = [1, 1, 1]} : vector<2x8x32xbf16> to vector<2x8x4xbf16>
    "tpu.trace_start"() <{level = 10 : i32, message = "bqk,bkd->bqd"}> : () -> ()
    %cst_193 = arith.constant dense<0.000000e+00> : vector<2x8x4xf32>
    %494 = tpu.matmul %492, %493, %cst_193 {dimension_numbers = #tpu.dot_dimension_numbers<[2], [1], [1], [2], [0, 0, 0, 1, 1, 2], [0], [0]>} : vector<2x8x8xbf16>, vector<2x8x4xbf16>, vector<2x8x4xf32> -> vector<2x8x4xf32>
    "tpu.trace_stop"() : () -> ()
    %495 = vector.shape_cast %494 : vector<2x8x4xf32> to vector<16x4xf32>
    %496 = arith.truncf %495 : vector<16x4xf32> to vector<16x4xbf16>
    %c1_194 = arith.constant 1 : index
    %c7_195 = arith.constant 7 : index
    %c0_196 = arith.constant 0 : index
    %c0_197 = arith.constant 0 : index
    %497 = vector.load %arg4[%c1_194, %c7_195, %c0_196, %c0_197] : memref<2x8x4x32xbf16, #tpu.memory_space<vmem>>, vector<1x1x4x32xbf16>
    %498 = vector.shape_cast %497 : vector<1x1x4x32xbf16> to vector<4x32xbf16>
    %cst_198 = arith.constant dense<0.000000e+00> : vector<16x32xf32>
    %499 = tpu.matmul %496, %498, %cst_198 {dimension_numbers = #tpu.dot_dimension_numbers<[1], [0], [0], [1], [0, 0, 1, 1], [], []>} : vector<16x4xbf16>, vector<4x32xbf16>, vector<16x32xf32> -> vector<16x32xf32>
    %500 = arith.addf %476, %499 : vector<16x32xf32>
    %c1_199 = arith.constant 1 : index
    %c0_200 = arith.constant 0 : index
    %c0_201 = arith.constant 0 : index
    %501 = vector.load %arg5[%c1_199, %c0_200, %c0_201] : memref<2x1x32xf32, #tpu.memory_space<vmem>>, vector<1x1x32xf32>
    %502 = vector.shape_cast %501 : vector<1x1x32xf32> to vector<1x32xf32>
    %503 = vector.broadcast %502 : vector<1x32xf32> to vector<16x32xf32>
    %504 = arith.addf %500, %503 : vector<16x32xf32>
    %505 = arith.addf %290, %504 : vector<16x32xf32>
    %c1_202 = arith.constant 1 : index
    %c0_203 = arith.constant 0 : index
    %c0_204 = arith.constant 0 : index
    %506 = vector.load %arg10[%c1_202, %c0_203, %c0_204] : memref<2x1x32xf32, #tpu.memory_space<vmem>>, vector<1x1x32xf32>
    %507 = vector.shape_cast %506 : vector<1x1x32xf32> to vector<1x32xf32>
    %c1_205 = arith.constant 1 : index
    %c0_206 = arith.constant 0 : index
    %c0_207 = arith.constant 0 : index
    %508 = vector.load %arg11[%c1_205, %c0_206, %c0_207] : memref<2x1x32xf32, #tpu.memory_space<vmem>>, vector<1x1x32xf32>
    %509 = vector.shape_cast %508 : vector<1x1x32xf32> to vector<1x32xf32>
    %cst_208 = arith.constant dense<0.000000e+00> : vector<16xf32>
    %510 = vector.multi_reduction <add>, %505, %cst_208 [1] : vector<16x32xf32> to vector<16xf32>
    %511 = vector.shape_cast %510 : vector<16xf32> to vector<16x1xf32>
    %cst_209 = arith.constant 3.200000e+01 : f32
    %512 = vector.broadcast %cst_209 : f32 to vector<16x1xf32>
    %513 = arith.divf %511, %512 : vector<16x1xf32>
    %514 = vector.broadcast %513 : vector<16x1xf32> to vector<16x32xf32>
    %515 = arith.subf %505, %514 : vector<16x32xf32>
    %516 = arith.mulf %515, %515 : vector<16x32xf32>
    %cst_210 = arith.constant dense<0.000000e+00> : vector<16xf32>
    %517 = vector.multi_reduction <add>, %516, %cst_210 [1] : vector<16x32xf32> to vector<16xf32>
    %518 = vector.shape_cast %517 : vector<16xf32> to vector<16x1xf32>
    %cst_211 = arith.constant 3.200000e+01 : f32
    %519 = vector.broadcast %cst_211 : f32 to vector<16x1xf32>
    %520 = arith.divf %518, %519 : vector<16x1xf32>
    %521 = vector.broadcast %513 : vector<16x1xf32> to vector<16x32xf32>
    %522 = arith.subf %505, %521 : vector<16x32xf32>
    %cst_212 = arith.constant 9.99999974E-6 : f32
    %523 = vector.broadcast %cst_212 : f32 to vector<16x1xf32>
    %524 = arith.addf %520, %523 : vector<16x1xf32>
    %525 = math.rsqrt %524 : vector<16x1xf32>
    %526 = vector.broadcast %525 : vector<16x1xf32> to vector<16x32xf32>
    %527 = arith.mulf %522, %526 : vector<16x32xf32>
    %528 = vector.broadcast %507 : vector<1x32xf32> to vector<16x32xf32>
    %529 = arith.mulf %527, %528 : vector<16x32xf32>
    %530 = vector.broadcast %509 : vector<1x32xf32> to vector<16x32xf32>
    %531 = arith.addf %529, %530 : vector<16x32xf32>
    %532 = arith.truncf %531 : vector<16x32xf32> to vector<16x32xbf16>
    %c1_213 = arith.constant 1 : index
    %c0_214 = arith.constant 0 : index
    %c0_215 = arith.constant 0 : index
    %533 = vector.load %arg6[%c1_213, %c0_214, %c0_215] : memref<2x32x128xbf16, #tpu.memory_space<vmem>>, vector<1x32x128xbf16>
    %534 = vector.shape_cast %533 : vector<1x32x128xbf16> to vector<32x128xbf16>
    %cst_216 = arith.constant dense<0.000000e+00> : vector<16x128xf32>
    %535 = tpu.matmul %532, %534, %cst_216 {dimension_numbers = #tpu.dot_dimension_numbers<[1], [0], [0], [1], [0, 0, 1, 1], [], []>} : vector<16x32xbf16>, vector<32x128xbf16>, vector<16x128xf32> -> vector<16x128xf32>
    %c1_217 = arith.constant 1 : index
    %c0_218 = arith.constant 0 : index
    %c0_219 = arith.constant 0 : index
    %536 = vector.load %arg7[%c1_217, %c0_218, %c0_219] : memref<2x1x128xf32, #tpu.memory_space<vmem>>, vector<1x1x128xf32>
    %537 = vector.shape_cast %536 : vector<1x1x128xf32> to vector<1x128xf32>
    %538 = vector.broadcast %537 : vector<1x128xf32> to vector<16x128xf32>
    %539 = arith.addf %535, %538 : vector<16x128xf32>
    %cst_220 = arith.constant 0.000000e+00 : f32
    %540 = vector.broadcast %cst_220 : f32 to vector<16x128xf32>
    %541 = arith.maximumf %539, %540 : vector<16x128xf32>
    %542 = arith.truncf %541 : vector<16x128xf32> to vector<16x128xbf16>
    %c1_221 = arith.constant 1 : index
    %c0_222 = arith.constant 0 : index
    %c0_223 = arith.constant 0 : index
    %543 = vector.load %arg8[%c1_221, %c0_222, %c0_223] : memref<2x128x32xbf16, #tpu.memory_space<vmem>>, vector<1x128x32xbf16>
    %544 = vector.shape_cast %543 : vector<1x128x32xbf16> to vector<128x32xbf16>
    %cst_224 = arith.constant dense<0.000000e+00> : vector<16x32xf32>
    %545 = tpu.matmul %542, %544, %cst_224 {dimension_numbers = #tpu.dot_dimension_numbers<[1], [0], [0], [1], [0, 0, 1, 1], [], []>} : vector<16x128xbf16>, vector<128x32xbf16>, vector<16x32xf32> -> vector<16x32xf32>
    %c1_225 = arith.constant 1 : index
    %c0_226 = arith.constant 0 : index
    %c0_227 = arith.constant 0 : index
    %546 = vector.load %arg9[%c1_225, %c0_226, %c0_227] : memref<2x1x32xf32, #tpu.memory_space<vmem>>, vector<1x1x32xf32>
    %547 = vector.shape_cast %546 : vector<1x1x32xf32> to vector<1x32xf32>
    %548 = vector.broadcast %547 : vector<1x32xf32> to vector<16x32xf32>
    %549 = arith.addf %545, %548 : vector<16x32xf32>
    %550 = arith.addf %531, %549 : vector<16x32xf32>
    %c1_228 = arith.constant 1 : index
    %c0_229 = arith.constant 0 : index
    %c0_230 = arith.constant 0 : index
    %551 = vector.load %arg12[%c1_228, %c0_229, %c0_230] : memref<2x1x32xf32, #tpu.memory_space<vmem>>, vector<1x1x32xf32>
    %552 = vector.shape_cast %551 : vector<1x1x32xf32> to vector<1x32xf32>
    %c1_231 = arith.constant 1 : index
    %c0_232 = arith.constant 0 : index
    %c0_233 = arith.constant 0 : index
    %553 = vector.load %arg13[%c1_231, %c0_232, %c0_233] : memref<2x1x32xf32, #tpu.memory_space<vmem>>, vector<1x1x32xf32>
    %554 = vector.shape_cast %553 : vector<1x1x32xf32> to vector<1x32xf32>
    %cst_234 = arith.constant dense<0.000000e+00> : vector<16xf32>
    %555 = vector.multi_reduction <add>, %550, %cst_234 [1] : vector<16x32xf32> to vector<16xf32>
    %556 = vector.shape_cast %555 : vector<16xf32> to vector<16x1xf32>
    %cst_235 = arith.constant 3.200000e+01 : f32
    %557 = vector.broadcast %cst_235 : f32 to vector<16x1xf32>
    %558 = arith.divf %556, %557 : vector<16x1xf32>
    %559 = vector.broadcast %558 : vector<16x1xf32> to vector<16x32xf32>
    %560 = arith.subf %550, %559 : vector<16x32xf32>
    %561 = arith.mulf %560, %560 : vector<16x32xf32>
    %cst_236 = arith.constant dense<0.000000e+00> : vector<16xf32>
    %562 = vector.multi_reduction <add>, %561, %cst_236 [1] : vector<16x32xf32> to vector<16xf32>
    %563 = vector.shape_cast %562 : vector<16xf32> to vector<16x1xf32>
    %cst_237 = arith.constant 3.200000e+01 : f32
    %564 = vector.broadcast %cst_237 : f32 to vector<16x1xf32>
    %565 = arith.divf %563, %564 : vector<16x1xf32>
    %566 = vector.broadcast %558 : vector<16x1xf32> to vector<16x32xf32>
    %567 = arith.subf %550, %566 : vector<16x32xf32>
    %cst_238 = arith.constant 9.99999974E-6 : f32
    %568 = vector.broadcast %cst_238 : f32 to vector<16x1xf32>
    %569 = arith.addf %565, %568 : vector<16x1xf32>
    %570 = math.rsqrt %569 : vector<16x1xf32>
    %571 = vector.broadcast %570 : vector<16x1xf32> to vector<16x32xf32>
    %572 = arith.mulf %567, %571 : vector<16x32xf32>
    %573 = vector.broadcast %552 : vector<1x32xf32> to vector<16x32xf32>
    %574 = arith.mulf %572, %573 : vector<16x32xf32>
    %575 = vector.broadcast %554 : vector<1x32xf32> to vector<16x32xf32>
    %576 = arith.addf %574, %575 : vector<16x32xf32>
    %577 = vector.shape_cast %576 : vector<16x32xf32> to vector<2x8x32xf32>
    %578 = vector.extract_strided_slice %577 {offsets = [0, 7, 0], sizes = [2, 1, 32], strides = [1, 1, 1]} : vector<2x8x32xf32> to vector<2x1x32xf32>
    %579 = vector.shape_cast %578 : vector<2x1x32xf32> to vector<2x32xf32>
    %c0_239 = arith.constant 0 : index
    %c0_240 = arith.constant 0 : index
    %580 = vector.load %arg14[%c0_239, %c0_240] : memref<2x32xf32, #tpu.memory_space<vmem>>, vector<2x32xf32>
    tpu.vector_store %arg14[%c0_239, %c0_240], %579 {strides = array<i32>} : memref<2x32xf32, #tpu.memory_space<vmem>>, vector<2x32xf32>,
    return
  }
}

</mosaic_0001>

<bundles_post_ra>
// kernel: tpu_custom_call.1
= control target key start
LH: loop header
LB: loop body
LE: loop exit
PB: predicated region body
PF: predicated region fallthrough
CT: control target
= control target key end

     0   :  { %v6301_v1 = vmov 0.0   ;;  %vm6302_vm0 = vmmov 0   ;;  %vm77_vm1 = vcmask 261120   ;;  %s7469_s0 = inlined_call_operand.vmem [shape: f32[2,8,32], index: 0, kind: input, shape index: {}]   ;;  %s7470_s1 = inlined_call_operand.vmem [shape: f32[2,1,8], index: 1, kind: input, shape index: {}]   ;;  %s7471_s2 = inlined_call_operand.vmem [shape: bf16[2,32,96], index: 2, kind: input, shape index: {}]   ;;  %s7472_s3 = inlined_call_operand.vmem [shape: f32[2,1,96], index: 3, kind: input, shape index: {}]   ;;  %s7473_s4 = inlined_call_operand.vmem [shape: bf16[2,8,4,32], index: 4, kind: input, shape index: {}]   ;;  %s7474_s5 = inlined_call_operand.vmem [shape: f32[2,1,32], index: 5, kind: input, shape index: {}]   ;;  %s7475_s6 = inlined_call_operand.vmem [shape: bf16[2,32,128], index: 6, kind: input, shape index: {}]   ;;  %s7476_s7 = inlined_call_operand.vmem [shape: f32[2,1,128], index: 7, kind: input, shape index: {}]   ;;  %s7477_s8 = inlined_call_operand.vmem [shape: bf16[2,128,32], index: 8, kind: input, shape index: {}]   ;;  %s7478_s9 = inlined_call_operand.vmem [shape: f32[2,1,32], index: 9, kind: input, shape index: {}]   ;;  %s7479_s10 = inlined_call_operand.vmem [shape: f32[2,1,32], index: 10, kind: input, shape index: {}]   ;;  %s7480_s11 = inlined_call_operand.vmem [shape: f32[2,1,32], index: 11, kind: input, shape index: {}]   ;;  %s7481_s12 = inlined_call_operand.vmem [shape: f32[2,1,32], index: 12, kind: input, shape index: {}]   ;;  %s7482_s13 = inlined_call_operand.vmem [shape: f32[2,1,32], index: 13, kind: input, shape index: {}]   ;;  %s7483_s14 = inlined_call_operand.hbm [shape: f32[2,32], index: 14, kind: output, shape index: {}]  }
   0x1   :  { %v6105_v0 = vld [vmem:[%s7471_s2 + $0x8] sm:$0xff]   ;;  %5527 = vmatprep.subr.bf16.mxu1 %v6301_v1  ;;  %5553 = vmatprep.subr.bf16.mxu0 %v6301_v1  ;;  %v6106_v2 = vld [vmem:[%s7471_s2] sm:$0xff]  }
   0x2   :  { %5528 = vmatpush3.bf16.msra.mxu1 %v6105_v0  ;;  %5531 = vmatprep.mubr.msk.bf16.mxu1 %vm6302_vm0, %v6301_v1  ;;  %v49_v3 = vld [vmem:[%s7469_s0] sm:$0xff]  ;;  %v50_v4 = vld [vmem:[%s7469_s0 + $0x8] sm:$0xff] }
   0x3   :  { %5529 = vmatprep.subr.bf16.mxu1 %v6301_v1  ;;  %5555 = vmatprep.mubr.msk.bf16.mxu0 %vm6302_vm0, %v6301_v1  ;;  %v53_v5 = vpack.c.bf16 %v50_v4, %v49_v3 }
   0x6   :  { %5530 = vmatpush3.bf16.msra.mxu1 %v6106_v2 }
   0x7   :  { %5535 = vmatprep.subr.bf16.mxu1 %v6301_v1 }
   0x9   :  { %5532 = vmatmul.mubr.msk.bf16.vlgmr.msra.gmra.mxu1 %vm77_vm1, %v53_v5 }
   0xa   :  { %5537 = vmatprep.mubr.msk.bf16.mxu1 %vm6302_vm0, %v6301_v1 }
   0xb   :  { %19 = vsyncpa [#allocation3], 0  ;;  %v5164_v6 = vld [vmem:[%s7472_s3] ss:$0 sm:$0xff]  ;;  %s6303_s23 = smov 96   ;;  %vm143_vm2 = vcmask 31744  }
   0xc   :  { %v6455_v23 = vld [vmem:[%s7470_s1] ss:$0 sm:$0xff]  ;;  %vm239_vm3 = vcmask 64512   ;;  %v6462_v30 = vld [vmem:[%s7470_s1 + $0x1] ss:$0 sm:$0xff]  ;;  %s6304_s28 = smov 64  }
   0xd   :  { %s6305_s29 = smov 92   ;;  %vm269_vm4 = vcmask 1043456   ;;  %s6306_s30 = smov 124   ;;  %vm591_vm5 = vcmask 1041408   ;;  %vm5146_vm6 = vcmask 261127   ;;  %vm5148_vm7 = vcmask 253952  }
   0xe   :  { %s6307_s15 = smov 60   ;;  %s6308_s16 = smov 120  }
   0xf   :  { %s6309_s17 = smov 88   ;;  %s6310_s22 = smov 56  }
  0x10   :  { %s6311_s24 = smov 84   ;;  %s7510_s25 = smov 116  }
  0x11   :  { %s7508_s18 = smov 52   ;;  %s7506_s19 = smov 80  }
  0x12   :  { %s7486_s20 = smov 112   ;;  %s7492_s27 = smov 48  }
  0x13   :  { %s7484_s21 = smov 76   ;;  %s7488_s26 = smov 108  }
  0xc9   :  { %v115_v7 = vpop.f32.mrf.mxu1 }
  0xca   :  { %v116_v8 = vadd.f32 %v5164_v6, %v115_v7 }
  0xcb   :  { %v5533_v9 = vpop.f32.mrf.mxu1 }
  0xcc   :  { %v6428_v10 = vpack.c.bf16 %v116_v8, %v116_v8  ;;  %v122_v17 = vmul.f32 0.5, %v116_v8 }
  0xcd   :  { %v118_v11 = vpop.f32.mrf.mxu1 }
  0xce   :  { %v119_v12 = vadd.f32 %v5164_v6, %v118_v11  ;;  %141 = vrot.lane.b32.xlu0 %v6428_v10, %s6303_s23  ;;  %v6438_v19 = vpack.c.bf16 %v122_v17, %v122_v17 }
  0xcf   :  { %v5534_v13 = vpop.f32.mrf.mxu1 }
  0xd0   :  { %v6432_v14 = vpack.c.bf16 %v119_v12, %v119_v12  ;;  %v123_v21 = vmul.f32 0.5, %v119_v12 }
  0xd2   :  { %191 = vrot.lane.b32.xlu0 %v6432_v14, %s6303_s23  ;;  %v6446_v22 = vpack.c.bf16 %v123_v21, %v123_v21 }
 0x140   :  { %v142_v15 = vpop.permute.xlu0 %141 }
 0x141   :  { %v148_v16 = vsel %vm143_vm2, %v142_v15, 0 }
 0x142   :  { %5536 = vmatpush3.bf16.xpose.msra.mxu1 %v148_v16 }
 0x143   :  { %5541 = vmatprep.subr.bf16.mxu1 %v6301_v1 }
 0x144   :  { %v192_v18 = vpop.permute.xlu0 %191 }
 0x145   :  { %v197_v20 = vsel %vm143_vm2, %v192_v18, 0 }
 0x149   :  { %5538 = vmatmul.mubr.msk.bf16.vlgmr.msra.gmra.mxu1 %vm143_vm2, %v6438_v19 }
 0x14a   :  { %5542 = vmatpush3.bf16.xpose.msra.mxu1 %v197_v20  ;;  %5543 = vmatprep.mubr.msk.bf16.mxu1 %vm6302_vm0, %v6301_v1 }
 0x14b   :  { %5547 = vmatprep.subr.bf16.mxu1 %v6301_v1 }
 0x151   :  { %5544 = vmatmul.mubr.msk.bf16.vlgmr.msra.gmra.mxu1 %vm143_vm2, %v6446_v22 }
 0x152   :  { %5549 = vmatprep.mubr.msk.bf16.mxu1 %vm6302_vm0, %v6301_v1 }
 0x209   :  { %v184_v24 = vpop.f32.mrf.mxu1 }
 0x20a   :  { %v185_v25 = vadd.f32 %v6455_v23, %v184_v24 }
 0x20b   :  { %v5539_v26 = vpop.f32.mrf.mxu1 }
 0x20c   :  { %v240_v27 = vsel %vm239_vm3, %v185_v25, -inf }
 0x20d   :  { %241 = vmax.xlane.f32.xlu1 %v240_v27  ;;  %v187_v28 = vpop.f32.mrf.mxu1 }
 0x20f   :  { %v5540_v29 = vpop.f32.mrf.mxu1 }
 0x211   :  { %v233_v31 = vpop.f32.mrf.mxu1 }
 0x212   :  { %v234_v32 = vadd.f32 %v6462_v30, %v233_v31 }
 0x213   :  { %v5545_v33 = vpop.f32.mrf.mxu1 }
 0x214   :  { %v243_v34 = vsel %vm239_vm3, %v234_v32, -inf }
 0x215   :  { %244 = vmax.xlane.f32.xlu1 %v243_v34  ;;  %v236_v35 = vpop.f32.mrf.mxu1 }
 0x217   :  { %v5546_v36 = vpop.f32.mrf.mxu1 }
 0x226   :  { %264 = vrot.lane.b32.xlu1 %v6428_v10, %s6304_s28 }
 0x22a   :  { %313 = vrot.lane.b32.xlu1 %v6432_v14, %s6304_s28 }
 0x22e   :  { %366 = vrot.lane.b32.xlu1 %v6428_v10, %s6305_s29 }
 0x296   :  { %v242_v37 = vpop.xlane.xlu1 %241 }
 0x297   :  { %v246_v38 = vsub.f32 %v185_v25, %v242_v37 }
 0x299   :  { %v248_v39 = vmul.f32 1.442695, %v246_v38 }
 0x29b   :  { %6129 = vpow2.f32 %v248_v39 }
 0x29e   :  { %v245_v40 = vpop.xlane.xlu1 %244 }
 0x29f   :  { %v247_v41 = vsub.f32 %v234_v32, %v245_v40 }
 0x2a1   :  { %v250_v42 = vmul.f32 1.442695, %v247_v41 }
 0x2a2   :  { %v265_v43 = vpop.permute.xlu1 %264 }
 0x2a3   :  { %6131 = vpow2.f32 %v250_v42  ;;  %v271_v44 = vsel %vm269_vm4, %v265_v43, 0 }
 0x2a4   :  { %5548 = vmatpush3.bf16.msra.mxu1 %v271_v44 }
 0x2a5   :  { %5559 = vmatprep.subr.bf16.mxu1 %v6301_v1 }
 0x2a6   :  { %v314_v45 = vpop.permute.xlu1 %313 }
 0x2a7   :  { %v319_v46 = vsel %vm269_vm4, %v314_v45, 0 }
 0x2a8   :  { %v6130_v47 = vpop.eup %6129  ;;  %5554 = vmatpush3.bf16.msra.mxu0 %v319_v46 }
 0x2a9   :  { %v252_v48 = vsel %vm239_vm3, %v6130_v47, 0.0  ;;  %5565 = vmatprep.subr.bf16.mxu0 %v6301_v1 }
 0x2aa   :  { %253 = vadd.xlane.f32.xlu0 %v252_v48  ;;  %v367_v52 = vpop.permute.xlu1 %366 }
 0x2ab   :  { %v372_v57 = vsel %vm143_vm2, %v367_v52, 0 }
 0x2b0   :  { %v6132_v49 = vpop.eup %6131 }
 0x2b1   :  { %v255_v50 = vsel %vm239_vm3, %v6132_v49, 0.0 }
 0x2b2   :  { %256 = vadd.xlane.f32.xlu1 %v255_v50 }
 0x2c0   :  { %364 = vrot.lane.b32.xlu0 %v6438_v19, %s6306_s30 }
 0x2c3   :  { %417 = vrot.lane.b32.xlu1 %v6432_v14, %s6305_s29 }
 0x2c7   :  { %415 = vrot.lane.b32.xlu1 %v6446_v22, %s6306_s30 }
 0x333   :  { %v254_v51 = vpop.xlane.xlu0 %253 }
 0x334   :  { %6133 = vrcp.f32 %v254_v51 }
 0x337   :  { %v365_v62 = vpop.permute.xlu0 %364 }
 0x33b   :  { %v257_v53 = vpop.xlane.xlu1 %256 }
 0x33c   :  { %6135 = vrcp.f32 %v257_v53 }
 0x33f   :  { %v418_v60 = vpop.permute.xlu1 %417 }
 0x340   :  { %v423_v63 = vsel %vm143_vm2, %v418_v60, 0 }
 0x341   :  { %v6134_v54 = vpop.eup %6133 }
 0x342   :  { %v260_v55 = vmul.f32 %v6134_v54, %v6130_v47 }
 0x343   :  { %v416_v0 = vpop.permute.xlu1 %415 }
 0x344   :  { %v262_v56 = vpack.c.bf16 %v260_v55, %v260_v55 }
 0x346   :  { %5550 = vmatmul.mubr.msk.bf16.vlgmr.msra.gmra.mxu1 %vm239_vm3, %v262_v56 }
 0x347   :  { %5560 = vmatpush3.bf16.xpose.msra.mxu1 %v372_v57  ;;  %5561 = vmatprep.mubr.msk.bf16.mxu1 %vm6302_vm0, %v6301_v1  ;;  %v5178_v57 = vld [vmem:[%s7473_s4 + $0x2] sm:$0x3] }
 0x348   :  { %5571 = vmatprep.subr.bf16.mxu1 %v6301_v1 }
 0x349   :  { %v6136_v58 = vpop.eup %6135 }
 0x34a   :  { %v261_v59 = vmul.f32 %v6136_v58, %v6132_v49  ;;  %v362_v49 = vld [vmem:[%s7473_s4] sm:$0x3]  ;;  %v593_v58 = vsel %vm591_vm5, %v5178_v57, 0 }
 0x34b   :  { %v640_v52 = vsel %vm591_vm5, %v362_v49, 0 }
 0x34c   :  { %v263_v61 = vpack.c.bf16 %v261_v59, %v261_v59 }
 0x34e   :  { %5556 = vmatmul.mubr.msk.bf16.vlgmr.msra.gmra.mxu0 %vm239_vm3, %v263_v61  ;;  %5562 = vmatmul.mubr.msk.bf16.vlgmr.msra.gmra.mxu1 %vm143_vm2, %v365_v62 }
 0x34f   :  { %5566 = vmatpush3.bf16.xpose.msra.mxu0 %v423_v63  ;;  %5567 = vmatprep.mubr.msk.bf16.mxu0 %vm6302_vm0, %v6301_v1 }
 0x350   :  { %5577 = vmatprep.subr.bf16.mxu0 %v6301_v1  ;;  %5573 = vmatprep.mubr.msk.bf16.mxu1 %vm6302_vm0, %v6301_v1 }
 0x356   :  { %5568 = vmatmul.mubr.msk.bf16.vlgmr.msra.gmra.mxu0 %vm143_vm2, %v416_v0 }
 0x357   :  { %5579 = vmatprep.mubr.msk.bf16.mxu0 %vm6302_vm0, %v6301_v1 }
 0x406   :  { %v6500_v2 = vpop.f32.mrf.mxu1 }
 0x408   :  { %v5551_v3 = vpop.f32.mrf.mxu1 }
 0x40a   :  { %v310_v4 = vpop.f32.mrf.mxu1 }
 0x40c   :  { %v5552_v5 = vpop.f32.mrf.mxu1 }
 0x40e   :  { %v6502_v6 = vpop.f32.mrf.mxu0  ;;  %v408_v7 = vpop.f32.mrf.mxu1 }
 0x40f   :  { %v361_v8 = vpack.c.bf16 %v6502_v6, %v6500_v2  ;;  %v409_v9 = vadd.f32 %v6455_v23, %v408_v7 }
 0x410   :  { %v5557_v11 = vpop.f32.mrf.mxu0  ;;  %v5563_v12 = vpop.f32.mrf.mxu1 }
 0x411   :  { %v465_v13 = vsel %vm239_vm3, %v409_v9, -inf }
 0x412   :  { %v358_v15 = vpop.f32.mrf.mxu0  ;;  %466 = vmax.xlane.f32.xlu1 %v465_v13  ;;  %v411_v16 = vpop.f32.mrf.mxu1 }
 0x414   :  { %v5558_v17 = vpop.f32.mrf.mxu0  ;;  %v5564_v18 = vpop.f32.mrf.mxu1 }
 0x416   :  { %v459_v20 = vpop.f32.mrf.mxu0 }
 0x417   :  { %v460_v21 = vadd.f32 %v6462_v30, %v459_v20 }
 0x418   :  { %v5569_v24 = vpop.f32.mrf.mxu0 }
 0x419   :  { %v468_v25 = vsel %vm239_vm3, %v460_v21, -inf }
 0x41a   :  { %469 = vmax.xlane.f32.xlu0 %v468_v25  ;;  %v462_v26 = vpop.f32.mrf.mxu0 }
 0x41c   :  { %v5570_v27 = vpop.f32.mrf.mxu0 }
 0x430   :  { %537 = vrot.lane.b32.xlu0 %v6432_v14, %s6307_s15 }
 0x434   :  { %683 = vrot.lane.b32.xlu0 %v6438_v19, %s6308_s16 }
 0x49b   :  { %v467_v28 = vpop.xlane.xlu1 %466 }
 0x49c   :  { %v471_v29 = vsub.f32 %v409_v9, %v467_v28 }
 0x49e   :  { %v473_v31 = vmul.f32 1.442695, %v471_v29 }
 0x4a0   :  { %6137 = vpow2.f32 %v473_v31 }
 0x4a3   :  { %v470_v32 = vpop.xlane.xlu0 %469 }
 0x4a4   :  { %v472_v33 = vsub.f32 %v460_v21, %v470_v32 }
 0x4a6   :  { %v475_v34 = vmul.f32 1.442695, %v472_v33 }
 0x4a7   :  { %v538_v35 = vpop.permute.xlu0 %537 }
 0x4a8   :  { %6139 = vpow2.f32 %v475_v34  ;;  %v543_v36 = vsel %vm269_vm4, %v538_v35, 0 }
 0x4a9   :  { %5578 = vmatpush3.bf16.msra.mxu0 %v543_v36 }
 0x4aa   :  { %5589 = vmatprep.subr.bf16.mxu0 %v6301_v1 }
 0x4ab   :  { %v684_v7 = vpop.permute.xlu0 %683 }
 0x4ad   :  { %v6138_v37 = vpop.eup %6137 }
 0x4ae   :  { %v477_v38 = vsel %vm239_vm3, %v6138_v37, 0.0 }
 0x4af   :  { %478 = vadd.xlane.f32.xlu1 %v477_v38 }
 0x4b5   :  { %v6140_v39 = vpop.eup %6139 }
 0x4b6   :  { %v480_v40 = vsel %vm239_vm3, %v6140_v39, 0.0 }
 0x4b7   :  { %481 = vadd.xlane.f32.xlu1 %v480_v40 }
 0x4c8   :  { %489 = vrot.lane.b32.xlu1 %v6428_v10, %s6307_s15 }
 0x4cc   :  { %685 = vrot.lane.b32.xlu1 %v6428_v10, %s6309_s17 }
 0x4d0   :  { %735 = vrot.lane.b32.xlu1 %v6432_v14, %s6309_s17 }
 0x4d4   :  { %733 = vrot.lane.b32.xlu1 %v6446_v22, %s6308_s16 }
 0x538   :  { %v479_v41 = vpop.xlane.xlu1 %478 }
 0x539   :  { %6141 = vrcp.f32 %v479_v41 }
 0x540   :  { %v482_v42 = vpop.xlane.xlu1 %481 }
 0x541   :  { %6143 = vrcp.f32 %v482_v42 }
 0x544   :  { %v490_v43 = vpop.permute.xlu1 %489 }
 0x545   :  { %v495_v44 = vsel %vm269_vm4, %v490_v43, 0 }
 0x546   :  { %v6142_v45 = vpop.eup %6141  ;;  %5572 = vmatpush3.bf16.msra.mxu1 %v495_v44 }
 0x547   :  { %v485_v46 = vmul.f32 %v6142_v45, %v6138_v37  ;;  %5583 = vmatprep.subr.bf16.mxu1 %v6301_v1 }
 0x548   :  { %v686_v53 = vpop.permute.xlu1 %685 }
 0x549   :  { %v487_v47 = vpack.c.bf16 %v485_v46, %v485_v46  ;;  %v691_v3 = vsel %vm143_vm2, %v686_v53, 0 }
 0x54b   :  { %5574 = vmatmul.mubr.msk.bf16.vlgmr.msra.gmra.mxu1 %vm239_vm3, %v487_v47 }
 0x54c   :  { %5585 = vmatprep.mubr.msk.bf16.mxu1 %vm6302_vm0, %v6301_v1  ;;  %v736_v54 = vpop.permute.xlu1 %735  ;;  %5584 = vmatpush3.bf16.msra.mxu1 %v593_v58  ;;  %v5185_v58 = vld [vmem:[%s7473_s4 + $0x4] sm:$0x3] }
 0x54d   :  { %v741_v55 = vsel %vm143_vm2, %v736_v54, 0  ;;  %5595 = vmatprep.subr.bf16.mxu1 %v6301_v1 }
 0x54e   :  { %v6144_v48 = vpop.eup %6143 }
 0x54f   :  { %v486_v50 = vmul.f32 %v6144_v48, %v6140_v39 }
 0x550   :  { %v734_v56 = vpop.permute.xlu1 %733 }
 0x551   :  { %v488_v51 = vpack.c.bf16 %v486_v50, %v486_v50 }
 0x553   :  { %5580 = vmatmul.mubr.msk.bf16.vlgmr.msra.gmra.mxu0 %vm239_vm3, %v488_v51 }
 0x554   :  { %5590 = vmatpush3.bf16.msra.mxu0 %v640_v52  ;;  %5591 = vmatprep.mubr.msk.bf16.mxu0 %vm6302_vm0, %v6301_v1 }
 0x555   :  { %5601 = vmatprep.subr.bf16.mxu0 %v6301_v1 }
 0x55b   :  { %5592 = vmatmul.mubr.msk.bf16.vlgmr.msra.gmra.mxu0 %vm143_vm2, %v361_v8 }
 0x55c   :  { %5602 = vmatpush3.bf16.xpose.msra.mxu0 %v741_v55  ;;  %5603 = vmatprep.mubr.msk.bf16.mxu0 %vm6302_vm0, %v6301_v1 }
 0x55d   :  { %5613 = vmatprep.subr.bf16.mxu0 %v6301_v1 }
 0x563   :  { %5604 = vmatmul.mubr.msk.bf16.vlgmr.msra.gmra.mxu0 %vm143_vm2, %v734_v56 }
 0x564   :  { %5615 = vmatprep.mubr.msk.bf16.mxu0 %vm6302_vm0, %v6301_v1 }
 0x60b   :  { %v531_v59 = vpop.f32.mrf.mxu1 }
 0x60d   :  { %v5575_v60 = vpop.f32.mrf.mxu1 }
 0x60f   :  { %v534_v61 = vpop.f32.mrf.mxu1 }
 0x611   :  { %v5576_v62 = vpop.f32.mrf.mxu1 }
 0x613   :  { %v579_v63 = vpop.f32.mrf.mxu0 }
 0x614   :  { %v585_v0 = vpack.c.bf16 %v579_v63, %v531_v59  ;;  %v910_v59 = vsel %vm591_vm5, %v5185_v58, 0 }
 0x615   :  { %v5581_v2 = vpop.f32.mrf.mxu0 }
 0x616   :  { %5586 = vmatmul.mubr.msk.bf16.vlgmr.msra.gmra.mxu1 %vm143_vm2, %v585_v0 }
 0x617   :  { %5596 = vmatpush3.bf16.xpose.msra.mxu1 %v691_v3  ;;  %v582_v4 = vpop.f32.mrf.mxu0  ;;  %5597 = vmatprep.mubr.msk.bf16.mxu1 %vm6302_vm0, %v6301_v1 }
 0x618   :  { %5607 = vmatprep.subr.bf16.mxu1 %v6301_v1 }
 0x619   :  { %v5582_v5 = vpop.f32.mrf.mxu0 }
 0x61b   :  { %v6560_v6 = vpop.f32.mrf.mxu0 }
 0x61d   :  { %v5593_v8 = vpop.f32.mrf.mxu0 }
 0x61e   :  { %5598 = vmatmul.mubr.msk.bf16.vlgmr.msra.gmra.mxu1 %vm143_vm2, %v684_v7 }
 0x61f   :  { %v6563_v9 = vpop.f32.mrf.mxu0  ;;  %5609 = vmatprep.mubr.msk.bf16.mxu1 %vm6302_vm0, %v6301_v1 }
 0x621   :  { %v5594_v11 = vpop.f32.mrf.mxu0 }
 0x623   :  { %v777_v12 = vpop.f32.mrf.mxu0 }
 0x624   :  { %v778_v13 = vadd.f32 %v6462_v30, %v777_v12 }
 0x625   :  { %v5605_v15 = vpop.f32.mrf.mxu0 }
 0x626   :  { %v786_v16 = vsel %vm239_vm3, %v778_v13, -inf }
 0x627   :  { %787 = vmax.xlane.f32.xlu1 %v786_v16  ;;  %v780_v17 = vpop.f32.mrf.mxu0 }
 0x629   :  { %v5606_v18 = vpop.f32.mrf.mxu0 }
 0x638   :  { %807 = vrot.lane.b32.xlu1 %v6428_v10, %s6310_s22 }
 0x63c   :  { %957 = vrot.lane.b32.xlu1 %v6428_v10, %s6311_s24 }
 0x640   :  { %1007 = vrot.lane.b32.xlu1 %v6432_v14, %s6311_s24 }
 0x644   :  { %1005 = vrot.lane.b32.xlu1 %v6446_v22, %s7510_s25 }
 0x6b0   :  { %v788_v20 = vpop.xlane.xlu1 %787 }
 0x6b1   :  { %v790_v25 = vsub.f32 %v778_v13, %v788_v20 }
 0x6b3   :  { %v793_v26 = vmul.f32 1.442695, %v790_v25 }
 0x6b4   :  { %v808_v21 = vpop.permute.xlu1 %807 }
 0x6b5   :  { %v813_v24 = vsel %vm269_vm4, %v808_v21, 0  ;;  %6145 = vpow2.f32 %v793_v26 }
 0x6b6   :  { %5608 = vmatpush3.bf16.msra.mxu1 %v813_v24 }
 0x6b7   :  { %5619 = vmatprep.subr.bf16.mxu1 %v6301_v1 }
 0x6b8   :  { %v958_v51 = vpop.permute.xlu1 %957 }
 0x6b9   :  { %v963_v53 = vsel %vm143_vm2, %v958_v51, 0  ;;  %v5191_v51 = vld [vmem:[%s7473_s4 + $0x6] sm:$0x3] }
 0x6bc   :  { %v1008_v2 = vpop.permute.xlu1 %1007 }
 0x6bd   :  { %v1013_v13 = vsel %vm143_vm2, %v1008_v2, 0 }
 0x6c0   :  { %v1006_v18 = vpop.permute.xlu1 %1005 }
 0x6c2   :  { %v6146_v36 = vpop.eup %6145 }
 0x6c3   :  { %v798_v39 = vsel %vm239_vm3, %v6146_v36, 0.0 }
 0x6d6   :  { %v6579_v27 = vpop.f32.mrf.mxu1 }
 0x6d8   :  { %v5587_v28 = vpop.f32.mrf.mxu1 }
 0x6d9   :  { %v677_v28 = vadd.f32 %v6560_v6, %v6579_v27 }
 0x6da   :  { %v6581_v29 = vpop.f32.mrf.mxu1 }
 0x6dc   :  { %v5588_v31 = vpop.f32.mrf.mxu1 }
 0x6de   :  { %v727_v32 = vpop.f32.mrf.mxu1 }
 0x6df   :  { %v728_v33 = vadd.f32 %v6455_v23, %v727_v32 }
 0x6e0   :  { %v5599_v34 = vpop.f32.mrf.mxu1 }
 0x6e1   :  { %v783_v35 = vsel %vm239_vm3, %v728_v33, -inf  ;;  %v680_v34 = vadd.f32 %v6563_v9, %v6581_v29 }
 0x6e2   :  { %784 = vmax.xlane.f32.xlu0 %v783_v35  ;;  %v730_v37 = vpop.f32.mrf.mxu1 }
 0x6e4   :  { %v5600_v38 = vpop.f32.mrf.mxu1 }
 0x6e6   :  { %799 = vadd.xlane.f32.xlu0 %v798_v39 }
 0x76b   :  { %v785_v40 = vpop.xlane.xlu0 %784 }
 0x76c   :  { %v789_v41 = vsub.f32 %v728_v33, %v785_v40 }
 0x76e   :  { %v791_v42 = vmul.f32 1.442695, %v789_v41 }
 0x76f   :  { %v800_v45 = vpop.xlane.xlu0 %799 }
 0x770   :  { %6147 = vpow2.f32 %v791_v42 }
 0x771   :  { %6149 = vrcp.f32 %v800_v45 }
 0x77d   :  { %v6148_v43 = vpop.eup %6147 }
 0x77e   :  { %v795_v44 = vsel %vm239_vm3, %v6148_v43, 0.0  ;;  %v6150_v46 = vpop.eup %6149 }
 0x77f   :  { %796 = vadd.xlane.f32.xlu0 %v795_v44  ;;  %v804_v48 = vmul.f32 %v6150_v46, %v6146_v36 }
 0x781   :  { %v806_v52 = vpack.c.bf16 %v804_v48, %v804_v48 }
 0x795   :  { %855 = vrot.lane.b32.xlu0 %v6432_v14, %s6310_s22 }
 0x799   :  { %955 = vrot.lane.b32.xlu0 %v6438_v19, %s7510_s25 }
 0x808   :  { %v797_v47 = vpop.xlane.xlu0 %796 }
 0x809   :  { %6151 = vrcp.f32 %v797_v47 }
 0x80c   :  { %v856_v49 = vpop.permute.xlu0 %855 }
 0x80d   :  { %v861_v50 = vsel %vm269_vm4, %v856_v49, 0 }
 0x80e   :  { %5614 = vmatpush3.bf16.msra.mxu0 %v861_v50 }
 0x80f   :  { %5625 = vmatprep.subr.bf16.mxu0 %v6301_v1 }
 0x810   :  { %v956_v56 = vpop.permute.xlu0 %955 }
 0x811   :  { %5616 = vmatmul.mubr.msk.bf16.vlgmr.msra.gmra.mxu0 %vm239_vm3, %v806_v52  ;;  %v1182_v52 = vsel %vm591_vm5, %v5191_v51, 0  ;;  %v5197_v51 = vld [vmem:[%s7473_s4 + $0x8] sm:$0x3] }
 0x812   :  { %5626 = vmatpush3.bf16.xpose.msra.mxu0 %v963_v53  ;;  %5627 = vmatprep.mubr.msk.bf16.mxu0 %vm6302_vm0, %v6301_v1 }
 0x813   :  { %5637 = vmatprep.subr.bf16.mxu0 %v6301_v1 }
 0x816   :  { %v6152_v54 = vpop.eup %6151 }
 0x817   :  { %v803_v55 = vmul.f32 %v6152_v54, %v6148_v43 }
 0x819   :  { %5628 = vmatmul.mubr.msk.bf16.vlgmr.msra.gmra.mxu0 %vm143_vm2, %v956_v56  ;;  %v805_v57 = vpack.c.bf16 %v803_v55, %v803_v55 }
 0x81a   :  { %5639 = vmatprep.mubr.msk.bf16.mxu0 %vm6302_vm0, %v6301_v1 }
 0x81b   :  { %5610 = vmatmul.mubr.msk.bf16.vlgmr.msra.gmra.mxu1 %vm239_vm3, %v805_v57 }
 0x81c   :  { %5621 = vmatprep.mubr.msk.bf16.mxu1 %vm6302_vm0, %v6301_v1  ;;  %5620 = vmatpush3.bf16.msra.mxu1 %v910_v59 }
 0x81d   :  { %5631 = vmatprep.subr.bf16.mxu1 %v6301_v1 }
 0x8d1   :  { %v897_v60 = vpop.f32.mrf.mxu0 }
 0x8d3   :  { %v5617_v61 = vpop.f32.mrf.mxu0 }
 0x8d5   :  { %v900_v62 = vpop.f32.mrf.mxu0 }
 0x8d7   :  { %v5618_v63 = vpop.f32.mrf.mxu0 }
 0x8d9   :  { %v999_v0 = vpop.f32.mrf.mxu0 }
 0x8da   :  { %v1000_v3 = vadd.f32 %v6455_v23, %v999_v0 }
 0x8db   :  { %v849_v4 = vpop.f32.mrf.mxu1  ;;  %v5629_v5 = vpop.f32.mrf.mxu0 }
 0x8dc   :  { %v903_v7 = vpack.c.bf16 %v897_v60, %v849_v4  ;;  %v1055_v8 = vsel %vm239_vm3, %v1000_v3, -inf }
 0x8dd   :  { %1056 = vmax.xlane.f32.xlu0 %v1055_v8  ;;  %v5611_v11 = vpop.f32.mrf.mxu1  ;;  %v1002_v12 = vpop.f32.mrf.mxu0 }
 0x8de   :  { %5622 = vmatmul.mubr.msk.bf16.vlgmr.msra.gmra.mxu1 %vm143_vm2, %v903_v7 }
 0x8df   :  { %5632 = vmatpush3.bf16.xpose.msra.mxu1 %v1013_v13  ;;  %v852_v15 = vpop.f32.mrf.mxu1  ;;  %v5630_v16 = vpop.f32.mrf.mxu0  ;;  %5633 = vmatprep.mubr.msk.bf16.mxu1 %vm6302_vm0, %v6301_v1 }
 0x8e0   :  { %5643 = vmatprep.subr.bf16.mxu1 %v6301_v1 }
 0x8e1   :  { %v5612_v17 = vpop.f32.mrf.mxu1 }
 0x8e6   :  { %5634 = vmatmul.mubr.msk.bf16.vlgmr.msra.gmra.mxu1 %vm143_vm2, %v1006_v18 }
 0x8e7   :  { %5645 = vmatprep.mubr.msk.bf16.mxu1 %vm6302_vm0, %v6301_v1 }
 0x966   :  { %v1057_v20 = vpop.xlane.xlu0 %1056 }
 0x967   :  { %v1061_v21 = vsub.f32 %v1000_v3, %v1057_v20 }
 0x969   :  { %v1063_v24 = vmul.f32 1.442695, %v1061_v21 }
 0x96b   :  { %6153 = vpow2.f32 %v1063_v24 }
 0x978   :  { %v6154_v25 = vpop.eup %6153 }
 0x979   :  { %v1067_v26 = vsel %vm239_vm3, %v6154_v25, 0.0 }
 0x97a   :  { %1068 = vadd.xlane.f32.xlu0 %v1067_v26 }
 0x99e   :  { %v946_v31 = vpop.f32.mrf.mxu1 }
 0x99f   :  { %v6622_v32 = vadd.f32 %v946_v31, %v677_v28 }
 0x9a0   :  { %v5623_v33 = vpop.f32.mrf.mxu1 }
 0x9a2   :  { %v949_v35 = vpop.f32.mrf.mxu1 }
 0x9a3   :  { %v6626_v36 = vadd.f32 %v949_v35, %v680_v34 }
 0x9a4   :  { %v5624_v37 = vpop.f32.mrf.mxu1 }
 0x9a6   :  { %v1049_v38 = vpop.f32.mrf.mxu1 }
 0x9a7   :  { %v1050_v39 = vadd.f32 %v6462_v30, %v1049_v38 }
 0x9a8   :  { %v5635_v40 = vpop.f32.mrf.mxu1 }
 0x9a9   :  { %v1058_v41 = vsel %vm239_vm3, %v1050_v39, -inf }
 0x9aa   :  { %1059 = vmax.xlane.f32.xlu1 %v1058_v41  ;;  %v1052_v42 = vpop.f32.mrf.mxu1 }
 0x9ac   :  { %v5636_v6 = vpop.f32.mrf.mxu1 }
 0x9bb   :  { %1079 = vrot.lane.b32.xlu1 %v6428_v10, %s7508_s18 }
 0x9bf   :  { %1229 = vrot.lane.b32.xlu1 %v6428_v10, %s7506_s19 }
 0x9c3   :  { %1279 = vrot.lane.b32.xlu1 %v6432_v14, %s7506_s19  ;;  %s7517_s19 = smov 76  }
 0x9c7   :  { %1277 = vrot.lane.b32.xlu1 %v6446_v22, %s7486_s20 }
 0xa03   :  { %v1069_v9 = vpop.xlane.xlu0 %1068 }
 0xa04   :  { %6155 = vrcp.f32 %v1069_v9 }
 0xa11   :  { %v6156_v27 = vpop.eup %6155 }
 0xa12   :  { %v1075_v45 = vmul.f32 %v6156_v27, %v6154_v25 }
 0xa14   :  { %v1077_v48 = vpack.c.bf16 %v1075_v45, %v1075_v45 }
 0xa33   :  { %v1060_v29 = vpop.xlane.xlu1 %1059 }
 0xa34   :  { %v1062_v43 = vsub.f32 %v1050_v39, %v1060_v29 }
 0xa36   :  { %v1065_v44 = vmul.f32 1.442695, %v1062_v43 }
 0xa37   :  { %v1080_v46 = vpop.permute.xlu1 %1079 }
 0xa38   :  { %6157 = vpow2.f32 %v1065_v44  ;;  %v1085_v47 = vsel %vm269_vm4, %v1080_v46, 0 }
 0xa39   :  { %5638 = vmatpush3.bf16.msra.mxu0 %v1085_v47 }
 0xa3a   :  { %5649 = vmatprep.subr.bf16.mxu0 %v6301_v1 }
 0xa3b   :  { %v1230_v58 = vpop.permute.xlu1 %1229 }
 0xa3c   :  { %5640 = vmatmul.mubr.msk.bf16.vlgmr.msra.gmra.mxu0 %vm239_vm3, %v1077_v48  ;;  %v1235_v60 = vsel %vm143_vm2, %v1230_v58, 0 }
 0xa3d   :  { %5651 = vmatprep.mubr.msk.bf16.mxu0 %vm6302_vm0, %v6301_v1  ;;  %5650 = vmatpush3.bf16.msra.mxu0 %v1182_v52  ;;  %v1454_v52 = vsel %vm591_vm5, %v5197_v51, 0 }
 0xa3e   :  { %5661 = vmatprep.subr.bf16.mxu0 %v6301_v1 }
 0xa3f   :  { %v1280_v3 = vpop.permute.xlu1 %1279 }
 0xa40   :  { %v1285_v8 = vsel %vm143_vm2, %v1280_v3, 0 }
 0xa43   :  { %v1278_v16 = vpop.permute.xlu1 %1277 }
 0xa45   :  { %v6158_v49 = vpop.eup %6157 }
 0xa46   :  { %v1070_v50 = vsel %vm239_vm3, %v6158_v49, 0.0 }
 0xa47   :  { %1071 = vadd.xlane.f32.xlu0 %v1070_v50 }
 0xa5d   :  { %1127 = vrot.lane.b32.xlu0 %v6432_v14, %s7508_s18  ;;  %s7515_s18 = smov 112  }
 0xa61   :  { %1227 = vrot.lane.b32.xlu0 %v6438_v19, %s7486_s20  ;;  %s7496_s20 = smov 44  }
 0xad0   :  { %v1072_v53 = vpop.xlane.xlu0 %1071 }
 0xad1   :  { %6159 = vrcp.f32 %v1072_v53 }
 0xad4   :  { %v1128_v54 = vpop.permute.xlu0 %1127 }
 0xad5   :  { %v1133_v55 = vsel %vm269_vm4, %v1128_v54, 0 }
 0xad6   :  { %5644 = vmatpush3.bf16.msra.mxu1 %v1133_v55 }
 0xad7   :  { %5655 = vmatprep.subr.bf16.mxu1 %v6301_v1 }
 0xad8   :  { %v1228_v61 = vpop.permute.xlu0 %1227 }
 0xade   :  { %v6160_v56 = vpop.eup %6159 }
 0xadf   :  { %v1076_v57 = vmul.f32 %v6160_v56, %v6158_v49 }
 0xae1   :  { %v1078_v59 = vpack.c.bf16 %v1076_v57, %v1076_v57 }
 0xae3   :  { %5646 = vmatmul.mubr.msk.bf16.vlgmr.msra.gmra.mxu1 %vm239_vm3, %v1078_v59 }
 0xae4   :  { %5656 = vmatpush3.bf16.xpose.msra.mxu1 %v1235_v60  ;;  %5657 = vmatprep.mubr.msk.bf16.mxu1 %vm6302_vm0, %v6301_v1 }
 0xae5   :  { %5667 = vmatprep.subr.bf16.mxu1 %v6301_v1 }
 0xaeb   :  { %5658 = vmatmul.mubr.msk.bf16.vlgmr.msra.gmra.mxu1 %vm143_vm2, %v1228_v61 }
 0xaec   :  { %5669 = vmatprep.mubr.msk.bf16.mxu1 %vm6302_vm0, %v6301_v1 }
 0xafc   :  { %v1121_v62 = vpop.f32.mrf.mxu0 }
 0xafe   :  { %v5641_v63 = vpop.f32.mrf.mxu0 }
 0xb00   :  { %v1124_v0 = vpop.f32.mrf.mxu0 }
 0xb02   :  { %v5642_v2 = vpop.f32.mrf.mxu0 }
 0xba3   :  { %v1169_v4 = vpop.f32.mrf.mxu1 }
 0xba4   :  { %v1175_v5 = vpack.c.bf16 %v1169_v4, %v1121_v62 }
 0xba5   :  { %v5647_v7 = vpop.f32.mrf.mxu1 }
 0xba6   :  { %5652 = vmatmul.mubr.msk.bf16.vlgmr.msra.gmra.mxu0 %vm143_vm2, %v1175_v5 }
 0xba7   :  { %5662 = vmatpush3.bf16.xpose.msra.mxu0 %v1285_v8  ;;  %v1172_v11 = vpop.f32.mrf.mxu1  ;;  %5663 = vmatprep.mubr.msk.bf16.mxu0 %vm6302_vm0, %v6301_v1 }
 0xba8   :  { %5673 = vmatprep.subr.bf16.mxu0 %v6301_v1 }
 0xba9   :  { %v5648_v12 = vpop.f32.mrf.mxu1 }
 0xbab   :  { %v1271_v13 = vpop.f32.mrf.mxu1 }
 0xbac   :  { %v1272_v15 = vadd.f32 %v6455_v23, %v1271_v13 }
 0xbad   :  { %v5659_v17 = vpop.f32.mrf.mxu1 }
 0xbae   :  { %5664 = vmatmul.mubr.msk.bf16.vlgmr.msra.gmra.mxu0 %vm143_vm2, %v1278_v16  ;;  %v1327_v18 = vsel %vm239_vm3, %v1272_v15, -inf }
 0xbaf   :  { %1328 = vmax.xlane.f32.xlu0 %v1327_v18  ;;  %v1274_v20 = vpop.f32.mrf.mxu1  ;;  %5675 = vmatprep.mubr.msk.bf16.mxu0 %vm6302_vm0, %v6301_v1 }
 0xbb1   :  { %v5660_v21 = vpop.f32.mrf.mxu1 }
 0xc38   :  { %v1329_v24 = vpop.xlane.xlu0 %1328 }
 0xc39   :  { %v1333_v25 = vsub.f32 %v1272_v15, %v1329_v24 }
 0xc3b   :  { %v1335_v26 = vmul.f32 1.442695, %v1333_v25 }
 0xc3d   :  { %6161 = vpow2.f32 %v1335_v26 }
 0xc4a   :  { %v6162_v28 = vpop.eup %6161 }
 0xc4b   :  { %v1339_v31 = vsel %vm239_vm3, %v6162_v28, 0.0 }
 0xc4c   :  { %1340 = vadd.xlane.f32.xlu0 %v1339_v31 }
 0xc66   :  { %v1218_v33 = vpop.f32.mrf.mxu0 }
 0xc67   :  { %v6675_v34 = vadd.f32 %v1218_v33, %v6622_v32 }
 0xc68   :  { %v5653_v35 = vpop.f32.mrf.mxu0 }
 0xc6a   :  { %v1221_v37 = vpop.f32.mrf.mxu0 }
 0xc6b   :  { %v6678_v38 = vadd.f32 %v1221_v37, %v6626_v36 }
 0xc6c   :  { %v5654_v39 = vpop.f32.mrf.mxu0 }
 0xc6e   :  { %v1321_v40 = vpop.f32.mrf.mxu0 }
 0xc6f   :  { %v1322_v41 = vadd.f32 %v6462_v30, %v1321_v40 }
 0xc70   :  { %v5665_v42 = vpop.f32.mrf.mxu0 }
 0xc71   :  { %v1330_v6 = vsel %vm239_vm3, %v1322_v41, -inf }
 0xc72   :  { %1331 = vmax.xlane.f32.xlu1 %v1330_v6  ;;  %v1324_v9 = vpop.f32.mrf.mxu0 }
 0xc74   :  { %v5666_v27 = vpop.f32.mrf.mxu0 }
 0xc83   :  { %1351 = vrot.lane.b32.xlu1 %v6428_v10, %s7492_s27 }
 0xc87   :  { %1501 = vrot.lane.b32.xlu1 %v6428_v10, %s7484_s21 }
 0xc8b   :  { %1551 = vrot.lane.b32.xlu1 %v6432_v14, %s7484_s21  ;;  %s7490_s21 = smov 72  }
 0xc8f   :  { %1549 = vrot.lane.b32.xlu1 %v6446_v22, %s7488_s26 }
 0xcd5   :  { %v1341_v32 = vpop.xlane.xlu0 %1340 }
 0xcd6   :  { %6163 = vrcp.f32 %v1341_v32 }
 0xce3   :  { %v6164_v36 = vpop.eup %6163 }
 0xce4   :  { %v1347_v45 = vmul.f32 %v6164_v36, %v6162_v28 }
 0xce6   :  { %v1349_v48 = vpack.c.bf16 %v1347_v45, %v1347_v45 }
 0xcfb   :  { %v1332_v29 = vpop.xlane.xlu1 %1331 }
 0xcfc   :  { %v1334_v43 = vsub.f32 %v1322_v41, %v1332_v29 }
 0xcfe   :  { %v1337_v44 = vmul.f32 1.442695, %v1334_v43 }
 0xcff   :  { %v1352_v46 = vpop.permute.xlu1 %1351 }
 0xd00   :  { %6165 = vpow2.f32 %v1337_v44  ;;  %v1357_v47 = vsel %vm269_vm4, %v1352_v46, 0 }
 0xd01   :  { %5668 = vmatpush3.bf16.msra.mxu1 %v1357_v47 }
 0xd02   :  { %5679 = vmatprep.subr.bf16.mxu1 %v6301_v1 }
 0xd03   :  { %v1502_v58 = vpop.permute.xlu1 %1501 }
 0xd04   :  { %5670 = vmatmul.mubr.msk.bf16.vlgmr.msra.gmra.mxu1 %vm239_vm3, %v1349_v48  ;;  %v1507_v60 = vsel %vm143_vm2, %v1502_v58, 0 }
 0xd05   :  { %5681 = vmatprep.mubr.msk.bf16.mxu1 %vm6302_vm0, %v6301_v1  ;;  %5680 = vmatpush3.bf16.msra.mxu1 %v1454_v52 }
 0xd06   :  { %5691 = vmatprep.subr.bf16.mxu1 %v6301_v1 }
 0xd07   :  { %v1552_v3 = vpop.permute.xlu1 %1551 }
 0xd08   :  { %v1557_v8 = vsel %vm143_vm2, %v1552_v3, 0 }
 0xd0b   :  { %v1550_v16 = vpop.permute.xlu1 %1549 }
 0xd0d   :  { %v6166_v49 = vpop.eup %6165 }
 0xd0e   :  { %v1342_v50 = vsel %vm239_vm3, %v6166_v49, 0.0 }
 0xd0f   :  { %1343 = vadd.xlane.f32.xlu0 %v1342_v50 }
 0xd25   :  { %1399 = vrot.lane.b32.xlu0 %v6432_v14, %s7492_s27  ;;  %s7500_s27 = smov 100  }
 0xd29   :  { %1499 = vrot.lane.b32.xlu0 %v6438_v19, %s7488_s26  ;;  %s7494_s26 = smov 104  }
 0xd98   :  { %v1344_v53 = vpop.xlane.xlu0 %1343 }
 0xd99   :  { %6167 = vrcp.f32 %v1344_v53 }
 0xd9c   :  { %v1400_v54 = vpop.permute.xlu0 %1399 }
 0xd9d   :  { %v1405_v55 = vsel %vm269_vm4, %v1400_v54, 0 }
 0xd9e   :  { %5674 = vmatpush3.bf16.msra.mxu0 %v1405_v55 }
 0xd9f   :  { %5685 = vmatprep.subr.bf16.mxu0 %v6301_v1 }
 0xda0   :  { %v1500_v61 = vpop.permute.xlu0 %1499 }
 0xda6   :  { %v6168_v56 = vpop.eup %6167 }
 0xda7   :  { %v1348_v57 = vmul.f32 %v6168_v56, %v6166_v49  ;;  %v5203_v49 = vld [vmem:[%s7473_s4 + $0xa] sm:$0x3] }
 0xda8   :  { %v1726_v50 = vsel %vm591_vm5, %v5203_v49, 0 }
 0xda9   :  { %v1350_v59 = vpack.c.bf16 %v1348_v57, %v1348_v57 }
 0xdab   :  { %5676 = vmatmul.mubr.msk.bf16.vlgmr.msra.gmra.mxu0 %vm239_vm3, %v1350_v59 }
 0xdac   :  { %5686 = vmatpush3.bf16.xpose.msra.mxu0 %v1507_v60  ;;  %5687 = vmatprep.mubr.msk.bf16.mxu0 %vm6302_vm0, %v6301_v1 }
 0xdad   :  { %5697 = vmatprep.subr.bf16.mxu0 %v6301_v1 }
 0xdb3   :  { %5688 = vmatmul.mubr.msk.bf16.vlgmr.msra.gmra.mxu0 %vm143_vm2, %v1500_v61 }
 0xdb4   :  { %5699 = vmatprep.mubr.msk.bf16.mxu0 %vm6302_vm0, %v6301_v1 }
 0xdc4   :  { %v1393_v62 = vpop.f32.mrf.mxu1 }
 0xdc6   :  { %v5671_v63 = vpop.f32.mrf.mxu1 }
 0xdc8   :  { %v1396_v0 = vpop.f32.mrf.mxu1 }
 0xdca   :  { %v5672_v2 = vpop.f32.mrf.mxu1 }
 0xe6b   :  { %v1441_v4 = vpop.f32.mrf.mxu0 }
 0xe6c   :  { %v1447_v5 = vpack.c.bf16 %v1441_v4, %v1393_v62 }
 0xe6d   :  { %v5677_v7 = vpop.f32.mrf.mxu0 }
 0xe6e   :  { %5682 = vmatmul.mubr.msk.bf16.vlgmr.msra.gmra.mxu1 %vm143_vm2, %v1447_v5 }
 0xe6f   :  { %5692 = vmatpush3.bf16.xpose.msra.mxu1 %v1557_v8  ;;  %v1444_v11 = vpop.f32.mrf.mxu0  ;;  %5693 = vmatprep.mubr.msk.bf16.mxu1 %vm6302_vm0, %v6301_v1 }
 0xe70   :  { %5703 = vmatprep.subr.bf16.mxu1 %v6301_v1 }
 0xe71   :  { %v5678_v12 = vpop.f32.mrf.mxu0 }
 0xe72   :  { %v6775_v12 = vld [vmem:[%s7470_s1] ss:$0 sm:$0xff] }
 0xe73   :  { %v1543_v13 = vpop.f32.mrf.mxu0 }
 0xe74   :  { %v1544_v15 = vadd.f32 %v6455_v23, %v1543_v13 }
 0xe75   :  { %v5689_v17 = vpop.f32.mrf.mxu0 }
 0xe76   :  { %5694 = vmatmul.mubr.msk.bf16.vlgmr.msra.gmra.mxu1 %vm143_vm2, %v1550_v16  ;;  %v1599_v18 = vsel %vm239_vm3, %v1544_v15, -inf }
 0xe77   :  { %1600 = vmax.xlane.f32.xlu0 %v1599_v18  ;;  %v1546_v20 = vpop.f32.mrf.mxu0  ;;  %5705 = vmatprep.mubr.msk.bf16.mxu1 %vm6302_vm0, %v6301_v1 }
 0xe79   :  { %v5690_v21 = vpop.f32.mrf.mxu0 }
 0xf00   :  { %v1601_v24 = vpop.xlane.xlu0 %1600 }
 0xf01   :  { %v1605_v25 = vsub.f32 %v1544_v15, %v1601_v24 }
 0xf03   :  { %v1607_v26 = vmul.f32 1.442695, %v1605_v25 }
 0xf05   :  { %6169 = vpow2.f32 %v1607_v26 }
 0xf12   :  { %v6170_v28 = vpop.eup %6169 }
 0xf13   :  { %v1611_v31 = vsel %vm239_vm3, %v6170_v28, 0.0 }
 0xf14   :  { %1612 = vadd.xlane.f32.xlu0 %v1611_v31 }
 0xf2e   :  { %v1490_v23 = vpop.f32.mrf.mxu1 }
 0xf2f   :  { %v6727_v33 = vadd.f32 %v1490_v23, %v6675_v34 }
 0xf30   :  { %v5683_v35 = vpop.f32.mrf.mxu1 }
 0xf32   :  { %v1493_v37 = vpop.f32.mrf.mxu1 }
 0xf33   :  { %v6730_v39 = vadd.f32 %v1493_v37, %v6678_v38 }
 0xf34   :  { %v5684_v40 = vpop.f32.mrf.mxu1 }
 0xf36   :  { %v1593_v41 = vpop.f32.mrf.mxu1 }
 0xf37   :  { %v1594_v42 = vadd.f32 %v6462_v30, %v1593_v41 }
 0xf38   :  { %v5695_v6 = vpop.f32.mrf.mxu1 }
 0xf39   :  { %v1602_v9 = vsel %vm239_vm3, %v1594_v42, -inf  ;;  %v6792_v6 = vld [vmem:[%s7470_s1 + $0x1] ss:$0 sm:$0xff] }
 0xf3a   :  { %1603 = vmax.xlane.f32.xlu1 %v1602_v9  ;;  %v1596_v27 = vpop.f32.mrf.mxu1 }
 0xf3c   :  { %v5696_v32 = vpop.f32.mrf.mxu1 }
 0xf4b   :  { %1623 = vrot.lane.b32.xlu1 %v6428_v10, %s7496_s20 }
 0xf4f   :  { %1773 = vrot.lane.b32.xlu1 %v6428_v10, %s7490_s21 }
 0xf53   :  { %1823 = vrot.lane.b32.xlu1 %v6432_v14, %s7490_s21  ;;  %s7514_s21 = smov 80  }
 0xf57   :  { %1821 = vrot.lane.b32.xlu1 %v6446_v22, %s7494_s26 }
 0xf9d   :  { %v1613_v30 = vpop.xlane.xlu0 %1612 }
 0xf9e   :  { %6171 = vrcp.f32 %v1613_v30 }
 0xfab   :  { %v6172_v34 = vpop.eup %6171 }
 0xfac   :  { %v1619_v43 = vmul.f32 %v6172_v34, %v6170_v28 }
 0xfae   :  { %v1621_v46 = vpack.c.bf16 %v1619_v43, %v1619_v43 }
 0xfc3   :  { %v1604_v38 = vpop.xlane.xlu1 %1603 }
 0xfc4   :  { %v1606_v36 = vsub.f32 %v1594_v42, %v1604_v38 }
 0xfc6   :  { %v1609_v29 = vmul.f32 1.442695, %v1606_v36 }
 0xfc7   :  { %v1624_v44 = vpop.permute.xlu1 %1623 }
 0xfc8   :  { %6173 = vpow2.f32 %v1609_v29  ;;  %v1629_v45 = vsel %vm269_vm4, %v1624_v44, 0 }
 0xfc9   :  { %5698 = vmatpush3.bf16.msra.mxu0 %v1629_v45 }
 0xfca   :  { %5709 = vmatprep.subr.bf16.mxu0 %v6301_v1 }
 0xfcb   :  { %v1774_v56 = vpop.permute.xlu1 %1773 }
 0xfcc   :  { %5700 = vmatmul.mubr.msk.bf16.vlgmr.msra.gmra.mxu0 %vm239_vm3, %v1621_v46  ;;  %v1779_v58 = vsel %vm143_vm2, %v1774_v56, 0 }
 0xfcd   :  { %5711 = vmatprep.mubr.msk.bf16.mxu0 %vm6302_vm0, %v6301_v1  ;;  %5710 = vmatpush3.bf16.msra.mxu0 %v1726_v50 }
 0xfce   :  { %5721 = vmatprep.subr.bf16.mxu0 %v6301_v1 }
 0xfcf   :  { %v1824_v0 = vpop.permute.xlu1 %1823 }
 0xfd0   :  { %v1829_v5 = vsel %vm143_vm2, %v1824_v0, 0 }
 0xfd3   :  { %v1822_v15 = vpop.permute.xlu1 %1821 }
 0xfd5   :  { %v6174_v47 = vpop.eup %6173 }
 0xfd6   :  { %v1614_v48 = vsel %vm239_vm3, %v6174_v47, 0.0 }
 0xfd7   :  { %1615 = vadd.xlane.f32.xlu0 %v1614_v48  ;;  %v5209_v48 = vld [vmem:[%s7473_s4 + $0xc] sm:$0x3] }
 0xfd8   :  { %v1998_v49 = vsel %vm591_vm5, %v5209_v48, 0 }
 0xfed   :  { %1671 = vrot.lane.b32.xlu0 %v6432_v14, %s7496_s20  ;;  %s7498_s20 = smov 68  }
 0xff1   :  { %1771 = vrot.lane.b32.xlu0 %v6438_v19, %s7494_s26  ;;  %s7504_s26 = smov 40  }
0x1060   :  { %v1616_v51 = vpop.xlane.xlu0 %1615 }
0x1061   :  { %6175 = vrcp.f32 %v1616_v51 }
0x1064   :  { %v1672_v52 = vpop.permute.xlu0 %1671 }
0x1065   :  { %v1677_v53 = vsel %vm269_vm4, %v1672_v52, 0 }
0x1066   :  { %5704 = vmatpush3.bf16.msra.mxu1 %v1677_v53 }
0x1067   :  { %5715 = vmatprep.subr.bf16.mxu1 %v6301_v1 }
0x1068   :  { %v1772_v59 = vpop.permute.xlu0 %1771 }
0x106e   :  { %v6176_v54 = vpop.eup %6175 }
0x106f   :  { %v1620_v55 = vmul.f32 %v6176_v54, %v6174_v47 }
0x1071   :  { %v1622_v57 = vpack.c.bf16 %v1620_v55, %v1620_v55 }
0x1073   :  { %5706 = vmatmul.mubr.msk.bf16.vlgmr.msra.gmra.mxu1 %vm239_vm3, %v1622_v57 }
0x1074   :  { %5716 = vmatpush3.bf16.xpose.msra.mxu1 %v1779_v58  ;;  %5717 = vmatprep.mubr.msk.bf16.mxu1 %vm6302_vm0, %v6301_v1 }
0x1075   :  { %5727 = vmatprep.subr.bf16.mxu1 %v6301_v1 }
0x107b   :  { %5718 = vmatmul.mubr.msk.bf16.vlgmr.msra.gmra.mxu1 %vm143_vm2, %v1772_v59 }
0x107c   :  { %5729 = vmatprep.mubr.msk.bf16.mxu1 %vm6302_vm0, %v6301_v1 }
0x108c   :  { %v1665_v60 = vpop.f32.mrf.mxu0 }
0x108e   :  { %v5701_v61 = vpop.f32.mrf.mxu0 }
0x1090   :  { %v1668_v62 = vpop.f32.mrf.mxu0 }
0x1092   :  { %v5702_v63 = vpop.f32.mrf.mxu0 }
0x1133   :  { %v1713_v2 = vpop.f32.mrf.mxu1 }
0x1134   :  { %v1719_v3 = vpack.c.bf16 %v1713_v2, %v1665_v60 }
0x1135   :  { %v5707_v4 = vpop.f32.mrf.mxu1 }
0x1136   :  { %5712 = vmatmul.mubr.msk.bf16.vlgmr.msra.gmra.mxu0 %vm143_vm2, %v1719_v3 }
0x1137   :  { %5722 = vmatpush3.bf16.xpose.msra.mxu0 %v1829_v5  ;;  %v1716_v7 = vpop.f32.mrf.mxu1  ;;  %5723 = vmatprep.mubr.msk.bf16.mxu0 %vm6302_vm0, %v6301_v1 }
0x1138   :  { %5733 = vmatprep.subr.bf16.mxu0 %v6301_v1 }
0x1139   :  { %v5708_v8 = vpop.f32.mrf.mxu1 }
0x113b   :  { %v1815_v11 = vpop.f32.mrf.mxu1 }
0x113c   :  { %v1816_v13 = vadd.f32 %v6775_v12, %v1815_v11 }
0x113d   :  { %v5719_v16 = vpop.f32.mrf.mxu1 }
0x113e   :  { %5724 = vmatmul.mubr.msk.bf16.vlgmr.msra.gmra.mxu0 %vm143_vm2, %v1822_v15  ;;  %v1871_v17 = vsel %vm239_vm3, %v1816_v13, -inf }
0x113f   :  { %1872 = vmax.xlane.f32.xlu0 %v1871_v17  ;;  %v1818_v18 = vpop.f32.mrf.mxu1  ;;  %5735 = vmatprep.mubr.msk.bf16.mxu0 %vm6302_vm0, %v6301_v1 }
0x1141   :  { %v5720_v20 = vpop.f32.mrf.mxu1 }
0x11c8   :  { %v1873_v21 = vpop.xlane.xlu0 %1872 }
0x11c9   :  { %v1877_v24 = vsub.f32 %v1816_v13, %v1873_v21 }
0x11cb   :  { %v1879_v25 = vmul.f32 1.442695, %v1877_v24 }
0x11cd   :  { %6177 = vpow2.f32 %v1879_v25 }
0x11da   :  { %v6178_v26 = vpop.eup %6177 }
0x11db   :  { %v1883_v28 = vsel %vm239_vm3, %v6178_v26, 0.0 }
0x11dc   :  { %1884 = vadd.xlane.f32.xlu0 %v1883_v28 }
0x11f6   :  { %v1762_v31 = vpop.f32.mrf.mxu0 }
0x11f7   :  { %v6784_v23 = vadd.f32 %v1762_v31, %v6727_v33 }
0x11f8   :  { %v5713_v35 = vpop.f32.mrf.mxu0 }
0x11fa   :  { %v1765_v37 = vpop.f32.mrf.mxu0 }
0x11fb   :  { %v6787_v40 = vadd.f32 %v1765_v37, %v6730_v39 }
0x11fc   :  { %v5714_v41 = vpop.f32.mrf.mxu0 }
0x11fe   :  { %v1865_v42 = vpop.f32.mrf.mxu0 }
0x11ff   :  { %v1866_v9 = vadd.f32 %v6792_v6, %v1865_v42 }
0x1200   :  { %v5725_v27 = vpop.f32.mrf.mxu0 }
0x1201   :  { %v1874_v32 = vsel %vm239_vm3, %v1866_v9, -inf }
0x1202   :  { %1875 = vmax.xlane.f32.xlu1 %v1874_v32  ;;  %v1868_v33 = vpop.f32.mrf.mxu0 }
0x1204   :  { %v5726_v30 = vpop.f32.mrf.mxu0 }
0x1213   :  { %1895 = vrot.lane.b32.xlu1 %v6428_v10, %s7504_s26 }
0x1217   :  { %2045 = vrot.lane.b32.xlu1 %v6428_v10, %s7498_s20 }
0x121b   :  { %2095 = vrot.lane.b32.xlu1 %v6432_v14, %s7498_s20  ;;  %s7502_s20 = smov 36  }
0x121f   :  { %2093 = vrot.lane.b32.xlu1 %v6446_v22, %s7500_s27 }
0x1265   :  { %v1885_v39 = vpop.xlane.xlu0 %1884 }
0x1266   :  { %6179 = vrcp.f32 %v1885_v39 }
0x1273   :  { %v6180_v34 = vpop.eup %6179 }
0x1274   :  { %v1891_v43 = vmul.f32 %v6180_v34, %v6178_v26 }
0x1276   :  { %v1893_v46 = vpack.c.bf16 %v1891_v43, %v1891_v43 }
0x128b   :  { %v1876_v38 = vpop.xlane.xlu1 %1875 }
0x128c   :  { %v1878_v36 = vsub.f32 %v1866_v9, %v1876_v38 }
0x128e   :  { %v1881_v29 = vmul.f32 1.442695, %v1878_v36 }
0x128f   :  { %v1896_v44 = vpop.permute.xlu1 %1895 }
0x1290   :  { %6181 = vpow2.f32 %v1881_v29  ;;  %v1901_v45 = vsel %vm269_vm4, %v1896_v44, 0 }
0x1291   :  { %5728 = vmatpush3.bf16.msra.mxu1 %v1901_v45 }
0x1292   :  { %5739 = vmatprep.subr.bf16.mxu1 %v6301_v1 }
0x1294   :  { %5730 = vmatmul.mubr.msk.bf16.vlgmr.msra.gmra.mxu1 %vm239_vm3, %v1893_v46  ;;  %v5215_v46 = vld [vmem:[%s7473_s4 + $0xe] sm:$0x3] }
0x1295   :  { %5741 = vmatprep.mubr.msk.bf16.mxu1 %vm6302_vm0, %v6301_v1  ;;  %5740 = vmatpush3.bf16.msra.mxu1 %v1998_v49 }
0x1296   :  { %5751 = vmatprep.subr.bf16.mxu1 %v6301_v1 }
0x129d   :  { %v6182_v22 = vpop.eup %6181 }
0x129e   :  { %v1886_v47 = vsel %vm239_vm3, %v6182_v22, 0.0 }
0x129f   :  { %1887 = vadd.xlane.f32.xlu0 %v1886_v47 }
0x12b5   :  { %1943 = vrot.lane.b32.xlu0 %v6432_v14, %s7504_s26  ;;  %s7518_s26 = smov 108  }
0x12b9   :  { %2043 = vrot.lane.b32.xlu0 %v6438_v19, %s7500_s27  ;;  %v2046_v19 = vpop.permute.xlu1 %2045  ;;  %s7513_s27 = smov 52  }
0x12ba   :  { %v2051_v56 = vsel %vm143_vm2, %v2046_v19, 0 }
0x12bd   :  { %v2096_v62 = vpop.permute.xlu1 %2095 }
0x12be   :  { %v2101_v3 = vsel %vm143_vm2, %v2096_v62, 0 }
0x12c1   :  { %v2094_v11 = vpop.permute.xlu1 %2093 }
0x1328   :  { %v1888_v50 = vpop.xlane.xlu0 %1887 }
0x1329   :  { %6183 = vrcp.f32 %v1888_v50 }
0x132c   :  { %v1944_v51 = vpop.permute.xlu0 %1943 }
0x132d   :  { %v1949_v52 = vsel %vm269_vm4, %v1944_v51, 0 }
0x132e   :  { %5734 = vmatpush3.bf16.msra.mxu0 %v1949_v52 }
0x132f   :  { %5745 = vmatprep.subr.bf16.mxu0 %v6301_v1 }
0x1330   :  { %v2044_v57 = vpop.permute.xlu0 %2043 }
0x1336   :  { %v6184_v53 = vpop.eup %6183 }
0x1337   :  { %v1892_v54 = vmul.f32 %v6184_v53, %v6182_v22  ;;  %v2270_v22 = vsel %vm591_vm5, %v5215_v46, 0  ;;  %v5219_v46 = vld [vmem:[%s7480_s11] ss:$0 sm:$0xff] }
0x1339   :  { %v1894_v55 = vpack.c.bf16 %v1892_v54, %v1892_v54 }
0x133b   :  { %5736 = vmatmul.mubr.msk.bf16.vlgmr.msra.gmra.mxu0 %vm239_vm3, %v1894_v55 }
0x133c   :  { %5746 = vmatpush3.bf16.xpose.msra.mxu0 %v2051_v56  ;;  %5747 = vmatprep.mubr.msk.bf16.mxu0 %vm6302_vm0, %v6301_v1 }
0x133d   :  { %5757 = vmatprep.subr.bf16.mxu0 %v6301_v1 }
0x1343   :  { %5748 = vmatmul.mubr.msk.bf16.vlgmr.msra.gmra.mxu0 %vm143_vm2, %v2044_v57 }
0x1344   :  { %5759 = vmatprep.mubr.msk.bf16.mxu0 %vm6302_vm0, %v6301_v1 }
0x1354   :  { %v1937_v58 = vpop.f32.mrf.mxu1 }
0x1356   :  { %v5731_v59 = vpop.f32.mrf.mxu1 }
0x1358   :  { %v1940_v60 = vpop.f32.mrf.mxu1 }
0x135a   :  { %v5732_v61 = vpop.f32.mrf.mxu1 }
0x135b   :  { %v5217_v61 = vld [vmem:[%s7474_s5] ss:$0 sm:$0xff] }
0x13fb   :  { %v1985_v63 = vpop.f32.mrf.mxu0 }
0x13fc   :  { %v1991_v0 = vpack.c.bf16 %v1985_v63, %v1937_v58 }
0x13fd   :  { %v5737_v2 = vpop.f32.mrf.mxu0 }
0x13fe   :  { %5742 = vmatmul.mubr.msk.bf16.vlgmr.msra.gmra.mxu1 %vm143_vm2, %v1991_v0 }
0x13ff   :  { %5752 = vmatpush3.bf16.xpose.msra.mxu1 %v2101_v3  ;;  %v1988_v4 = vpop.f32.mrf.mxu0  ;;  %5753 = vmatprep.mubr.msk.bf16.mxu1 %vm6302_vm0, %v6301_v1 }
0x1400   :  { %5763 = vmatprep.subr.bf16.mxu1 %v6301_v1  ;;  %v6275_v4 = vld [vmem:[%s7469_s0] sm:$0xff] }
0x1401   :  { %v5738_v5 = vpop.f32.mrf.mxu0 }
0x1403   :  { %v2087_v7 = vpop.f32.mrf.mxu0 }
0x1404   :  { %v2088_v8 = vadd.f32 %v6775_v12, %v2087_v7 }
0x1405   :  { %v5749_v13 = vpop.f32.mrf.mxu0 }
0x1406   :  { %5754 = vmatmul.mubr.msk.bf16.vlgmr.msra.gmra.mxu1 %vm143_vm2, %v2094_v11  ;;  %v2143_v15 = vsel %vm239_vm3, %v2088_v8, -inf  ;;  %v6276_v13 = vld [vmem:[%s7469_s0 + $0x8] sm:$0xff] }
0x1407   :  { %2144 = vmax.xlane.f32.xlu0 %v2143_v15  ;;  %v2090_v16 = vpop.f32.mrf.mxu0  ;;  %5765 = vmatprep.mubr.msk.bf16.mxu1 %vm6302_vm0, %v6301_v1 }
0x1409   :  { %v5750_v17 = vpop.f32.mrf.mxu0 }
0x1490   :  { %v2145_v18 = vpop.xlane.xlu0 %2144 }
0x1491   :  { %v2149_v20 = vsub.f32 %v2088_v8, %v2145_v18 }
0x1493   :  { %v2151_v21 = vmul.f32 1.442695, %v2149_v20 }
0x1495   :  { %6185 = vpow2.f32 %v2151_v21 }
0x14a2   :  { %v6186_v24 = vpop.eup %6185 }
0x14a3   :  { %v2155_v25 = vsel %vm239_vm3, %v6186_v24, 0.0 }
0x14a4   :  { %2156 = vadd.xlane.f32.xlu0 %v2155_v25 }
0x14be   :  { %v2034_v26 = vpop.f32.mrf.mxu1 }
0x14bf   :  { %v2041_v28 = vadd.f32 %v2034_v26, %v6784_v23 }
0x14c0   :  { %v5743_v31 = vpop.f32.mrf.mxu1 }
0x14c2   :  { %v2037_v35 = vpop.f32.mrf.mxu1 }
0x14c3   :  { %v2042_v37 = vadd.f32 %v2037_v35, %v6787_v40 }
0x14c4   :  { %v5744_v41 = vpop.f32.mrf.mxu1 }
0x14c5   :  { %v6108_v41 = vld [vmem:[%s7475_s6] sm:$0xff]  }
0x14c6   :  { %v2137_v42 = vpop.f32.mrf.mxu1 }
0x14c7   :  { %v2138_v9 = vadd.f32 %v6792_v6, %v2137_v42  ;;  %v6109_v42 = vld [vmem:[%s7477_s8 + $0x38] sm:$0xff]  }
0x14c8   :  { %v5755_v27 = vpop.f32.mrf.mxu1 }
0x14c9   :  { %v2146_v32 = vsel %vm239_vm3, %v2138_v9, -inf  ;;  %v6111_v27 = vld [vmem:[%s7477_s8 + $0x28] sm:$0xff]  }
0x14ca   :  { %2147 = vmax.xlane.f32.xlu1 %v2146_v32  ;;  %v2140_v33 = vpop.f32.mrf.mxu1  ;;  %v6112_v32 = vld [vmem:[%s7477_s8 + $0x20] sm:$0xff]  }
0x14cb   :  { %v6113_v33 = vld [vmem:[%s7477_s8 + $0x18] sm:$0xff]  }
0x14cc   :  { %v5756_v30 = vpop.f32.mrf.mxu1 }
0x14db   :  { %2167 = vrot.lane.b32.xlu1 %v6428_v10, %s7502_s20 }
0x152d   :  { %v2157_v39 = vpop.xlane.xlu0 %2156 }
0x152e   :  { %6187 = vrcp.f32 %v2157_v39 }
0x153b   :  { %v6188_v23 = vpop.eup %6187 }
0x153c   :  { %v2163_v36 = vmul.f32 %v6188_v23, %v6186_v24 }
0x153e   :  { %v2165_v44 = vpack.c.bf16 %v2163_v36, %v2163_v36 }
0x1553   :  { %v2148_v34 = vpop.xlane.xlu1 %2147 }
0x1554   :  { %v2150_v38 = vsub.f32 %v2138_v9, %v2148_v34  ;;  %v6110_v9 = vld [vmem:[%s7477_s8 + $0x30] sm:$0xff]  }
0x1556   :  { %v2153_v40 = vmul.f32 1.442695, %v2150_v38 }
0x1557   :  { %v2168_v29 = vpop.permute.xlu1 %2167 }
0x1558   :  { %6189 = vpow2.f32 %v2153_v40  ;;  %v2173_v43 = vsel %vm269_vm4, %v2168_v29, 0 }
0x1559   :  { %5758 = vmatpush3.bf16.msra.mxu0 %v2173_v43  ;;  %v5218_v43 = vld [vmem:[%s7479_s10] ss:$0 sm:$0xff] }
0x155a   :  { %5769 = vmatprep.subr.bf16.mxu0 %v6301_v1 }
0x155c   :  { %5760 = vmatmul.mubr.msk.bf16.vlgmr.msra.gmra.mxu0 %vm239_vm3, %v2165_v44 }
0x155d   :  { %5771 = vmatprep.mubr.msk.bf16.mxu0 %vm6302_vm0, %v6301_v1  ;;  %5770 = vmatpush3.bf16.msra.mxu0 %v2270_v22 }
0x155e   :  { %5783 = vmatprep.subr.bf16.mxu0 %v6301_v1 }
0x1565   :  { %v6190_v10 = vpop.eup %6189 }
0x1566   :  { %v2158_v45 = vsel %vm239_vm3, %v6190_v10, 0.0 }
0x1567   :  { %2159 = vadd.xlane.f32.xlu0 %v2158_v45 }
0x157d   :  { %2215 = vrot.lane.b32.xlu0 %v6432_v14, %s7502_s20 }
0x15f0   :  { %v2160_v47 = vpop.xlane.xlu0 %2159 }
0x15f1   :  { %6191 = vrcp.f32 %v2160_v47 }
0x15f4   :  { %v2216_v48 = vpop.permute.xlu0 %2215 }
0x15f5   :  { %v2221_v49 = vsel %vm269_vm4, %v2216_v48, 0 }
0x15f6   :  { %5764 = vmatpush3.bf16.msra.mxu1 %v2221_v49 }
0x15f7   :  { %5775 = vmatprep.subr.bf16.mxu1 %v6301_v1 }
0x15fe   :  { %v6192_v50 = vpop.eup %6191 }
0x15ff   :  { %v2164_v51 = vmul.f32 %v6192_v50, %v6190_v10  ;;  %v6114_v50 = vld [vmem:[%s7477_s8 + $0x10] sm:$0xff]  }
0x1601   :  { %v2166_v14 = vpack.c.bf16 %v2164_v51, %v2164_v51  ;;  %v6115_v51 = vld [vmem:[%s7477_s8 + $0x8] sm:$0xff]  }
0x1603   :  { %5766 = vmatmul.mubr.msk.bf16.vlgmr.msra.gmra.mxu1 %vm239_vm3, %v2166_v14  ;;  %v6116_v14 = vld [vmem:[%s7477_s8] sm:$0xff]  }
0x1604   :  { %5779 = vmatprep.mubr.msk.bf16.mxu1 %vm6302_vm0, %v6301_v1 }
0x161c   :  { %v2209_v52 = vpop.f32.mrf.mxu0 }
0x161e   :  { %v5761_v53 = vpop.f32.mrf.mxu0 }
0x1620   :  { %v2212_v54 = vpop.f32.mrf.mxu0 }
0x1622   :  { %v5762_v19 = vpop.f32.mrf.mxu0 }
0x16c3   :  { %v2257_v55 = vpop.f32.mrf.mxu1 }
0x16c4   :  { %v2263_v56 = vpack.c.bf16 %v2257_v55, %v2209_v52  ;;  %v5220_v52 = vld [vmem:[%s7476_s7] ss:$0 sm:$0xff] }
0x16c5   :  { %v5767_v57 = vpop.f32.mrf.mxu1 }
0x16c6   :  { %5772 = vmatmul.mubr.msk.bf16.vlgmr.msra.gmra.mxu0 %vm143_vm2, %v2263_v56 }
0x16c7   :  { %v2260_v58 = vpop.f32.mrf.mxu1  ;;  %5799 = vmatprep.mubr.msk.bf16.mxu0 %vm6302_vm0, %v6301_v1  ;;  %5784 = vmatpush3.bf16.msra.mxu0 %v6109_v42 }
0x16c8   :  { %5785 = vmatprep.subr.bf16.mxu0 %v6301_v1 }
0x16c9   :  { %v5768_v59 = vpop.f32.mrf.mxu1 }
0x16cb   :  { %5786 = vmatpush3.bf16.msra.mxu0 %v6110_v9 }
0x16cc   :  { %5787 = vmatprep.subr.bf16.mxu0 %v6301_v1 }
0x16cf   :  { %5788 = vmatpush3.bf16.msra.mxu0 %v6111_v27 }
0x16d0   :  { %5789 = vmatprep.subr.bf16.mxu0 %v6301_v1 }
0x16d3   :  { %5790 = vmatpush3.bf16.msra.mxu0 %v6112_v32 }
0x16d4   :  { %5791 = vmatprep.subr.bf16.mxu0 %v6301_v1 }
0x16d7   :  { %5792 = vmatpush3.bf16.msra.mxu0 %v6113_v33 }
0x16d8   :  { %5793 = vmatprep.subr.bf16.mxu0 %v6301_v1 }
0x16db   :  { %5794 = vmatpush3.bf16.msra.mxu0 %v6114_v50 }
0x16dc   :  { %5795 = vmatprep.subr.bf16.mxu0 %v6301_v1 }
0x16df   :  { %5796 = vmatpush3.bf16.msra.mxu0 %v6115_v51 }
0x16e0   :  { %5797 = vmatprep.subr.bf16.mxu0 %v6301_v1 }
0x16e3   :  { %5798 = vmatpush3.bf16.msra.mxu0 %v6116_v14 }
0x16e4   :  { %5829 = vmatprep.subr.bf16.mxu0 %v6301_v1 }
0x1786   :  { %v2306_v60 = vpop.f32.mrf.mxu0 }
0x1787   :  { %v2313_v62 = vadd.f32 %v2306_v60, %v2041_v28 }
0x1788   :  { %v5773_v63 = vpop.f32.mrf.mxu0 }
0x1789   :  { %v2322_v0 = vadd.f32 %v5217_v61, %v2313_v62 }
0x178a   :  { %v2309_v2 = vpop.f32.mrf.mxu0 }
0x178b   :  { %v2314_v3 = vadd.f32 %v2309_v2, %v2042_v37  ;;  %v2324_v5 = vadd.f32 %v6275_v4, %v2322_v0  ;;  %v6107_v37 = vld [vmem:[%s7475_s6 + $0x8] sm:$0xff]  }
0x178c   :  { %v5774_v7 = vpop.f32.mrf.mxu0  ;;  %5776 = vmatpush3.bf16.msra.mxu1 %v6107_v37 }
0x178d   :  { %v2323_v8 = vadd.f32 %v5217_v61, %v2314_v3  ;;  %v2328_v11 = vsel %vm77_vm1, %v2324_v5, 0.0  ;;  %5777 = vmatprep.subr.bf16.mxu1 %v6301_v1  ;;  %v5224_v61 = vld [vmem:[%s7478_s9] ss:$0 sm:$0xff] }
0x178e   :  { %2329 = vadd.xlane.f32.xlu1 %v2328_v11 }
0x178f   :  { %v2325_v15 = vadd.f32 %v6276_v13, %v2323_v8 }
0x1790   :  { %5778 = vmatpush3.bf16.msra.mxu1 %v6108_v41 }
0x1791   :  { %v2331_v16 = vsel %vm77_vm1, %v2325_v15, 0.0  ;;  %5803 = vmatprep.subr.bf16.mxu1 %v6301_v1 }
0x1792   :  { %2332 = vadd.xlane.f32.xlu0 %v2331_v16 }
0x1817   :  { %v2330_v17 = vpop.xlane.xlu1 %2329 }
0x1818   :  { %v2335_v18 = vmul.f32 0.03125, %v2330_v17 }
0x181a   :  { %v2337_v20 = vsub.f32 %v2324_v5, %v2335_v18 }
0x181b   :  { %v2333_v21 = vpop.xlane.xlu0 %2332 }
0x181c   :  { %v2336_v24 = vmul.f32 0.03125, %v2333_v21  ;;  %v2339_v25 = vmul.f32 %v2337_v20, %v2337_v20 }
0x181e   :  { %v2338_v26 = vsub.f32 %v2325_v15, %v2336_v24  ;;  %v2341_v28 = vsel %vm77_vm1, %v2339_v25, 0.0 }
0x181f   :  { %2342 = vadd.xlane.f32.xlu1 %v2341_v28  ;;  %v6117_v28 = vld [vmem:[%s7471_s2 + $0x18] sm:$0xff]  }
0x1820   :  { %v2340_v31 = vmul.f32 %v2338_v26, %v2338_v26 }
0x1822   :  { %v2344_v35 = vsel %vm77_vm1, %v2340_v31, 0.0  ;;  %v6118_v31 = vld [vmem:[%s7471_s2 + $0x10] sm:$0xff]   ;;  %s7516_s2 = smov 48  }
0x1823   :  { %2345 = vadd.xlane.f32.xlu0 %v2344_v35 }
0x18a8   :  { %v2343_v30 = vpop.xlane.xlu1 %2342 }
0x18a9   :  { %v2347_v39 = vmul.f32 0.03125, %v2343_v30  ;;  %v5233_v30 = vld [vmem:[%s7481_s12] ss:$0 sm:$0xff] }
0x18ab   :  { %v2349_v23 = vadd.f32 1e-05, %v2347_v39 }
0x18ac   :  { %v2346_v34 = vpop.xlane.xlu0 %2345 }
0x18ad   :  { %6193 = vrsqrt.f32 %v2349_v23  ;;  %v2348_v38 = vmul.f32 0.03125, %v2346_v34 }
0x18af   :  { %v2350_v40 = vadd.f32 1e-05, %v2348_v38  ;;  %v5234_v38 = vld [vmem:[%s7482_s13] ss:$0 sm:$0xff] }
0x18b1   :  { %6195 = vrsqrt.f32 %v2350_v40 }
0x18ba   :  { %v6194_v36 = vpop.eup %6193 }
0x18bb   :  { %v2353_v29 = vmul.f32 %v6194_v36, %v2337_v20 }
0x18bd   :  { %v2361_v45 = vmul.f32 %v5218_v43, %v2353_v29 }
0x18be   :  { %v6196_v44 = vpop.eup %6195 }
0x18bf   :  { %v2354_v10 = vmul.f32 %v6196_v44, %v2338_v26  ;;  %v2369_v47 = vadd.f32 %v5219_v46, %v2361_v45  ;;  %v5240_v44 = vld [vmem:[%s7472_s3 + $0x1] ss:$0 sm:$0xff] }
0x18c1   :  { %v2362_v22 = vmul.f32 %v5218_v43, %v2354_v10 }
0x18c3   :  { %v2370_v48 = vadd.f32 %v5219_v46, %v2362_v22 }
0x18c5   :  { %v2371_v49 = vpack.c.bf16 %v2370_v48, %v2369_v47 }
0x18c7   :  { %5780 = vmatmul.mubr.msk.bf16.vlgmr.msra.gmra.mxu1 %vm77_vm1, %v2371_v49 }
0x18c8   :  { %5807 = vmatprep.mubr.msk.bf16.mxu1 %vm6302_vm0, %v6301_v1  ;;  %5804 = vmatpush3.bf16.msra.mxu1 %v6117_v28 }
0x18c9   :  { %5805 = vmatprep.subr.bf16.mxu1 %v6301_v1 }
0x18cc   :  { %5806 = vmatpush3.bf16.msra.mxu1 %v6118_v31 }
0x18cd   :  { %5811 = vmatprep.subr.bf16.mxu1 %v6301_v1 }
0x1987   :  { %v2432_v53 = vpop.f32.mrf.mxu1 }
0x1988   :  { %v2433_v19 = vadd.f32 %v5220_v52, %v2432_v53 }
0x1989   :  { %v5781_v54 = vpop.f32.mrf.mxu1 }
0x198a   :  { %v2439_v58 = vmax.f32 %v2433_v19, 0.0 }
0x198b   :  { %v2435_v55 = vpop.f32.mrf.mxu1 }
0x198c   :  { %v2436_v56 = vadd.f32 %v5220_v52, %v2435_v55 }
0x198d   :  { %v5782_v57 = vpop.f32.mrf.mxu1 }
0x198e   :  { %v2440_v59 = vmax.f32 %v2436_v56, 0.0 }
0x1990   :  { %v2441_v60 = vpack.c.bf16 %v2440_v59, %v2439_v58 }
0x1992   :  { %5800 = vmatmul.mubr.bf16.vlgmr.msra.gmra.mxu0 %v2441_v60 }
0x1993   :  { %5831 = vmatprep.mubr.msk.bf16.mxu0 %vm6302_vm0, %v6301_v1 }
0x1a52   :  { %v2547_v62 = vpop.f32.mrf.mxu0 }
0x1a53   :  { %v2548_v63 = vadd.f32 %v5224_v61, %v2547_v62 }
0x1a54   :  { %v5801_v0 = vpop.f32.mrf.mxu0 }
0x1a55   :  { %v2554_v2 = vadd.f32 %v2548_v63, %v2369_v47 }
0x1a56   :  { %v2550_v3 = vpop.f32.mrf.mxu0 }
0x1a57   :  { %v2551_v4 = vadd.f32 %v5224_v61, %v2550_v3  ;;  %v2558_v5 = vsel %vm77_vm1, %v2554_v2, 0.0 }
0x1a58   :  { %2559 = vadd.xlane.f32.xlu1 %v2558_v5  ;;  %v5802_v7 = vpop.f32.mrf.mxu0 }
0x1a59   :  { %v2555_v8 = vadd.f32 %v2551_v4, %v2370_v48 }
0x1a5b   :  { %v2561_v11 = vsel %vm77_vm1, %v2555_v8, 0.0 }
0x1a5c   :  { %2562 = vadd.xlane.f32.xlu0 %v2561_v11 }
0x1ae1   :  { %v2560_v13 = vpop.xlane.xlu1 %2559 }
0x1ae2   :  { %v2564_v15 = vmul.f32 0.03125, %v2560_v13 }
0x1ae4   :  { %v2566_v16 = vsub.f32 %v2554_v2, %v2564_v15 }
0x1ae5   :  { %v2563_v17 = vpop.xlane.xlu0 %2562 }
0x1ae6   :  { %v2565_v18 = vmul.f32 0.03125, %v2563_v17  ;;  %v2568_v20 = vmul.f32 %v2566_v16, %v2566_v16 }
0x1ae8   :  { %v2567_v21 = vsub.f32 %v2555_v8, %v2565_v18  ;;  %v2570_v24 = vsel %vm77_vm1, %v2568_v20, 0.0 }
0x1ae9   :  { %2571 = vadd.xlane.f32.xlu1 %v2570_v24 }
0x1aea   :  { %v2569_v25 = vmul.f32 %v2567_v21, %v2567_v21 }
0x1aec   :  { %v2573_v26 = vsel %vm77_vm1, %v2569_v25, 0.0 }
0x1aed   :  { %2574 = vadd.xlane.f32.xlu0 %v2573_v26 }
0x1b72   :  { %v2572_v35 = vpop.xlane.xlu1 %2571 }
0x1b73   :  { %v2576_v37 = vmul.f32 0.03125, %v2572_v35 }
0x1b75   :  { %v2578_v41 = vadd.f32 1e-05, %v2576_v37 }
0x1b76   :  { %v2575_v42 = vpop.xlane.xlu0 %2574 }
0x1b77   :  { %6197 = vrsqrt.f32 %v2578_v41  ;;  %v2577_v9 = vmul.f32 0.03125, %v2575_v42 }
0x1b79   :  { %v2579_v27 = vadd.f32 1e-05, %v2577_v9 }
0x1b7b   :  { %6199 = vrsqrt.f32 %v2579_v27 }
0x1b84   :  { %v6198_v32 = vpop.eup %6197 }
0x1b85   :  { %v2582_v33 = vmul.f32 %v6198_v32, %v2566_v16 }
0x1b87   :  { %v2590_v34 = vmul.f32 %v5233_v30, %v2582_v33 }
0x1b88   :  { %v6200_v39 = vpop.eup %6199 }
0x1b89   :  { %v2583_v23 = vmul.f32 %v6200_v39, %v2567_v21  ;;  %v6955_v36 = vadd.f32 %v5234_v38, %v2590_v34 }
0x1b8b   :  { %v2591_v40 = vmul.f32 %v5233_v30, %v2583_v23 }
0x1b8d   :  { %v6957_v29 = vadd.f32 %v5234_v38, %v2591_v40 }
0x1b8f   :  { %v2600_v43 = vpack.c.bf16 %v6957_v29, %v6955_v36 }
0x1b91   :  { %5808 = vmatmul.mubr.msk.bf16.vlgmr.msra.gmra.mxu1 %vm77_vm1, %v2600_v43 }
0x1b92   :  { %5813 = vmatprep.mubr.msk.bf16.mxu1 %vm6302_vm0, %v6301_v1 }
0x1c51   :  { %v2663_v10 = vpop.f32.mrf.mxu1 }
0x1c52   :  { %v2664_v45 = vadd.f32 %v5240_v44, %v2663_v10 }
0x1c53   :  { %v5809_v46 = vpop.f32.mrf.mxu1 }
0x1c54   :  { %v6967_v22 = vpack.c.bf16 %v2664_v45, %v2664_v45  ;;  %v2670_v52 = vmul.f32 0.5, %v2664_v45 }
0x1c55   :  { %v2666_v47 = vpop.f32.mrf.mxu1 }
0x1c56   :  { %v2667_v48 = vadd.f32 %v5240_v44, %v2666_v47  ;;  %2677 = vrot.lane.b32.xlu1 %v6967_v22, %s6303_s23  ;;  %v6977_v54 = vpack.c.bf16 %v2670_v52, %v2670_v52 }
0x1c57   :  { %v5810_v49 = vpop.f32.mrf.mxu1 }
0x1c58   :  { %v6971_v50 = vpack.c.bf16 %v2667_v48, %v2667_v48  ;;  %v2671_v55 = vmul.f32 0.5, %v2667_v48 }
0x1c5a   :  { %2726 = vrot.lane.b32.xlu0 %v6971_v50, %s6303_s23  ;;  %v6985_v56 = vpack.c.bf16 %v2671_v55, %v2671_v55  ;;  %s7519_s23 = smov 44  }
0x1cc8   :  { %v2678_v51 = vpop.permute.xlu1 %2677 }
0x1cc9   :  { %v2683_v14 = vsel %vm143_vm2, %v2678_v51, 0 }
0x1cca   :  { %5812 = vmatpush3.bf16.xpose.msra.mxu1 %v2683_v14 }
0x1ccb   :  { %5817 = vmatprep.subr.bf16.mxu1 %v6301_v1 }
0x1ccc   :  { %v2727_v53 = vpop.permute.xlu0 %2726 }
0x1ccd   :  { %v2732_v19 = vsel %vm143_vm2, %v2727_v53, 0 }
0x1cd1   :  { %5814 = vmatmul.mubr.msk.bf16.vlgmr.msra.gmra.mxu1 %vm143_vm2, %v6977_v54 }
0x1cd2   :  { %5818 = vmatpush3.bf16.xpose.msra.mxu1 %v2732_v19  ;;  %5819 = vmatprep.mubr.msk.bf16.mxu1 %vm6302_vm0, %v6301_v1 }
0x1cd3   :  { %5823 = vmatprep.subr.bf16.mxu1 %v6301_v1 }
0x1cd9   :  { %5820 = vmatmul.mubr.msk.bf16.vlgmr.msra.gmra.mxu1 %vm143_vm2, %v6985_v56 }
0x1cda   :  { %5825 = vmatprep.mubr.msk.bf16.mxu1 %vm6302_vm0, %v6301_v1 }
0x1d91   :  { %v2719_v57 = vpop.f32.mrf.mxu1 }
0x1d92   :  { %v2720_v58 = vadd.f32 %v6775_v12, %v2719_v57 }
0x1d93   :  { %v5815_v59 = vpop.f32.mrf.mxu1 }
0x1d94   :  { %v2774_v60 = vsel %vm239_vm3, %v2720_v58, -inf }
0x1d95   :  { %2775 = vmax.xlane.f32.xlu1 %v2774_v60  ;;  %v2722_v61 = vpop.f32.mrf.mxu1 }
0x1d97   :  { %v5816_v62 = vpop.f32.mrf.mxu1 }
0x1d99   :  { %v2768_v63 = vpop.f32.mrf.mxu1 }
0x1d9a   :  { %v2769_v0 = vadd.f32 %v6792_v6, %v2768_v63 }
0x1d9b   :  { %v5821_v2 = vpop.f32.mrf.mxu1 }
0x1d9c   :  { %v2777_v3 = vsel %vm239_vm3, %v2769_v0, -inf }
0x1d9d   :  { %2778 = vmax.xlane.f32.xlu0 %v2777_v3  ;;  %v2771_v4 = vpop.f32.mrf.mxu1 }
0x1d9f   :  { %v5822_v5 = vpop.f32.mrf.mxu1 }
0x1da6   :  { %2798 = vrot.lane.b32.xlu1 %v6967_v22, %s6304_s28 }
0x1e1e   :  { %v2776_v7 = vpop.xlane.xlu1 %2775 }
0x1e1f   :  { %v2780_v8 = vsub.f32 %v2720_v58, %v2776_v7 }
0x1e21   :  { %v2782_v11 = vmul.f32 1.442695, %v2780_v8 }
0x1e22   :  { %v2799_v13 = vpop.permute.xlu1 %2798 }
0x1e23   :  { %6201 = vpow2.f32 %v2782_v11  ;;  %v2804_v15 = vsel %vm269_vm4, %v2799_v13, 0 }
0x1e24   :  { %5824 = vmatpush3.bf16.msra.mxu1 %v2804_v15 }
0x1e25   :  { %5835 = vmatprep.subr.bf16.mxu1 %v6301_v1 }
0x1e26   :  { %v2779_v16 = vpop.xlane.xlu0 %2778 }
0x1e27   :  { %v2781_v17 = vsub.f32 %v2769_v0, %v2779_v16 }
0x1e29   :  { %v2784_v18 = vmul.f32 1.442695, %v2781_v17 }
0x1e2b   :  { %6203 = vpow2.f32 %v2784_v18 }
0x1e30   :  { %v6202_v20 = vpop.eup %6201 }
0x1e31   :  { %v2786_v21 = vsel %vm239_vm3, %v6202_v20, 0.0 }
0x1e32   :  { %2787 = vadd.xlane.f32.xlu1 %v2786_v21 }
0x1e38   :  { %v6204_v24 = vpop.eup %6203 }
0x1e39   :  { %v2789_v25 = vsel %vm239_vm3, %v6204_v24, 0.0 }
0x1e3a   :  { %2790 = vadd.xlane.f32.xlu0 %v2789_v25 }
0x1e43   :  { %2900 = vrot.lane.b32.xlu1 %v6967_v22, %s6305_s29 }
0x1e47   :  { %2951 = vrot.lane.b32.xlu1 %v6971_v50, %s6305_s29  ;;  %s7521_s29 = smov 104  }
0x1e4b   :  { %2949 = vrot.lane.b32.xlu1 %v6985_v56, %s6306_s30 }
0x1e50   :  { %2846 = vrot.lane.b32.xlu0 %v6971_v50, %s6304_s28  ;;  %s7520_s28 = smov 72  }
0x1e54   :  { %2898 = vrot.lane.b32.xlu0 %v6977_v54, %s6306_s30  ;;  %s7512_s30 = smov 116  }
0x1ebb   :  { %v2788_v26 = vpop.xlane.xlu1 %2787 }
0x1ebc   :  { %6205 = vrcp.f32 %v2788_v26 }
0x1ebf   :  { %v2901_v42 = vpop.permute.xlu1 %2900 }
0x1ec0   :  { %v2906_v27 = vsel %vm143_vm2, %v2901_v42, 0 }
0x1ec3   :  { %v2791_v28 = vpop.xlane.xlu0 %2790  ;;  %v2952_v30 = vpop.permute.xlu1 %2951 }
0x1ec4   :  { %6207 = vrcp.f32 %v2791_v28  ;;  %v2957_v34 = vsel %vm143_vm2, %v2952_v30, 0  ;;  %v5248_v28 = vld [vmem:[%s7473_s4 + $0x10] sm:$0x3] }
0x1ec7   :  { %v2847_v31 = vpop.permute.xlu0 %2846  ;;  %v2950_v38 = vpop.permute.xlu1 %2949 }
0x1ec8   :  { %v2852_v35 = vsel %vm269_vm4, %v2847_v31, 0 }
0x1ec9   :  { %v6206_v37 = vpop.eup %6205  ;;  %5830 = vmatpush3.bf16.msra.mxu0 %v2852_v35 }
0x1eca   :  { %v2794_v41 = vmul.f32 %v6206_v37, %v6202_v20  ;;  %5841 = vmatprep.subr.bf16.mxu0 %v6301_v1  ;;  %v3173_v37 = vsel %vm591_vm5, %v5248_v28, 0 }
0x1ecb   :  { %v2899_v23 = vpop.permute.xlu0 %2898 }
0x1ecc   :  { %v2796_v9 = vpack.c.bf16 %v2794_v41, %v2794_v41 }
0x1ece   :  { %5826 = vmatmul.mubr.msk.bf16.vlgmr.msra.gmra.mxu1 %vm239_vm3, %v2796_v9 }
0x1ecf   :  { %5836 = vmatpush3.bf16.xpose.msra.mxu1 %v2906_v27  ;;  %5837 = vmatprep.mubr.msk.bf16.mxu1 %vm6302_vm0, %v6301_v1 }
0x1ed0   :  { %5847 = vmatprep.subr.bf16.mxu1 %v6301_v1 }
0x1ed1   :  { %v6208_v32 = vpop.eup %6207 }
0x1ed2   :  { %v2795_v33 = vmul.f32 %v6208_v32, %v6204_v24  ;;  %v5253_v32 = vld [vmem:[%s7473_s4 + $0x12] sm:$0x3] }
0x1ed4   :  { %v2797_v39 = vpack.c.bf16 %v2795_v33, %v2795_v33  ;;  %v3126_v33 = vsel %vm591_vm5, %v5253_v32, 0 }
0x1ed6   :  { %5832 = vmatmul.mubr.msk.bf16.vlgmr.msra.gmra.mxu0 %vm239_vm3, %v2797_v39  ;;  %5838 = vmatmul.mubr.msk.bf16.vlgmr.msra.gmra.mxu1 %vm143_vm2, %v2899_v23 }
0x1ed7   :  { %5842 = vmatpush3.bf16.xpose.msra.mxu0 %v2957_v34  ;;  %5843 = vmatprep.mubr.msk.bf16.mxu0 %vm6302_vm0, %v6301_v1 }
0x1ed8   :  { %5853 = vmatprep.subr.bf16.mxu0 %v6301_v1  ;;  %5849 = vmatprep.mubr.msk.bf16.mxu1 %vm6302_vm0, %v6301_v1 }
0x1ede   :  { %5844 = vmatmul.mubr.msk.bf16.vlgmr.msra.gmra.mxu0 %vm143_vm2, %v2950_v38 }
0x1edf   :  { %5855 = vmatprep.mubr.msk.bf16.mxu0 %vm6302_vm0, %v6301_v1 }
0x1f8e   :  { %v7029_v40 = vpop.f32.mrf.mxu1 }
0x1f90   :  { %v5827_v43 = vpop.f32.mrf.mxu1 }
0x1f92   :  { %v2843_v44 = vpop.f32.mrf.mxu1 }
0x1f94   :  { %v5828_v10 = vpop.f32.mrf.mxu1 }
0x1f96   :  { %v7031_v45 = vpop.f32.mrf.mxu0  ;;  %v2942_v46 = vpop.f32.mrf.mxu1 }
0x1f97   :  { %v2894_v47 = vpack.c.bf16 %v7031_v45, %v7029_v40  ;;  %v2943_v48 = vadd.f32 %v6775_v12, %v2942_v46 }
0x1f98   :  { %v5833_v49 = vpop.f32.mrf.mxu0  ;;  %v5839_v51 = vpop.f32.mrf.mxu1 }
0x1f99   :  { %v2999_v14 = vsel %vm239_vm3, %v2943_v48, -inf }
0x1f9a   :  { %v2891_v52 = vpop.f32.mrf.mxu0  ;;  %3000 = vmax.xlane.f32.xlu0 %v2999_v14  ;;  %v2945_v53 = vpop.f32.mrf.mxu1 }
0x1f9c   :  { %v5834_v19 = vpop.f32.mrf.mxu0  ;;  %v5840_v55 = vpop.f32.mrf.mxu1 }
0x1f9e   :  { %v2993_v57 = vpop.f32.mrf.mxu0 }
0x1f9f   :  { %v2994_v58 = vadd.f32 %v6792_v6, %v2993_v57 }
0x1fa0   :  { %v5845_v59 = vpop.f32.mrf.mxu0 }
0x1fa1   :  { %v3002_v60 = vsel %vm239_vm3, %v2994_v58, -inf }
0x1fa2   :  { %3003 = vmax.xlane.f32.xlu1 %v3002_v60  ;;  %v2996_v61 = vpop.f32.mrf.mxu0 }
0x1fa4   :  { %v5846_v62 = vpop.f32.mrf.mxu0 }
0x1fb3   :  { %3023 = vrot.lane.b32.xlu1 %v6967_v22, %s6307_s15 }
0x1fb7   :  { %3218 = vrot.lane.b32.xlu1 %v6967_v22, %s6309_s17 }
0x1fbb   :  { %3268 = vrot.lane.b32.xlu1 %v6971_v50, %s6309_s17  ;;  %s7523_s17 = smov 68  }
0x1fbf   :  { %3266 = vrot.lane.b32.xlu1 %v6985_v56, %s6308_s16 }
0x2023   :  { %v3001_v12 = vpop.xlane.xlu0 %3000 }
0x2024   :  { %v3005_v63 = vsub.f32 %v2943_v48, %v3001_v12 }
0x2026   :  { %v3007_v0 = vmul.f32 1.442695, %v3005_v63 }
0x2028   :  { %6209 = vpow2.f32 %v3007_v0 }
0x202b   :  { %v3004_v2 = vpop.xlane.xlu1 %3003 }
0x202c   :  { %v3006_v3 = vsub.f32 %v2994_v58, %v3004_v2 }
0x202e   :  { %v3009_v4 = vmul.f32 1.442695, %v3006_v3  ;;  %v7115_v3 = vld [vmem:[%s7470_s1] ss:$0 sm:$0xff] }
0x202f   :  { %v3024_v5 = vpop.permute.xlu1 %3023 }
0x2030   :  { %6211 = vpow2.f32 %v3009_v4  ;;  %v3029_v7 = vsel %vm269_vm4, %v3024_v5, 0 }
0x2031   :  { %5848 = vmatpush3.bf16.msra.mxu1 %v3029_v7 }
0x2032   :  { %5859 = vmatprep.subr.bf16.mxu1 %v6301_v1 }
0x2033   :  { %v3219_v41 = vpop.permute.xlu1 %3218 }
0x2034   :  { %v3224_v44 = vsel %vm143_vm2, %v3219_v41, 0 }
0x2035   :  { %v6210_v8 = vpop.eup %6209 }
0x2036   :  { %v3011_v11 = vsel %vm239_vm3, %v6210_v8, 0.0 }
0x2037   :  { %3012 = vadd.xlane.f32.xlu0 %v3011_v11  ;;  %v3269_v42 = vpop.permute.xlu1 %3268 }
0x2038   :  { %v3274_v9 = vsel %vm143_vm2, %v3269_v42, 0 }
0x203b   :  { %v3267_v27 = vpop.permute.xlu1 %3266 }
0x203d   :  { %v6212_v13 = vpop.eup %6211 }
0x203e   :  { %v3014_v15 = vsel %vm239_vm3, %v6212_v13, 0.0 }
0x203f   :  { %3015 = vadd.xlane.f32.xlu0 %v3014_v15 }
0x2055   :  { %3071 = vrot.lane.b32.xlu0 %v6971_v50, %s6307_s15 }
0x2059   :  { %3216 = vrot.lane.b32.xlu0 %v6977_v54, %s6308_s16  ;;  %s7522_s16 = smov 40  }
0x20c0   :  { %v3013_v16 = vpop.xlane.xlu0 %3012 }
0x20c1   :  { %6213 = vrcp.f32 %v3013_v16 }
0x20c8   :  { %v3016_v17 = vpop.xlane.xlu0 %3015 }
0x20c9   :  { %6215 = vrcp.f32 %v3016_v17 }
0x20cc   :  { %v3072_v18 = vpop.permute.xlu0 %3071 }
0x20cd   :  { %v3077_v20 = vsel %vm269_vm4, %v3072_v18, 0 }
0x20ce   :  { %v6214_v21 = vpop.eup %6213  ;;  %5854 = vmatpush3.bf16.msra.mxu0 %v3077_v20 }
0x20cf   :  { %v3019_v24 = vmul.f32 %v6214_v21, %v6210_v8  ;;  %5865 = vmatprep.subr.bf16.mxu0 %v6301_v1 }
0x20d1   :  { %v3021_v25 = vpack.c.bf16 %v3019_v24, %v3019_v24 }
0x20d3   :  { %5850 = vmatmul.mubr.msk.bf16.vlgmr.msra.gmra.mxu1 %vm239_vm3, %v3021_v25 }
0x20d4   :  { %5861 = vmatprep.mubr.msk.bf16.mxu1 %vm6302_vm0, %v6301_v1  ;;  %5860 = vmatpush3.bf16.msra.mxu1 %v3126_v33 }
0x20d5   :  { %5871 = vmatprep.subr.bf16.mxu1 %v6301_v1 }
0x20d6   :  { %v6216_v26 = vpop.eup %6215 }
0x20d7   :  { %v3020_v31 = vmul.f32 %v6216_v26, %v6212_v13 }
0x20d9   :  { %v3022_v35 = vpack.c.bf16 %v3020_v31, %v3020_v31 }
0x20db   :  { %5856 = vmatmul.mubr.msk.bf16.vlgmr.msra.gmra.mxu0 %vm239_vm3, %v3022_v35 }
0x20dc   :  { %5866 = vmatpush3.bf16.msra.mxu0 %v3173_v37  ;;  %5867 = vmatprep.mubr.msk.bf16.mxu0 %vm6302_vm0, %v6301_v1 }
0x20dd   :  { %5877 = vmatprep.subr.bf16.mxu0 %v6301_v1 }
0x20e3   :  { %5868 = vmatmul.mubr.msk.bf16.vlgmr.msra.gmra.mxu0 %vm143_vm2, %v2894_v47  ;;  %v3217_v47 = vpop.permute.xlu0 %3216 }
0x20e4   :  { %5878 = vmatpush3.bf16.xpose.msra.mxu0 %v3274_v9  ;;  %5879 = vmatprep.mubr.msk.bf16.mxu0 %vm6302_vm0, %v6301_v1 }
0x20e5   :  { %5889 = vmatprep.subr.bf16.mxu0 %v6301_v1 }
0x20eb   :  { %5880 = vmatmul.mubr.msk.bf16.vlgmr.msra.gmra.mxu0 %vm143_vm2, %v3267_v27 }
0x20ec   :  { %5891 = vmatprep.mubr.msk.bf16.mxu0 %vm6302_vm0, %v6301_v1 }
0x2193   :  { %v3065_v30 = vpop.f32.mrf.mxu1 }
0x2195   :  { %v5851_v39 = vpop.f32.mrf.mxu1 }
0x2197   :  { %v3068_v23 = vpop.f32.mrf.mxu1 }
0x2199   :  { %v5852_v34 = vpop.f32.mrf.mxu1 }
0x219b   :  { %v3113_v38 = vpop.f32.mrf.mxu0 }
0x219c   :  { %v3119_v40 = vpack.c.bf16 %v3113_v38, %v3065_v30  ;;  %v5260_v30 = vld [vmem:[%s7473_s4 + $0x14] sm:$0x3] }
0x219d   :  { %v5857_v43 = vpop.f32.mrf.mxu0  ;;  %v3443_v39 = vsel %vm591_vm5, %v5260_v30, 0 }
0x219e   :  { %5862 = vmatmul.mubr.msk.bf16.vlgmr.msra.gmra.mxu1 %vm143_vm2, %v3119_v40 }
0x219f   :  { %5872 = vmatpush3.bf16.xpose.msra.mxu1 %v3224_v44  ;;  %v3116_v10 = vpop.f32.mrf.mxu0  ;;  %5873 = vmatprep.mubr.msk.bf16.mxu1 %vm6302_vm0, %v6301_v1 }
0x21a0   :  { %5883 = vmatprep.subr.bf16.mxu1 %v6301_v1 }
0x21a1   :  { %v5858_v45 = vpop.f32.mrf.mxu0 }
0x21a3   :  { %v7089_v46 = vpop.f32.mrf.mxu0 }
0x21a5   :  { %v5869_v48 = vpop.f32.mrf.mxu0 }
0x21a6   :  { %5874 = vmatmul.mubr.msk.bf16.vlgmr.msra.gmra.mxu1 %vm143_vm2, %v3217_v47 }
0x21a7   :  { %v7092_v49 = vpop.f32.mrf.mxu0  ;;  %5885 = vmatprep.mubr.msk.bf16.mxu1 %vm6302_vm0, %v6301_v1 }
0x21a9   :  { %v5870_v51 = vpop.f32.mrf.mxu0 }
0x21ab   :  { %v3310_v14 = vpop.f32.mrf.mxu0 }
0x21ac   :  { %v3311_v52 = vadd.f32 %v6792_v6, %v3310_v14 }
0x21ad   :  { %v5881_v53 = vpop.f32.mrf.mxu0 }
0x21ae   :  { %v3319_v19 = vsel %vm239_vm3, %v3311_v52, -inf }
0x21af   :  { %3320 = vmax.xlane.f32.xlu1 %v3319_v19  ;;  %v3313_v55 = vpop.f32.mrf.mxu0 }
0x21b1   :  { %v5882_v57 = vpop.f32.mrf.mxu0 }
0x21c0   :  { %3340 = vrot.lane.b32.xlu1 %v6967_v22, %s6310_s22 }
0x21c4   :  { %3490 = vrot.lane.b32.xlu1 %v6967_v22, %s6311_s24 }
0x21c8   :  { %3540 = vrot.lane.b32.xlu1 %v6971_v50, %s6311_s24 }
0x21cc   :  { %3538 = vrot.lane.b32.xlu1 %v6985_v56, %s7512_s30 }
0x2238   :  { %v3321_v58 = vpop.xlane.xlu1 %3320 }
0x2239   :  { %v3323_v60 = vsub.f32 %v3311_v52, %v3321_v58 }
0x223b   :  { %v3326_v61 = vmul.f32 1.442695, %v3323_v60 }
0x223c   :  { %v3341_v6 = vpop.permute.xlu1 %3340 }
0x223d   :  { %v3346_v59 = vsel %vm269_vm4, %v3341_v6, 0  ;;  %6217 = vpow2.f32 %v3326_v61 }
0x223e   :  { %5884 = vmatpush3.bf16.msra.mxu1 %v3346_v59 }
0x223f   :  { %5895 = vmatprep.subr.bf16.mxu1 %v6301_v1 }
0x2240   :  { %v3491_v37 = vpop.permute.xlu1 %3490 }
0x2241   :  { %v3496_v42 = vsel %vm143_vm2, %v3491_v37, 0 }
0x2244   :  { %v3541_v44 = vpop.permute.xlu1 %3540 }
0x2245   :  { %v3546_v53 = vsel %vm143_vm2, %v3541_v44, 0 }
0x2248   :  { %v3539_v58 = vpop.permute.xlu1 %3538 }
0x224a   :  { %v6218_v8 = vpop.eup %6217 }
0x224b   :  { %v3331_v15 = vsel %vm239_vm3, %v6218_v8, 0.0 }
0x225e   :  { %v7108_v62 = vpop.f32.mrf.mxu1 }
0x2260   :  { %v5863_v12 = vpop.f32.mrf.mxu1 }
0x2262   :  { %v7110_v63 = vpop.f32.mrf.mxu1 }
0x2264   :  { %v5864_v0 = vpop.f32.mrf.mxu1 }
0x2265   :  { %v3210_v0 = vadd.f32 %v7089_v46, %v7108_v62 }
0x2266   :  { %v3260_v2 = vpop.f32.mrf.mxu1 }
0x2267   :  { %v3261_v4 = vadd.f32 %v7115_v3, %v3260_v2 }
0x2268   :  { %v5875_v5 = vpop.f32.mrf.mxu1 }
0x2269   :  { %v3316_v7 = vsel %vm239_vm3, %v3261_v4, -inf }
0x226a   :  { %3317 = vmax.xlane.f32.xlu0 %v3316_v7  ;;  %v3263_v11 = vpop.f32.mrf.mxu1  ;;  %v3213_v7 = vadd.f32 %v7092_v49, %v7110_v63 }
0x226c   :  { %v5876_v13 = vpop.f32.mrf.mxu1 }
0x226e   :  { %3332 = vadd.xlane.f32.xlu0 %v3331_v15 }
0x22f3   :  { %v3318_v16 = vpop.xlane.xlu0 %3317 }
0x22f4   :  { %v3322_v17 = vsub.f32 %v3261_v4, %v3318_v16  ;;  %v7165_v16 = vld [vmem:[%s7470_s1 + $0x1] ss:$0 sm:$0xff] }
0x22f6   :  { %v3324_v18 = vmul.f32 1.442695, %v3322_v17 }
0x22f7   :  { %v3333_v24 = vpop.xlane.xlu0 %3332 }
0x22f8   :  { %6219 = vpow2.f32 %v3324_v18 }
0x22f9   :  { %6221 = vrcp.f32 %v3333_v24 }
0x2305   :  { %v6220_v20 = vpop.eup %6219 }
0x2306   :  { %v3328_v21 = vsel %vm239_vm3, %v6220_v20, 0.0  ;;  %v6222_v25 = vpop.eup %6221 }
0x2307   :  { %3329 = vadd.xlane.f32.xlu0 %v3328_v21  ;;  %v3337_v28 = vmul.f32 %v6222_v25, %v6218_v8 }
0x2309   :  { %v3339_v41 = vpack.c.bf16 %v3337_v28, %v3337_v28 }
0x231d   :  { %3388 = vrot.lane.b32.xlu0 %v6971_v50, %s6310_s22  ;;  %s7524_s22 = smov 100  }
0x2321   :  { %3488 = vrot.lane.b32.xlu0 %v6977_v54, %s7512_s30 }
0x2390   :  { %v3330_v26 = vpop.xlane.xlu0 %3329 }
0x2391   :  { %6223 = vrcp.f32 %v3330_v26 }
0x2394   :  { %v3389_v31 = vpop.permute.xlu0 %3388 }
0x2395   :  { %v3394_v35 = vsel %vm269_vm4, %v3389_v31, 0 }
0x2396   :  { %5890 = vmatpush3.bf16.msra.mxu0 %v3394_v35 }
0x2397   :  { %5901 = vmatprep.subr.bf16.mxu0 %v6301_v1 }
0x2398   :  { %v3489_v32 = vpop.permute.xlu0 %3488 }
0x2399   :  { %5892 = vmatmul.mubr.msk.bf16.vlgmr.msra.gmra.mxu0 %vm239_vm3, %v3339_v41 }
0x239a   :  { %5902 = vmatpush3.bf16.xpose.msra.mxu0 %v3496_v42  ;;  %5903 = vmatprep.mubr.msk.bf16.mxu0 %vm6302_vm0, %v6301_v1  ;;  %v5266_v42 = vld [vmem:[%s7473_s4 + $0x16] sm:$0x3] }
0x239b   :  { %5913 = vmatprep.subr.bf16.mxu0 %v6301_v1 }
0x239e   :  { %v6224_v9 = vpop.eup %6223 }
0x239f   :  { %v3336_v27 = vmul.f32 %v6224_v9, %v6220_v20  ;;  %v3715_v9 = vsel %vm591_vm5, %v5266_v42, 0 }
0x23a1   :  { %v3338_v33 = vpack.c.bf16 %v3336_v27, %v3336_v27  ;;  %5904 = vmatmul.mubr.msk.bf16.vlgmr.msra.gmra.mxu0 %vm143_vm2, %v3489_v32 }
0x23a2   :  { %5915 = vmatprep.mubr.msk.bf16.mxu0 %vm6302_vm0, %v6301_v1 }
0x23a3   :  { %5886 = vmatmul.mubr.msk.bf16.vlgmr.msra.gmra.mxu1 %vm239_vm3, %v3338_v33 }
0x23a4   :  { %5897 = vmatprep.mubr.msk.bf16.mxu1 %vm6302_vm0, %v6301_v1  ;;  %5896 = vmatpush3.bf16.msra.mxu1 %v3443_v39 }
0x23a5   :  { %5907 = vmatprep.subr.bf16.mxu1 %v6301_v1 }
0x2459   :  { %v3430_v23 = vpop.f32.mrf.mxu0 }
0x245b   :  { %v5893_v34 = vpop.f32.mrf.mxu0 }
0x245d   :  { %v3433_v38 = vpop.f32.mrf.mxu0 }
0x245f   :  { %v5894_v40 = vpop.f32.mrf.mxu0 }
0x2461   :  { %v3532_v43 = vpop.f32.mrf.mxu0 }
0x2462   :  { %v3533_v10 = vadd.f32 %v7115_v3, %v3532_v43 }
0x2463   :  { %v3382_v45 = vpop.f32.mrf.mxu1  ;;  %v5905_v47 = vpop.f32.mrf.mxu0 }
0x2464   :  { %v3436_v48 = vpack.c.bf16 %v3430_v23, %v3382_v45  ;;  %v3588_v51 = vsel %vm239_vm3, %v3533_v10, -inf }
0x2465   :  { %3589 = vmax.xlane.f32.xlu0 %v3588_v51  ;;  %v5887_v14 = vpop.f32.mrf.mxu1  ;;  %v3535_v52 = vpop.f32.mrf.mxu0 }
0x2466   :  { %5898 = vmatmul.mubr.msk.bf16.vlgmr.msra.gmra.mxu1 %vm143_vm2, %v3436_v48 }
0x2467   :  { %5908 = vmatpush3.bf16.xpose.msra.mxu1 %v3546_v53  ;;  %v3385_v19 = vpop.f32.mrf.mxu1  ;;  %v5906_v55 = vpop.f32.mrf.mxu0  ;;  %5909 = vmatprep.mubr.msk.bf16.mxu1 %vm6302_vm0, %v6301_v1 }
0x2468   :  { %5919 = vmatprep.subr.bf16.mxu1 %v6301_v1 }
0x2469   :  { %v5888_v57 = vpop.f32.mrf.mxu1 }
0x246e   :  { %5910 = vmatmul.mubr.msk.bf16.vlgmr.msra.gmra.mxu1 %vm143_vm2, %v3539_v58 }
0x246f   :  { %5921 = vmatprep.mubr.msk.bf16.mxu1 %vm6302_vm0, %v6301_v1 }
0x24ee   :  { %v3590_v6 = vpop.xlane.xlu0 %3589 }
0x24ef   :  { %v3594_v59 = vsub.f32 %v3533_v10, %v3590_v6 }
0x24f1   :  { %v3596_v60 = vmul.f32 1.442695, %v3594_v59 }
0x24f3   :  { %6225 = vpow2.f32 %v3596_v60 }
0x2500   :  { %v6226_v61 = vpop.eup %6225 }
0x2501   :  { %v3600_v12 = vsel %vm239_vm3, %v6226_v61, 0.0 }
0x2502   :  { %3601 = vadd.xlane.f32.xlu0 %v3600_v12 }
0x2526   :  { %v3479_v2 = vpop.f32.mrf.mxu1 }
0x2527   :  { %v7156_v4 = vadd.f32 %v3479_v2, %v3210_v0 }
0x2528   :  { %v5899_v5 = vpop.f32.mrf.mxu1 }
0x252a   :  { %v3482_v8 = vpop.f32.mrf.mxu1 }
0x252b   :  { %v7160_v11 = vadd.f32 %v3482_v8, %v3213_v7 }
0x252c   :  { %v5900_v13 = vpop.f32.mrf.mxu1 }
0x252e   :  { %v3582_v15 = vpop.f32.mrf.mxu1 }
0x252f   :  { %v3583_v17 = vadd.f32 %v7165_v16, %v3582_v15 }
0x2530   :  { %v5911_v46 = vpop.f32.mrf.mxu1 }
0x2531   :  { %v3591_v62 = vsel %vm239_vm3, %v3583_v17, -inf }
0x2532   :  { %3592 = vmax.xlane.f32.xlu1 %v3591_v62  ;;  %v3585_v18 = vpop.f32.mrf.mxu1 }
0x2534   :  { %v5912_v20 = vpop.f32.mrf.mxu1 }
0x2543   :  { %3612 = vrot.lane.b32.xlu1 %v6967_v22, %s7513_s27 }
0x2547   :  { %3762 = vrot.lane.b32.xlu1 %v6967_v22, %s7514_s21 }
0x254b   :  { %3812 = vrot.lane.b32.xlu1 %v6971_v50, %s7514_s21 }
0x254f   :  { %3810 = vrot.lane.b32.xlu1 %v6985_v56, %s7515_s18 }
0x258b   :  { %v3602_v49 = vpop.xlane.xlu0 %3601 }
0x258c   :  { %6227 = vrcp.f32 %v3602_v49 }
0x2599   :  { %v6228_v63 = vpop.eup %6227 }
0x259a   :  { %v3608_v26 = vmul.f32 %v6228_v63, %v6226_v61 }
0x259c   :  { %v3610_v35 = vpack.c.bf16 %v3608_v26, %v3608_v26 }
0x25bb   :  { %v3593_v21 = vpop.xlane.xlu1 %3592 }
0x25bc   :  { %v3595_v24 = vsub.f32 %v3583_v17, %v3593_v21 }
0x25be   :  { %v3598_v25 = vmul.f32 1.442695, %v3595_v24 }
0x25bf   :  { %v3613_v28 = vpop.permute.xlu1 %3612 }
0x25c0   :  { %6229 = vpow2.f32 %v3598_v25  ;;  %v3618_v31 = vsel %vm269_vm4, %v3613_v28, 0 }
0x25c1   :  { %5914 = vmatpush3.bf16.msra.mxu0 %v3618_v31 }
0x25c2   :  { %5925 = vmatprep.subr.bf16.mxu0 %v6301_v1 }
0x25c3   :  { %v3763_v23 = vpop.permute.xlu1 %3762 }
0x25c4   :  { %5916 = vmatmul.mubr.msk.bf16.vlgmr.msra.gmra.mxu0 %vm239_vm3, %v3610_v35  ;;  %v3768_v38 = vsel %vm143_vm2, %v3763_v23, 0 }
0x25c5   :  { %5927 = vmatprep.mubr.msk.bf16.mxu0 %vm6302_vm0, %v6301_v1  ;;  %5926 = vmatpush3.bf16.msra.mxu0 %v3715_v9 }
0x25c6   :  { %5937 = vmatprep.subr.bf16.mxu0 %v6301_v1 }
0x25c7   :  { %v3813_v47 = vpop.permute.xlu1 %3812 }
0x25c8   :  { %v3818_v52 = vsel %vm143_vm2, %v3813_v47, 0 }
0x25cb   :  { %v3811_v58 = vpop.permute.xlu1 %3810 }
0x25cd   :  { %v6230_v37 = vpop.eup %6229 }
0x25ce   :  { %v3603_v41 = vsel %vm239_vm3, %v6230_v37, 0.0 }
0x25cf   :  { %3604 = vadd.xlane.f32.xlu0 %v3603_v41 }
0x25e5   :  { %3660 = vrot.lane.b32.xlu0 %v6971_v50, %s7513_s27  ;;  %s7525_s27 = smov 36  }
0x25e9   :  { %3760 = vrot.lane.b32.xlu0 %v6977_v54, %s7515_s18 }
0x2658   :  { %v3605_v27 = vpop.xlane.xlu0 %3604 }
0x2659   :  { %6231 = vrcp.f32 %v3605_v27  ;;  %v5272_v27 = vld [vmem:[%s7473_s4 + $0x18] sm:$0x3] }
0x265c   :  { %v3661_v32 = vpop.permute.xlu0 %3660 }
0x265d   :  { %v3666_v33 = vsel %vm269_vm4, %v3661_v32, 0  ;;  %v3987_v32 = vsel %vm591_vm5, %v5272_v27, 0 }
0x265e   :  { %5920 = vmatpush3.bf16.msra.mxu1 %v3666_v33 }
0x265f   :  { %5931 = vmatprep.subr.bf16.mxu1 %v6301_v1 }
0x2660   :  { %v3761_v40 = vpop.permute.xlu0 %3760 }
0x2666   :  { %v6232_v30 = vpop.eup %6231 }
0x2667   :  { %v3609_v39 = vmul.f32 %v6232_v30, %v6230_v37 }
0x2669   :  { %v3611_v34 = vpack.c.bf16 %v3609_v39, %v3609_v39 }
0x266b   :  { %5922 = vmatmul.mubr.msk.bf16.vlgmr.msra.gmra.mxu1 %vm239_vm3, %v3611_v34 }
0x266c   :  { %5932 = vmatpush3.bf16.xpose.msra.mxu1 %v3768_v38  ;;  %5933 = vmatprep.mubr.msk.bf16.mxu1 %vm6302_vm0, %v6301_v1 }
0x266d   :  { %5943 = vmatprep.subr.bf16.mxu1 %v6301_v1 }
0x2673   :  { %5934 = vmatmul.mubr.msk.bf16.vlgmr.msra.gmra.mxu1 %vm143_vm2, %v3761_v40 }
0x2674   :  { %5945 = vmatprep.mubr.msk.bf16.mxu1 %vm6302_vm0, %v6301_v1 }
0x2684   :  { %v3654_v43 = vpop.f32.mrf.mxu0 }
0x2686   :  { %v5917_v44 = vpop.f32.mrf.mxu0 }
0x2688   :  { %v3657_v10 = vpop.f32.mrf.mxu0 }
0x268a   :  { %v5918_v45 = vpop.f32.mrf.mxu0 }
0x272b   :  { %v3702_v48 = vpop.f32.mrf.mxu1 }
0x272c   :  { %v3708_v51 = vpack.c.bf16 %v3702_v48, %v3654_v43 }
0x272d   :  { %v5923_v14 = vpop.f32.mrf.mxu1 }
0x272e   :  { %5928 = vmatmul.mubr.msk.bf16.vlgmr.msra.gmra.mxu0 %vm143_vm2, %v3708_v51 }
0x272f   :  { %5938 = vmatpush3.bf16.xpose.msra.mxu0 %v3818_v52  ;;  %v3705_v53 = vpop.f32.mrf.mxu1  ;;  %5939 = vmatprep.mubr.msk.bf16.mxu0 %vm6302_vm0, %v6301_v1 }
0x2730   :  { %5949 = vmatprep.subr.bf16.mxu0 %v6301_v1 }
0x2731   :  { %v5924_v19 = vpop.f32.mrf.mxu1 }
0x2733   :  { %v3804_v55 = vpop.f32.mrf.mxu1 }
0x2734   :  { %v3805_v57 = vadd.f32 %v7115_v3, %v3804_v55 }
0x2735   :  { %v5935_v6 = vpop.f32.mrf.mxu1 }
0x2736   :  { %5940 = vmatmul.mubr.msk.bf16.vlgmr.msra.gmra.mxu0 %vm143_vm2, %v3811_v58  ;;  %v3860_v59 = vsel %vm239_vm3, %v3805_v57, -inf }
0x2737   :  { %3861 = vmax.xlane.f32.xlu0 %v3860_v59  ;;  %v3807_v60 = vpop.f32.mrf.mxu1  ;;  %5951 = vmatprep.mubr.msk.bf16.mxu0 %vm6302_vm0, %v6301_v1 }
0x2739   :  { %v5936_v61 = vpop.f32.mrf.mxu1 }
0x27c0   :  { %v3862_v12 = vpop.xlane.xlu0 %3861 }
0x27c1   :  { %v3866_v0 = vsub.f32 %v3805_v57, %v3862_v12 }
0x27c3   :  { %v3868_v2 = vmul.f32 1.442695, %v3866_v0 }
0x27c5   :  { %6233 = vpow2.f32 %v3868_v2 }
0x27d2   :  { %v6234_v5 = vpop.eup %6233 }
0x27d3   :  { %v3872_v7 = vsel %vm239_vm3, %v6234_v5, 0.0 }
0x27d4   :  { %3873 = vadd.xlane.f32.xlu0 %v3872_v7 }
0x27ee   :  { %v3751_v8 = vpop.f32.mrf.mxu0 }
0x27ef   :  { %v7214_v13 = vadd.f32 %v3751_v8, %v7156_v4 }
0x27f0   :  { %v5929_v15 = vpop.f32.mrf.mxu0 }
0x27f2   :  { %v3754_v17 = vpop.f32.mrf.mxu0 }
0x27f3   :  { %v7217_v46 = vadd.f32 %v3754_v17, %v7160_v11 }
0x27f4   :  { %v5930_v62 = vpop.f32.mrf.mxu0 }
0x27f6   :  { %v3854_v18 = vpop.f32.mrf.mxu0 }
0x27f7   :  { %v3855_v20 = vadd.f32 %v7165_v16, %v3854_v18 }
0x27f8   :  { %v5941_v49 = vpop.f32.mrf.mxu0 }
0x27f9   :  { %v3863_v63 = vsel %vm239_vm3, %v3855_v20, -inf }
0x27fa   :  { %3864 = vmax.xlane.f32.xlu1 %v3863_v63  ;;  %v3857_v21 = vpop.f32.mrf.mxu0 }
0x27fc   :  { %v5942_v24 = vpop.f32.mrf.mxu0 }
0x280b   :  { %3884 = vrot.lane.b32.xlu1 %v6967_v22, %s7516_s2 }
0x280f   :  { %4034 = vrot.lane.b32.xlu1 %v6967_v22, %s7517_s19 }
0x2813   :  { %4084 = vrot.lane.b32.xlu1 %v6971_v50, %s7517_s19 }
0x2817   :  { %4082 = vrot.lane.b32.xlu1 %v6985_v56, %s7518_s26 }
0x285d   :  { %v3874_v4 = vpop.xlane.xlu0 %3873 }
0x285e   :  { %6235 = vrcp.f32 %v3874_v4 }
0x286b   :  { %v6236_v11 = vpop.eup %6235 }
0x286c   :  { %v3880_v28 = vmul.f32 %v6236_v11, %v6234_v5 }
0x286e   :  { %v3882_v41 = vpack.c.bf16 %v3880_v28, %v3880_v28 }
0x2883   :  { %v3865_v25 = vpop.xlane.xlu1 %3864 }
0x2884   :  { %v3867_v26 = vsub.f32 %v3855_v20, %v3865_v25 }
0x2886   :  { %v3870_v31 = vmul.f32 1.442695, %v3867_v26 }
0x2887   :  { %v3885_v35 = vpop.permute.xlu1 %3884 }
0x2888   :  { %6237 = vpow2.f32 %v3870_v31  ;;  %v3890_v37 = vsel %vm269_vm4, %v3885_v35, 0 }
0x2889   :  { %5944 = vmatpush3.bf16.msra.mxu1 %v3890_v37 }
0x288a   :  { %5955 = vmatprep.subr.bf16.mxu1 %v6301_v1 }
0x288b   :  { %v4035_v38 = vpop.permute.xlu1 %4034 }
0x288c   :  { %5946 = vmatmul.mubr.msk.bf16.vlgmr.msra.gmra.mxu1 %vm239_vm3, %v3882_v41  ;;  %v4040_v43 = vsel %vm143_vm2, %v4035_v38, 0 }
0x288d   :  { %5957 = vmatprep.mubr.msk.bf16.mxu1 %vm6302_vm0, %v6301_v1  ;;  %5956 = vmatpush3.bf16.msra.mxu1 %v3987_v32 }
0x288e   :  { %5967 = vmatprep.subr.bf16.mxu1 %v6301_v1 }
0x288f   :  { %v4085_v51 = vpop.permute.xlu1 %4084 }
0x2890   :  { %v4090_v19 = vsel %vm143_vm2, %v4085_v51, 0 }
0x2893   :  { %v4083_v59 = vpop.permute.xlu1 %4082 }
0x2895   :  { %v6238_v42 = vpop.eup %6237 }
0x2896   :  { %v3875_v9 = vsel %vm239_vm3, %v6238_v42, 0.0 }
0x2897   :  { %3876 = vadd.xlane.f32.xlu0 %v3875_v9 }
0x28ad   :  { %3932 = vrot.lane.b32.xlu0 %v6971_v50, %s7516_s2 }
0x28b1   :  { %4032 = vrot.lane.b32.xlu0 %v6977_v54, %s7518_s26  ;;  %s6326_s26 = smov [#allocation2]  }
0x28b2   :  { %s5156_s20 = sshll.u32 %s6326_s26, 4  ;;  %s5157_s20 = int_to_ptr.vmem [resolvable:$true] %s5156_s20 }
0x28b3   :  { %p6284_p1 = scmp.lt.s32.totalorder %s5157_s20, %s5157_s20 }
0x2920   :  { %v3877_v33 = vpop.xlane.xlu0 %3876 }
0x2921   :  { %6239 = vrcp.f32 %v3877_v33  ;;  %v5278_v33 = vld [vmem:[%s7473_s4 + $0x1a] sm:$0x3] }
0x2924   :  { %v3933_v30 = vpop.permute.xlu0 %3932 }
0x2925   :  { %v3938_v39 = vsel %vm269_vm4, %v3933_v30, 0  ;;  %v4259_v30 = vsel %vm591_vm5, %v5278_v33, 0 }
0x2926   :  { %5950 = vmatpush3.bf16.msra.mxu0 %v3938_v39 }
0x2927   :  { %5961 = vmatprep.subr.bf16.mxu0 %v6301_v1 }
0x2928   :  { %v4033_v44 = vpop.permute.xlu0 %4032 }
0x292e   :  { %v6240_v23 = vpop.eup %6239 }
0x292f   :  { %v3881_v34 = vmul.f32 %v6240_v23, %v6238_v42 }
0x2931   :  { %v3883_v40 = vpack.c.bf16 %v3881_v34, %v3881_v34 }
0x2933   :  { %5952 = vmatmul.mubr.msk.bf16.vlgmr.msra.gmra.mxu0 %vm239_vm3, %v3883_v40 }
0x2934   :  { %5962 = vmatpush3.bf16.xpose.msra.mxu0 %v4040_v43  ;;  %5963 = vmatprep.mubr.msk.bf16.mxu0 %vm6302_vm0, %v6301_v1 }
0x2935   :  { %5973 = vmatprep.subr.bf16.mxu0 %v6301_v1 }
0x293b   :  { %5964 = vmatmul.mubr.msk.bf16.vlgmr.msra.gmra.mxu0 %vm143_vm2, %v4033_v44 }
0x293c   :  { %5975 = vmatprep.mubr.msk.bf16.mxu0 %vm6302_vm0, %v6301_v1 }
0x294c   :  { %v3926_v10 = vpop.f32.mrf.mxu1 }
0x294e   :  { %v5947_v45 = vpop.f32.mrf.mxu1 }
0x2950   :  { %v3929_v47 = vpop.f32.mrf.mxu1 }
0x2952   :  { %v5948_v48 = vpop.f32.mrf.mxu1 }
0x29f3   :  { %v3974_v14 = vpop.f32.mrf.mxu0 }
0x29f4   :  { %v3980_v52 = vpack.c.bf16 %v3974_v14, %v3926_v10 }
0x29f5   :  { %v5953_v53 = vpop.f32.mrf.mxu0 }
0x29f6   :  { %5958 = vmatmul.mubr.msk.bf16.vlgmr.msra.gmra.mxu1 %vm143_vm2, %v3980_v52 }
0x29f7   :  { %5968 = vmatpush3.bf16.xpose.msra.mxu1 %v4090_v19  ;;  %v3977_v55 = vpop.f32.mrf.mxu0  ;;  %5969 = vmatprep.mubr.msk.bf16.mxu1 %vm6302_vm0, %v6301_v1 }
0x29f8   :  { %5979 = vmatprep.subr.bf16.mxu1 %v6301_v1 }
0x29f9   :  { %v5954_v57 = vpop.f32.mrf.mxu0 }
0x29fb   :  { %v4076_v58 = vpop.f32.mrf.mxu0 }
0x29fc   :  { %v4077_v6 = vadd.f32 %v7115_v3, %v4076_v58 }
0x29fd   :  { %v5965_v60 = vpop.f32.mrf.mxu0 }
0x29fe   :  { %5970 = vmatmul.mubr.msk.bf16.vlgmr.msra.gmra.mxu1 %vm143_vm2, %v4083_v59  ;;  %v4132_v61 = vsel %vm239_vm3, %v4077_v6, -inf }
0x29ff   :  { %4133 = vmax.xlane.f32.xlu0 %v4132_v61  ;;  %v4079_v12 = vpop.f32.mrf.mxu0  ;;  %5981 = vmatprep.mubr.msk.bf16.mxu1 %vm6302_vm0, %v6301_v1 }
0x2a01   :  { %v5966_v0 = vpop.f32.mrf.mxu0 }
0x2a88   :  { %v4134_v2 = vpop.xlane.xlu0 %4133 }
0x2a89   :  { %v4138_v5 = vsub.f32 %v4077_v6, %v4134_v2 }
0x2a8b   :  { %v4140_v7 = vmul.f32 1.442695, %v4138_v5 }
0x2a8d   :  { %6241 = vpow2.f32 %v4140_v7 }
0x2a9a   :  { %v6242_v8 = vpop.eup %6241 }
0x2a9b   :  { %v4144_v15 = vsel %vm239_vm3, %v6242_v8, 0.0 }
0x2a9c   :  { %4145 = vadd.xlane.f32.xlu0 %v4144_v15 }
0x2ab6   :  { %v4023_v17 = vpop.f32.mrf.mxu1 }
0x2ab7   :  { %v7266_v62 = vadd.f32 %v4023_v17, %v7214_v13 }
0x2ab8   :  { %v5959_v18 = vpop.f32.mrf.mxu1 }
0x2aba   :  { %v4026_v20 = vpop.f32.mrf.mxu1 }
0x2abb   :  { %v7269_v49 = vadd.f32 %v4026_v20, %v7217_v46 }
0x2abc   :  { %v5960_v63 = vpop.f32.mrf.mxu1 }
0x2abe   :  { %v4126_v21 = vpop.f32.mrf.mxu1 }
0x2abf   :  { %v4127_v24 = vadd.f32 %v7165_v16, %v4126_v21 }
0x2ac0   :  { %v5971_v4 = vpop.f32.mrf.mxu1 }
0x2ac1   :  { %v4135_v11 = vsel %vm239_vm3, %v4127_v24, -inf }
0x2ac2   :  { %4136 = vmax.xlane.f32.xlu1 %v4135_v11  ;;  %v4129_v25 = vpop.f32.mrf.mxu1 }
0x2ac4   :  { %v5972_v26 = vpop.f32.mrf.mxu1 }
0x2ad3   :  { %4156 = vrot.lane.b32.xlu1 %v6967_v22, %s7519_s23 }
0x2ad7   :  { %4306 = vrot.lane.b32.xlu1 %v6967_v22, %s7520_s28 }
0x2adb   :  { %4356 = vrot.lane.b32.xlu1 %v6971_v50, %s7520_s28 }
0x2adf   :  { %4354 = vrot.lane.b32.xlu1 %v6985_v56, %s7521_s29 }
0x2b25   :  { %v4146_v13 = vpop.xlane.xlu0 %4145 }
0x2b26   :  { %6243 = vrcp.f32 %v4146_v13 }
0x2b33   :  { %v6244_v46 = vpop.eup %6243 }
0x2b34   :  { %v4152_v35 = vmul.f32 %v6244_v46, %v6242_v8 }
0x2b36   :  { %v4154_v9 = vpack.c.bf16 %v4152_v35, %v4152_v35 }
0x2b4b   :  { %v4137_v28 = vpop.xlane.xlu1 %4136 }
0x2b4c   :  { %v4139_v31 = vsub.f32 %v4127_v24, %v4137_v28 }
0x2b4e   :  { %v4142_v37 = vmul.f32 1.442695, %v4139_v31 }
0x2b4f   :  { %v4157_v41 = vpop.permute.xlu1 %4156 }
0x2b50   :  { %6245 = vpow2.f32 %v4142_v37  ;;  %v4162_v42 = vsel %vm269_vm4, %v4157_v41, 0 }
0x2b51   :  { %5974 = vmatpush3.bf16.msra.mxu0 %v4162_v42 }
0x2b52   :  { %5985 = vmatprep.subr.bf16.mxu0 %v6301_v1 }
0x2b53   :  { %v4307_v43 = vpop.permute.xlu1 %4306 }
0x2b54   :  { %5976 = vmatmul.mubr.msk.bf16.vlgmr.msra.gmra.mxu0 %vm239_vm3, %v4154_v9  ;;  %v4312_v10 = vsel %vm143_vm2, %v4307_v43, 0 }
0x2b55   :  { %5987 = vmatprep.mubr.msk.bf16.mxu0 %vm6302_vm0, %v6301_v1  ;;  %5986 = vmatpush3.bf16.msra.mxu0 %v4259_v30  ;;  %v5284_v30 = vld [vmem:[%s7473_s4 + $0x1c] sm:$0x3] }
0x2b56   :  { %5997 = vmatprep.subr.bf16.mxu0 %v6301_v1 }
0x2b57   :  { %v4357_v52 = vpop.permute.xlu1 %4356 }
0x2b58   :  { %v4362_v57 = vsel %vm143_vm2, %v4357_v52, 0 }
0x2b5b   :  { %v4355_v61 = vpop.permute.xlu1 %4354 }
0x2b5d   :  { %v6246_v27 = vpop.eup %6245 }
0x2b5e   :  { %v4147_v32 = vsel %vm239_vm3, %v6246_v27, 0.0 }
0x2b5f   :  { %4148 = vadd.xlane.f32.xlu0 %v4147_v32 }
0x2b75   :  { %4204 = vrot.lane.b32.xlu0 %v6971_v50, %s7519_s23 }
0x2b79   :  { %4304 = vrot.lane.b32.xlu0 %v6977_v54, %s7521_s29 }
0x2be8   :  { %v4149_v39 = vpop.xlane.xlu0 %4148 }
0x2be9   :  { %6247 = vrcp.f32 %v4149_v39  ;;  %v4531_v39 = vsel %vm591_vm5, %v5284_v30, 0 }
0x2bec   :  { %v4205_v23 = vpop.permute.xlu0 %4204 }
0x2bed   :  { %v4210_v34 = vsel %vm269_vm4, %v4205_v23, 0 }
0x2bee   :  { %5980 = vmatpush3.bf16.msra.mxu1 %v4210_v34 }
0x2bef   :  { %5991 = vmatprep.subr.bf16.mxu1 %v6301_v1 }
0x2bf0   :  { %v4305_v45 = vpop.permute.xlu0 %4304 }
0x2bf6   :  { %v6248_v38 = vpop.eup %6247 }
0x2bf7   :  { %v4153_v40 = vmul.f32 %v6248_v38, %v6246_v27 }
0x2bf9   :  { %v4155_v44 = vpack.c.bf16 %v4153_v40, %v4153_v40 }
0x2bfb   :  { %5982 = vmatmul.mubr.msk.bf16.vlgmr.msra.gmra.mxu1 %vm239_vm3, %v4155_v44 }
0x2bfc   :  { %5992 = vmatpush3.bf16.xpose.msra.mxu1 %v4312_v10  ;;  %5993 = vmatprep.mubr.msk.bf16.mxu1 %vm6302_vm0, %v6301_v1 }
0x2bfd   :  { %6003 = vmatprep.subr.bf16.mxu1 %v6301_v1 }
0x2c03   :  { %5994 = vmatmul.mubr.msk.bf16.vlgmr.msra.gmra.mxu1 %vm143_vm2, %v4305_v45 }
0x2c04   :  { %6005 = vmatprep.mubr.msk.bf16.mxu1 %vm6302_vm0, %v6301_v1 }
0x2c14   :  { %v4198_v47 = vpop.f32.mrf.mxu0 }
0x2c16   :  { %v5977_v48 = vpop.f32.mrf.mxu0 }
0x2c18   :  { %v4201_v51 = vpop.f32.mrf.mxu0 }
0x2c1a   :  { %v5978_v14 = vpop.f32.mrf.mxu0 }
0x2cbb   :  { %v4246_v53 = vpop.f32.mrf.mxu1 }
0x2cbc   :  { %v4252_v19 = vpack.c.bf16 %v4246_v53, %v4198_v47 }
0x2cbd   :  { %v5983_v55 = vpop.f32.mrf.mxu1 }
0x2cbe   :  { %5988 = vmatmul.mubr.msk.bf16.vlgmr.msra.gmra.mxu0 %vm143_vm2, %v4252_v19 }
0x2cbf   :  { %5998 = vmatpush3.bf16.xpose.msra.mxu0 %v4362_v57  ;;  %v4249_v58 = vpop.f32.mrf.mxu1  ;;  %5999 = vmatprep.mubr.msk.bf16.mxu0 %vm6302_vm0, %v6301_v1 }
0x2cc0   :  { %6009 = vmatprep.subr.bf16.mxu0 %v6301_v1 }
0x2cc1   :  { %v5984_v6 = vpop.f32.mrf.mxu1 }
0x2cc3   :  { %v4348_v59 = vpop.f32.mrf.mxu1 }
0x2cc4   :  { %v4349_v60 = vadd.f32 %v7115_v3, %v4348_v59 }
0x2cc5   :  { %v5995_v12 = vpop.f32.mrf.mxu1 }
0x2cc6   :  { %6000 = vmatmul.mubr.msk.bf16.vlgmr.msra.gmra.mxu0 %vm143_vm2, %v4355_v61  ;;  %v4404_v0 = vsel %vm239_vm3, %v4349_v60, -inf }
0x2cc7   :  { %4405 = vmax.xlane.f32.xlu0 %v4404_v0  ;;  %v4351_v2 = vpop.f32.mrf.mxu1  ;;  %6011 = vmatprep.mubr.msk.bf16.mxu0 %vm6302_vm0, %v6301_v1 }
0x2cc9   :  { %v5996_v5 = vpop.f32.mrf.mxu1 }
0x2d50   :  { %v4406_v7 = vpop.xlane.xlu0 %4405 }
0x2d51   :  { %v4410_v8 = vsub.f32 %v4349_v60, %v4406_v7 }
0x2d53   :  { %v4412_v15 = vmul.f32 1.442695, %v4410_v8 }
0x2d55   :  { %6249 = vpow2.f32 %v4412_v15 }
0x2d62   :  { %v6250_v17 = vpop.eup %6249 }
0x2d63   :  { %v4416_v18 = vsel %vm239_vm3, %v6250_v17, 0.0 }
0x2d64   :  { %4417 = vadd.xlane.f32.xlu0 %v4416_v18 }
0x2d7e   :  { %v4295_v20 = vpop.f32.mrf.mxu0 }
0x2d7f   :  { %v7318_v63 = vadd.f32 %v4295_v20, %v7266_v62 }
0x2d80   :  { %v5989_v21 = vpop.f32.mrf.mxu0 }
0x2d82   :  { %v4298_v24 = vpop.f32.mrf.mxu0 }
0x2d83   :  { %v7321_v4 = vadd.f32 %v4298_v24, %v7269_v49 }
0x2d84   :  { %v5990_v11 = vpop.f32.mrf.mxu0 }
0x2d86   :  { %v4398_v25 = vpop.f32.mrf.mxu0 }
0x2d87   :  { %v4399_v26 = vadd.f32 %v7165_v16, %v4398_v25 }
0x2d88   :  { %v6001_v13 = vpop.f32.mrf.mxu0 }
0x2d89   :  { %v4407_v46 = vsel %vm239_vm3, %v4399_v26, -inf }
0x2d8a   :  { %4408 = vmax.xlane.f32.xlu1 %v4407_v46  ;;  %v4401_v28 = vpop.f32.mrf.mxu0 }
0x2d8c   :  { %v6002_v31 = vpop.f32.mrf.mxu0 }
0x2d9b   :  { %4428 = vrot.lane.b32.xlu1 %v6967_v22, %s7522_s16 }
0x2d9f   :  { %4578 = vrot.lane.b32.xlu1 %v6967_v22, %s7523_s17 }
0x2da3   :  { %4628 = vrot.lane.b32.xlu1 %v6971_v50, %s7523_s17 }
0x2da7   :  { %4626 = vrot.lane.b32.xlu1 %v6985_v56, %s7524_s22 }
0x2ded   :  { %v4418_v62 = vpop.xlane.xlu0 %4417 }
0x2dee   :  { %6251 = vrcp.f32 %v4418_v62 }
0x2dfb   :  { %v6252_v49 = vpop.eup %6251 }
0x2dfc   :  { %v4424_v41 = vmul.f32 %v6252_v49, %v6250_v17 }
0x2dfe   :  { %v4426_v32 = vpack.c.bf16 %v4424_v41, %v4424_v41 }
0x2e13   :  { %v4409_v35 = vpop.xlane.xlu1 %4408 }
0x2e14   :  { %v4411_v37 = vsub.f32 %v4399_v26, %v4409_v35 }
0x2e16   :  { %v4414_v42 = vmul.f32 1.442695, %v4411_v37 }
0x2e17   :  { %v4429_v9 = vpop.permute.xlu1 %4428 }
0x2e18   :  { %6253 = vpow2.f32 %v4414_v42  ;;  %v4434_v27 = vsel %vm269_vm4, %v4429_v9, 0 }
0x2e19   :  { %6004 = vmatpush3.bf16.msra.mxu1 %v4434_v27 }
0x2e1a   :  { %6015 = vmatprep.subr.bf16.mxu1 %v6301_v1 }
0x2e1c   :  { %6006 = vmatmul.mubr.msk.bf16.vlgmr.msra.gmra.mxu1 %vm239_vm3, %v4426_v32  ;;  %v5290_v32 = vld [vmem:[%s7473_s4 + $0x1e] sm:$0x3] }
0x2e1d   :  { %6017 = vmatprep.mubr.msk.bf16.mxu1 %vm6302_vm0, %v6301_v1  ;;  %6016 = vmatpush3.bf16.msra.mxu1 %v4531_v39 }
0x2e1e   :  { %6027 = vmatprep.subr.bf16.mxu1 %v6301_v1 }
0x2e25   :  { %v6254_v56 = vpop.eup %6253 }
0x2e26   :  { %v4419_v33 = vsel %vm239_vm3, %v6254_v56, 0.0 }
0x2e27   :  { %4420 = vadd.xlane.f32.xlu0 %v4419_v33 }
0x2e3d   :  { %4476 = vrot.lane.b32.xlu0 %v6971_v50, %s7522_s16 }
0x2e41   :  { %4576 = vrot.lane.b32.xlu0 %v6977_v54, %s7524_s22  ;;  %v4579_v54 = vpop.permute.xlu1 %4578 }
0x2e42   :  { %v4584_v10 = vsel %vm143_vm2, %v4579_v54, 0 }
0x2e45   :  { %v4629_v52 = vpop.permute.xlu1 %4628 }
0x2e46   :  { %v4634_v57 = vsel %vm143_vm2, %v4629_v52, 0 }
0x2e49   :  { %v4627_v61 = vpop.permute.xlu1 %4626 }
0x2eb0   :  { %v4421_v23 = vpop.xlane.xlu0 %4420 }
0x2eb1   :  { %6255 = vrcp.f32 %v4421_v23 }
0x2eb4   :  { %v4477_v34 = vpop.permute.xlu0 %4476 }
0x2eb5   :  { %v4482_v38 = vsel %vm269_vm4, %v4477_v34, 0 }
0x2eb6   :  { %6010 = vmatpush3.bf16.msra.mxu0 %v4482_v38 }
0x2eb7   :  { %6021 = vmatprep.subr.bf16.mxu0 %v6301_v1 }
0x2eb8   :  { %v4577_v45 = vpop.permute.xlu0 %4576 }
0x2ebe   :  { %v6256_v40 = vpop.eup %6255 }
0x2ebf   :  { %v4425_v43 = vmul.f32 %v6256_v40, %v6254_v56  ;;  %v4803_v56 = vsel %vm591_vm5, %v5290_v32, 0 }
0x2ec1   :  { %v4427_v44 = vpack.c.bf16 %v4425_v43, %v4425_v43 }
0x2ec3   :  { %6012 = vmatmul.mubr.msk.bf16.vlgmr.msra.gmra.mxu0 %vm239_vm3, %v4427_v44 }
0x2ec4   :  { %6022 = vmatpush3.bf16.xpose.msra.mxu0 %v4584_v10  ;;  %6023 = vmatprep.mubr.msk.bf16.mxu0 %vm6302_vm0, %v6301_v1 }
0x2ec5   :  { %6033 = vmatprep.subr.bf16.mxu0 %v6301_v1 }
0x2ecb   :  { %6024 = vmatmul.mubr.msk.bf16.vlgmr.msra.gmra.mxu0 %vm143_vm2, %v4577_v45 }
0x2ecc   :  { %6035 = vmatprep.mubr.msk.bf16.mxu0 %vm6302_vm0, %v6301_v1 }
0x2edc   :  { %v4470_v47 = vpop.f32.mrf.mxu1 }
0x2ede   :  { %v6007_v48 = vpop.f32.mrf.mxu1 }
0x2ee0   :  { %v4473_v51 = vpop.f32.mrf.mxu1 }
0x2ee2   :  { %v6008_v14 = vpop.f32.mrf.mxu1 }
0x2ee3   :  { %v5293_v14 = vld [vmem:[%s7474_s5 + $0x1] ss:$0 sm:$0xff] }
0x2f83   :  { %v4518_v53 = vpop.f32.mrf.mxu0 }
0x2f84   :  { %v4524_v19 = vpack.c.bf16 %v4518_v53, %v4470_v47 }
0x2f85   :  { %v6013_v55 = vpop.f32.mrf.mxu0 }
0x2f86   :  { %6018 = vmatmul.mubr.msk.bf16.vlgmr.msra.gmra.mxu1 %vm143_vm2, %v4524_v19 }
0x2f87   :  { %6028 = vmatpush3.bf16.xpose.msra.mxu1 %v4634_v57  ;;  %v4521_v58 = vpop.f32.mrf.mxu0  ;;  %6029 = vmatprep.mubr.msk.bf16.mxu1 %vm6302_vm0, %v6301_v1 }
0x2f88   :  { %6039 = vmatprep.subr.bf16.mxu1 %v6301_v1 }
0x2f89   :  { %v6014_v6 = vpop.f32.mrf.mxu0 }
0x2f8b   :  { %v4620_v59 = vpop.f32.mrf.mxu0 }
0x2f8c   :  { %v4621_v60 = vadd.f32 %v7115_v3, %v4620_v59 }
0x2f8d   :  { %v6025_v12 = vpop.f32.mrf.mxu0 }
0x2f8e   :  { %6030 = vmatmul.mubr.msk.bf16.vlgmr.msra.gmra.mxu1 %vm143_vm2, %v4627_v61  ;;  %v4676_v0 = vsel %vm239_vm3, %v4621_v60, -inf }
0x2f8f   :  { %4677 = vmax.xlane.f32.xlu0 %v4676_v0  ;;  %v4623_v2 = vpop.f32.mrf.mxu0  ;;  %6041 = vmatprep.mubr.msk.bf16.mxu1 %vm6302_vm0, %v6301_v1 }
0x2f91   :  { %v6026_v5 = vpop.f32.mrf.mxu0 }
0x3018   :  { %v4678_v7 = vpop.xlane.xlu0 %4677 }
0x3019   :  { %v4682_v8 = vsub.f32 %v4621_v60, %v4678_v7 }
0x301b   :  { %v4684_v15 = vmul.f32 1.442695, %v4682_v8 }
0x301d   :  { %6257 = vpow2.f32 %v4684_v15 }
0x302a   :  { %v6258_v17 = vpop.eup %6257 }
0x302b   :  { %v4688_v18 = vsel %vm239_vm3, %v6258_v17, 0.0 }
0x302c   :  { %4689 = vadd.xlane.f32.xlu0 %v4688_v18 }
0x3046   :  { %v4567_v3 = vpop.f32.mrf.mxu1 }
0x3047   :  { %v4574_v20 = vadd.f32 %v4567_v3, %v7318_v63 }
0x3048   :  { %v6019_v21 = vpop.f32.mrf.mxu1 }
0x3049   :  { %v6121_v21 = vld [vmem:[%s7477_s8 + $0x78] sm:$0xff]  }
0x304a   :  { %v4570_v24 = vpop.f32.mrf.mxu1 }
0x304b   :  { %v4575_v11 = vadd.f32 %v4570_v24, %v7321_v4  ;;  %v6122_v24 = vld [vmem:[%s7477_s8 + $0x70] sm:$0xff]  }
0x304c   :  { %v6020_v25 = vpop.f32.mrf.mxu1 }
0x304d   :  { %v6124_v25 = vld [vmem:[%s7477_s8 + $0x60] sm:$0xff]  }
0x304e   :  { %v4670_v26 = vpop.f32.mrf.mxu1 }
0x304f   :  { %v4671_v13 = vadd.f32 %v7165_v16, %v4670_v26  ;;  %v6125_v26 = vld [vmem:[%s7477_s8 + $0x58] sm:$0xff]  }
0x3050   :  { %v6031_v46 = vpop.f32.mrf.mxu1 }
0x3051   :  { %v4679_v28 = vsel %vm239_vm3, %v4671_v13, -inf }
0x3052   :  { %4680 = vmax.xlane.f32.xlu1 %v4679_v28  ;;  %v4673_v31 = vpop.f32.mrf.mxu1 }
0x3054   :  { %v6032_v62 = vpop.f32.mrf.mxu1 }
0x3063   :  { %4700 = vrot.lane.b32.xlu1 %v6967_v22, %s7525_s27 }
0x30b5   :  { %v4690_v49 = vpop.xlane.xlu0 %4689 }
0x30b6   :  { %6259 = vrcp.f32 %v4690_v49 }
0x30c3   :  { %v6260_v63 = vpop.eup %6259 }
0x30c4   :  { %v4696_v41 = vmul.f32 %v6260_v63, %v6258_v17 }
0x30c6   :  { %v4698_v9 = vpack.c.bf16 %v4696_v41, %v4696_v41 }
0x30db   :  { %v4681_v35 = vpop.xlane.xlu1 %4680 }
0x30dc   :  { %v4683_v37 = vsub.f32 %v4671_v13, %v4681_v35 }
0x30de   :  { %v4686_v4 = vmul.f32 1.442695, %v4683_v37  ;;  %v5296_v37 = vld [vmem:[%s7479_s10 + $0x1] ss:$0 sm:$0xff] }
0x30df   :  { %v4701_v42 = vpop.permute.xlu1 %4700 }
0x30e0   :  { %6261 = vpow2.f32 %v4686_v4  ;;  %v4706_v16 = vsel %vm269_vm4, %v4701_v42, 0 }
0x30e1   :  { %6034 = vmatpush3.bf16.msra.mxu0 %v4706_v16  ;;  %v5297_v16 = vld [vmem:[%s7480_s11 + $0x1] ss:$0 sm:$0xff] }
0x30e2   :  { %6045 = vmatprep.subr.bf16.mxu0 %v6301_v1 }
0x30e4   :  { %6036 = vmatmul.mubr.msk.bf16.vlgmr.msra.gmra.mxu0 %vm239_vm3, %v4698_v9 }
0x30e5   :  { %6047 = vmatprep.mubr.msk.bf16.mxu0 %vm6302_vm0, %v6301_v1  ;;  %6046 = vmatpush3.bf16.msra.mxu0 %v4803_v56  ;;  %v6126_v56 = vld [vmem:[%s7477_s8 + $0x50] sm:$0xff]  }
0x30e6   :  { %6059 = vmatprep.subr.bf16.mxu0 %v6301_v1 }
0x30ed   :  { %v6262_v22 = vpop.eup %6261 }
0x30ee   :  { %v4691_v27 = vsel %vm239_vm3, %v6262_v22, 0.0 }
0x30ef   :  { %4692 = vadd.xlane.f32.xlu0 %v4691_v27 }
0x3105   :  { %4748 = vrot.lane.b32.xlu0 %v6971_v50, %s7525_s27 }
0x3178   :  { %v4693_v33 = vpop.xlane.xlu0 %4692 }
0x3179   :  { %6263 = vrcp.f32 %v4693_v33  ;;  %v6127_v33 = vld [vmem:[%s7477_s8 + $0x48] sm:$0xff]  }
0x317c   :  { %v4749_v30 = vpop.permute.xlu0 %4748 }
0x317d   :  { %v4754_v39 = vsel %vm269_vm4, %v4749_v30, 0  ;;  %v6128_v30 = vld [vmem:[%s7477_s8 + $0x40] sm:$0xff]  }
0x317e   :  { %6040 = vmatpush3.bf16.msra.mxu1 %v4754_v39  ;;  %v5303_v39 = vld [vmem:[%s7476_s7 + $0x1] ss:$0 sm:$0xff] }
0x317f   :  { %6051 = vmatprep.subr.bf16.mxu1 %v6301_v1 }
0x3186   :  { %v6264_v23 = vpop.eup %6263 }
0x3187   :  { %v4697_v34 = vmul.f32 %v6264_v23, %v6262_v22 }
0x3189   :  { %v4699_v50 = vpack.c.bf16 %v4697_v34, %v4697_v34 }
0x318b   :  { %6042 = vmatmul.mubr.msk.bf16.vlgmr.msra.gmra.mxu1 %vm239_vm3, %v4699_v50 }
0x318c   :  { %6055 = vmatprep.mubr.msk.bf16.mxu1 %vm6302_vm0, %v6301_v1 }
0x31a4   :  { %v4742_v38 = vpop.f32.mrf.mxu0 }
0x31a6   :  { %v6037_v40 = vpop.f32.mrf.mxu0 }
0x31a8   :  { %v4745_v43 = vpop.f32.mrf.mxu0 }
0x31aa   :  { %v6038_v54 = vpop.f32.mrf.mxu0 }
0x324b   :  { %v4790_v44 = vpop.f32.mrf.mxu1 }
0x324c   :  { %v4796_v10 = vpack.c.bf16 %v4790_v44, %v4742_v38 }
0x324d   :  { %v6043_v45 = vpop.f32.mrf.mxu1 }
0x324e   :  { %6048 = vmatmul.mubr.msk.bf16.vlgmr.msra.gmra.mxu0 %vm143_vm2, %v4796_v10 }
0x324f   :  { %v4793_v47 = vpop.f32.mrf.mxu1  ;;  %6075 = vmatprep.mubr.msk.bf16.mxu0 %vm6302_vm0, %v6301_v1  ;;  %6060 = vmatpush3.bf16.msra.mxu0 %v6121_v21 }
0x3250   :  { %6061 = vmatprep.subr.bf16.mxu0 %v6301_v1 }
0x3251   :  { %v6044_v48 = vpop.f32.mrf.mxu1 }
0x3253   :  { %6062 = vmatpush3.bf16.msra.mxu0 %v6122_v24  ;;  %v5336_v24 = vld [vmem:[%s7482_s13 + $0x1] ss:$0 sm:$0xff] }
0x3254   :  { %6063 = vmatprep.subr.bf16.mxu0 %v6301_v1 }
0x330e   :  { %v4839_v51 = vpop.f32.mrf.mxu0 }
0x330f   :  { %v4846_v52 = vadd.f32 %v4839_v51, %v4574_v20  ;;  %v6120_v20 = vld [vmem:[%s7475_s6 + $0x10] sm:$0xff]  }
0x3310   :  { %v6049_v53 = vpop.f32.mrf.mxu0 }
0x3311   :  { %v4856_v19 = vadd.f32 %v5293_v14, %v4846_v52 }
0x3312   :  { %v4842_v55 = vpop.f32.mrf.mxu0 }
0x3313   :  { %v4847_v57 = vadd.f32 %v4842_v55, %v4575_v11  ;;  %v4858_v58 = vadd.f32 %v4856_v19, %v6955_v36  ;;  %v6123_v11 = vld [vmem:[%s7477_s8 + $0x68] sm:$0xff]  }
0x3314   :  { %v6050_v6 = vpop.f32.mrf.mxu0  ;;  %6064 = vmatpush3.bf16.msra.mxu0 %v6123_v11 }
0x3315   :  { %v4857_v59 = vadd.f32 %v5293_v14, %v4847_v57  ;;  %v4864_v60 = vsel %vm77_vm1, %v4858_v58, 0.0  ;;  %6065 = vmatprep.subr.bf16.mxu0 %v6301_v1 }
0x3316   :  { %4865 = vadd.xlane.f32.xlu1 %v4864_v60 }
0x3317   :  { %v4859_v61 = vadd.f32 %v4857_v59, %v6957_v29  ;;  %v6119_v29 = vld [vmem:[%s7475_s6 + $0x18] sm:$0xff]  }
0x3318   :  { %6052 = vmatpush3.bf16.msra.mxu1 %v6119_v29  ;;  %6066 = vmatpush3.bf16.msra.mxu0 %v6124_v25 }
0x3319   :  { %v4867_v12 = vsel %vm77_vm1, %v4859_v61, 0.0  ;;  %6053 = vmatprep.subr.bf16.mxu1 %v6301_v1  ;;  %6067 = vmatprep.subr.bf16.mxu0 %v6301_v1 }
0x331a   :  { %4868 = vadd.xlane.f32.xlu0 %v4867_v12 }
0x331c   :  { %6054 = vmatpush3.bf16.msra.mxu1 %v6120_v20  ;;  %6068 = vmatpush3.bf16.msra.mxu0 %v6125_v26  ;;  %v5335_v20 = vld [vmem:[%s7481_s12 + $0x1] ss:$0 sm:$0xff]  ;;  %s6279_s12 = scalar_lea.vmem %s5157_s20, 32 }
0x331d   :  { %6069 = vmatprep.subr.bf16.mxu0 %v6301_v1  ;;  %p6280_p0 = scmp.ne.s32.totalorder %s5157_s20, %s6279_s12  ;;  %p6285_p2 = scmp.lt.s32.totalorder %s6279_s12, %s6279_s12 }
0x331f   :  { %p6286_p3 = por %p6285_p2, %p6284_p1 }
0x3320   :  { %6070 = vmatpush3.bf16.msra.mxu0 %v6126_v56 }
0x3321   :  { %6071 = vmatprep.subr.bf16.mxu0 %v6301_v1  ;;  %p6287_p4 = pnand %p6286_p3, %p6280_p0 }
0x3324   :  { %6072 = vmatpush3.bf16.msra.mxu0 %v6127_v33 }
0x3325   :  { %6073 = vmatprep.subr.bf16.mxu0 %v6301_v1  ;;  %v5324_v1 = vld [vmem:[%s7478_s9 + $0x1] ss:$0 sm:$0xff] }
0x3328   :  { %6074 = vmatpush3.bf16.msra.mxu0 %v6128_v30 }
0x339f   :  { %v4866_v0 = vpop.xlane.xlu1 %4865 }
0x33a0   :  { %v4870_v2 = vmul.f32 0.03125, %v4866_v0 }
0x33a2   :  { %v4872_v5 = vsub.f32 %v4858_v58, %v4870_v2 }
0x33a3   :  { %v4869_v7 = vpop.xlane.xlu0 %4868 }
0x33a4   :  { %v4871_v8 = vmul.f32 0.03125, %v4869_v7  ;;  %v4874_v15 = vmul.f32 %v4872_v5, %v4872_v5 }
0x33a6   :  { %v4873_v17 = vsub.f32 %v4859_v61, %v4871_v8  ;;  %v4876_v18 = vsel %vm77_vm1, %v4874_v15, 0.0 }
0x33a7   :  { %4877 = vadd.xlane.f32.xlu1 %v4876_v18 }
0x33a8   :  { %v4875_v36 = vmul.f32 %v4873_v17, %v4873_v17 }
0x33aa   :  { %v4879_v3 = vsel %vm77_vm1, %v4875_v36, 0.0 }
0x33ab   :  { %4880 = vadd.xlane.f32.xlu0 %v4879_v3 }
0x3430   :  { %v4878_v13 = vpop.xlane.xlu1 %4877 }
0x3431   :  { %v4882_v46 = vmul.f32 0.03125, %v4878_v13 }
0x3433   :  { %v4884_v28 = vadd.f32 1e-05, %v4882_v46 }
0x3434   :  { %v4881_v31 = vpop.xlane.xlu0 %4880 }
0x3435   :  { %6265 = vrsqrt.f32 %v4884_v28  ;;  %v4883_v62 = vmul.f32 0.03125, %v4881_v31 }
0x3437   :  { %v4885_v49 = vadd.f32 1e-05, %v4883_v62 }
0x3439   :  { %6267 = vrsqrt.f32 %v4885_v49 }
0x3442   :  { %v6266_v63 = vpop.eup %6265 }
0x3443   :  { %v4888_v35 = vmul.f32 %v6266_v63, %v4872_v5 }
0x3445   :  { %v4896_v4 = vmul.f32 %v5296_v37, %v4888_v35 }
0x3446   :  { %v6268_v41 = vpop.eup %6267 }
0x3447   :  { %v4889_v42 = vmul.f32 %v6268_v41, %v4873_v17  ;;  %v4904_v22 = vadd.f32 %v5297_v16, %v4896_v4 }
0x3449   :  { %v4897_v9 = vmul.f32 %v5296_v37, %v4889_v42 }
0x344b   :  { %v4905_v27 = vadd.f32 %v5297_v16, %v4897_v9 }
0x344d   :  { %v4906_v32 = vpack.c.bf16 %v4905_v27, %v4904_v22 }
0x344f   :  { %6056 = vmatmul.mubr.msk.bf16.vlgmr.msra.gmra.mxu1 %vm77_vm1, %v4906_v32 }
0x350f   :  { %v4969_v23 = vpop.f32.mrf.mxu1 }
0x3510   :  { %v4970_v50 = vadd.f32 %v5303_v39, %v4969_v23 }
0x3511   :  { %v6057_v34 = vpop.f32.mrf.mxu1 }
0x3512   :  { %v4976_v54 = vmax.f32 %v4970_v50, 0.0 }
0x3513   :  { %v4972_v38 = vpop.f32.mrf.mxu1 }
0x3514   :  { %v4973_v40 = vadd.f32 %v5303_v39, %v4972_v38 }
0x3515   :  { %v6058_v43 = vpop.f32.mrf.mxu1 }
0x3516   :  { %v4977_v44 = vmax.f32 %v4973_v40, 0.0 }
0x3518   :  { %v4978_v10 = vpack.c.bf16 %v4977_v44, %v4976_v54 }
0x351a   :  { %6076 = vmatmul.mubr.bf16.vlgmr.msra.gmra.mxu0 %v4978_v10 }
0x35da   :  { %v5086_v45 = vpop.f32.mrf.mxu0 }
0x35db   :  { %v5087_v47 = vadd.f32 %v5324_v1, %v5086_v45 }
0x35dc   :  { %v6077_v48 = vpop.f32.mrf.mxu0 }
0x35dd   :  { %v5093_v51 = vadd.f32 %v5087_v47, %v4904_v22 }
0x35de   :  { %v5089_v14 = vpop.f32.mrf.mxu0 }
0x35df   :  { %v5090_v52 = vadd.f32 %v5324_v1, %v5089_v14  ;;  %v5099_v53 = vsel %vm77_vm1, %v5093_v51, 0.0 }
0x35e0   :  { %5100 = vadd.xlane.f32.xlu0 %v5099_v53  ;;  %v6078_v19 = vpop.f32.mrf.mxu0 }
0x35e1   :  { %v5094_v55 = vadd.f32 %v5090_v52, %v4905_v27 }
0x35e3   :  { %v5102_v57 = vsel %vm77_vm1, %v5094_v55, 0.0 }
0x35e4   :  { %5103 = vadd.xlane.f32.xlu1 %v5102_v57 }
0x3669   :  { %v5101_v58 = vpop.xlane.xlu0 %5100 }
0x366a   :  { %v5105_v6 = vmul.f32 0.03125, %v5101_v58 }
0x366c   :  { %v5107_v59 = vsub.f32 %v5093_v51, %v5105_v6 }
0x366d   :  { %v5104_v60 = vpop.xlane.xlu1 %5103 }
0x366e   :  { %v5106_v61 = vmul.f32 0.03125, %v5104_v60  ;;  %v5109_v12 = vmul.f32 %v5107_v59, %v5107_v59 }
0x3670   :  { %v5108_v0 = vsub.f32 %v5094_v55, %v5106_v61  ;;  %v5111_v2 = vsel %vm77_vm1, %v5109_v12, 0.0 }
0x3671   :  { %5112 = vadd.xlane.f32.xlu0 %v5111_v2 }
0x3672   :  { %v5110_v5 = vmul.f32 %v5108_v0, %v5108_v0 }
0x3674   :  { %v5114_v7 = vsel %vm77_vm1, %v5110_v5, 0.0 }
0x3675   :  { %5115 = vadd.xlane.f32.xlu1 %v5114_v7 }
0x36fa   :  { %v5113_v8 = vpop.xlane.xlu0 %5112 }
0x36fb   :  { %v5117_v15 = vmul.f32 0.03125, %v5113_v8 }
0x36fd   :  { %v5119_v17 = vadd.f32 1e-05, %v5117_v15 }
0x36fe   :  { %v5116_v18 = vpop.xlane.xlu1 %5115 }
0x36ff   :  { %6269 = vrsqrt.f32 %v5119_v17  ;;  %v5118_v36 = vmul.f32 0.03125, %v5116_v18 }
0x3701   :  { %v5120_v3 = vadd.f32 1e-05, %v5118_v36 }
0x3703   :  { %6271 = vrsqrt.f32 %v5120_v3 }
0x370c   :  { %v6270_v29 = vpop.eup %6269 }
0x370d   :  { %v5123_v21 = vmul.f32 %v6270_v29, %v5107_v59 }
0x370f   :  { %v5131_v11 = vmul.f32 %v5335_v20, %v5123_v21 }
0x3710   :  { %v6272_v25 = vpop.eup %6271 }
0x3711   :  { %v5124_v26 = vmul.f32 %v6272_v25, %v5108_v0  ;;  %v5139_v13 = vadd.f32 %v5336_v24, %v5131_v11 }
0x3713   :  { %v5132_v46 = vmul.f32 %v5335_v20, %v5124_v26  ;;  %5147 = vst.msk [vmem:[#allocation2 - $0x7] sm:$0x80] %vm5146_vm6, %v5139_v13 }
0x3715   :  { %v5140_v28 = vadd.f32 %v5336_v24, %v5132_v46 }
0x3717   :  { %v5143_v31 = vrot.slane %v5140_v28, 7 }
0x3719   :  { %5149 = vst.msk [vmem:[#allocation2 + $0x1] sm:$0x1] %vm5148_vm7, %v5143_v31 }
0x371a   :  { %6290 = shalt.err (!%p6287_p4)
}
0x371b   :  { %5159 = dma.vmem_to_hbm [thread:$0]  %s5157_s20, 32, %s7483_s14, [#allocation3]  }
0x371c   :  { %6299 = dma.done.wait [#allocation3], 32  }
0x371d   :  { %6300 = vsyncadd [#allocation3], 4294967264 }
0x371e   :  { %5163 = vsyncpa [#allocation3], 1 }

</bundles_post_ra>
